<compile_context>
chip_gen: v6e
topology: v6e:2x2x1
jax: 0.10.0
libtpu: 0.0.40
codegen_flags: <defaults>
</compile_context>

<pallas_src>
import functools
import math

import jax
import jax.numpy as jnp
from jax.experimental import pallas as pl
from jax.experimental.pallas import tpu as pltpu

_BF16 = jnp.bfloat16
_F32 = jnp.float32


def _mxu(a, b):
    """MXU matmul: bf16 operands, f32 accumulation."""
    return jnp.dot(a.astype(_BF16), b.astype(_BF16), preferred_element_type=_F32)


# ----------------------------------------------------------------- shared per-head GAT math
def _gat_head(h, we, ssrc, sdst, maskb,
              embed, asrc, adst, aedge, wtz, wte, ews, ewd, ewe):
    """One attention head of one GAT layer (all intermediates stay in VMEM/vregs)."""
    # embed_node + in-kernel src/dst gathers (one-hot incidence matmuls)
    z = _mxu(h, embed)                      # [N, D]
    z_src = _mxu(ssrc, z)                   # [E, D]
    z_dst = _mxu(sdst, z)                   # [E, D]

    # attn_fc([z_src | z_dst | w]) decomposed -> VPU multiply + lane reduce (no concat)
    logit = (jnp.sum(z_src * asrc, axis=-1, keepdims=True)
             + jnp.sum(z_dst * adst, axis=-1, keepdims=True)
             + jnp.sum(we * aedge, axis=-1, keepdims=True))          # [E, 1]
    e_att = jnp.where(logit >= 0.0, logit, 0.1 * logit)              # LeakyReLU(0.1)

    # to_node_fc([z_src | w]) decomposed
    t = _mxu(z_src, wtz) + _mxu(we, wte)                             # [E, D]

    # masked per-destination softmax over incoming edges
    # TODO(synk): DGL's UDF reduce leaves h = embed(h) for zero-in-degree nodes; here such
    #             nodes produce 0 (test graph has in-degree 2 everywhere, so unaffected).
    e_row = jnp.broadcast_to(e_att[:, 0][None, :], maskb.shape)      # [N, E]
    scores = jnp.where(maskb, e_row, jnp.full_like(e_row, -1e30))
    m = jnp.max(scores, axis=-1, keepdims=True)
    p = jnp.where(maskb, jnp.exp(scores - m), 0.0)
    denom = jnp.maximum(jnp.sum(p, axis=-1, keepdims=True), 1e-20)
    alpha = p * pl.reciprocal(denom, approx=True)                    # [N, E]

    h_new = _mxu(alpha, t)                                           # [N, D]

    # edge_calc: edge_linear([h_src_new | h_dst_new | w]) decomposed (uses pre-ELU h_new)
    hn_src = _mxu(ssrc, h_new)
    hn_dst = _mxu(sdst, h_new)
    w_new = _mxu(hn_src, ews) + _mxu(hn_dst, ewd) + _mxu(we, ewe)    # [E, Eo]
    return h_new, w_new


# -------------------------------------------------- hidden GAT layer (flatten merge + ELU)
def _gat_hidden_kernel(h_ref, we_ref, ssrc_ref, sdst_ref, mask_ref,
                       embed_ref, asrc_ref, adst_ref, aedge_ref,
                       wtz_ref, wte_ref, ews_ref, ewd_ref, ewe_ref,
                       hout_ref, wout_ref):
    maskb = mask_ref[...] > 0.5
    h_new, w_new = _gat_head(h_ref[...], we_ref[...], ssrc_ref[...], sdst_ref[...], maskb,
                             embed_ref[...], asrc_ref[...], adst_ref[...], aedge_ref[...],
                             wtz_ref[...], wte_ref[...],
                             ews_ref[...], ewd_ref[...], ewe_ref[...])
    wout_ref[...] = w_new
    # F.elu fused; flatten (torch.cat over heads, dim=1) handled by the output BlockSpec.
    hout_ref[...] = jnp.where(h_new > 0.0, h_new, jnp.exp(h_new) - 1.0)


# ------------------------------ final GAT layer + mean merge + readout + prediction heads
def _gat_final_kernel(h_ref, we_ref, ssrc_ref, sdst_ref, mask_ref,
                      embed_ref, asrc_ref, adst_ref, aedge_ref,
                      wtz_ref, wte_ref, ews_ref, ewd_ref, ewe_ref,
                      lh1w_ref, lh1b_ref, lh2w_ref, lh2b_ref,
                      le1hw_ref, le1ew_ref, le1b_ref, le2w_ref, le2b_ref,
                      hpred_ref, epred_ref,
                      hm_acc, em_acc, *, num_heads):
    hd = pl.program_id(0)

    @pl.when(hd == 0)
    def _():
        hm_acc[...] = jnp.zeros_like(hm_acc)
        em_acc[...] = jnp.zeros_like(em_acc)

    maskb = mask_ref[...] > 0.5
    h_new, w_new = _gat_head(h_ref[...], we_ref[...], ssrc_ref[...], sdst_ref[...], maskb,
                             embed_ref[...], asrc_ref[...], adst_ref[...], aedge_ref[...],
                             wtz_ref[...], wte_ref[...],
                             ews_ref[...], ewd_ref[...], ewe_ref[...])
    inv_h = 1.0 / num_heads
    hm_acc[...] += h_new * inv_h          # merge='mean' over heads (accumulate in VMEM)
    em_acc[...] += w_new * inv_h

    @pl.when(hd == num_heads - 1)
    def _():
        hm = hm_acc[...]                                              # [N, 128]
        em = em_acc[...]                                              # [E, 128]
        # graph readout: dgl.mean_nodes
        h_read = jnp.mean(hm, axis=0, keepdims=True)                  # [1, 128]

        # TODO(synk): nn.Dropout(0.2) is inference-mode identity here (no stochastic drop).
        # linear_h: Linear(128,32)+ReLU+Linear(32,3) (second layer lane-padded to 128)
        t1 = jnp.maximum(_mxu(h_read, lh1w_ref[...]) + lh1b_ref[...], 0.0)   # [1, 32]
        hpred_ref[...] = _mxu(t1, lh2w_ref[...]) + lh2b_ref[...]             # [1, 128]

        # linear_e on cat([broadcast(h_read), e]) decomposed (no 256-wide concat)
        r = _mxu(h_read, le1hw_ref[...])                                      # [1, 32]
        t2 = jnp.maximum(_mxu(em, le1ew_ref[...]) + r + le1b_ref[...], 0.0)   # [E, 32]
        epred_ref[...] = _mxu(t2, le2w_ref[...]) + le2b_ref[...]              # [E, 128]


# --------------------------------------------------------------------------- layer wrappers
def _layer_in_specs(n, fin, e, de, d, e_out):
    def shared(shape):
        return pl.BlockSpec(shape, lambda hd: (0,) * len(shape))

    def per_head(shape):  # shape excludes the (squeezed) head axis
        return pl.BlockSpec((None,) + shape, lambda hd: (hd,) + (0,) * len(shape))

    specs = [
        shared((n, fin)), shared((e, de)), shared((e, n)), shared((e, n)),
        shared((n, e)),
        per_head((fin, d)), per_head((1, d)), per_head((1, d)), per_head((1, de)),
        per_head((d, d)), per_head((de, d)),
        per_head((d, e_out)), per_head((d, e_out)), per_head((de, e_out)),
    ]
    return specs, shared


def gat_hidden_layer(h, w_e, graph, lp):
    """One multi-head GAT layer with merge='flatten' + fused F.elu (ONE pallas_call)."""
    s_src, s_dst, mask = graph
    n, fin = h.shape
    e, de = w_e.shape
    heads, _, d = lp["embed"].shape
    e_out = lp["ew_src"].shape[2]
    in_specs, _ = _layer_in_specs(n, fin, e, de, d, e_out)

    grid_spec = pltpu.PrefetchScalarGridSpec(
        num_scalar_prefetch=0,
        grid=(heads,),
        in_specs=in_specs,
        # flatten merge: head hd writes column block hd of the [N, H*D] / [E, H*Eo] outputs
        out_specs=(pl.BlockSpec((n, d), lambda hd: (0, hd)),
                   pl.BlockSpec((e, e_out), lambda hd: (0, hd))),
    )
    return pl.pallas_call(
        _gat_hidden_kernel,
        out_shape=(jax.ShapeDtypeStruct((n, heads * d), _F32),
                   jax.ShapeDtypeStruct((e, heads * e_out), _F32)),
        grid_spec=grid_spec,
        compiler_params=pltpu.CompilerParams(dimension_semantics=("parallel",)),
    )(h.astype(_F32), w_e.astype(_F32), s_src, s_dst, mask,
      lp["embed"], lp["a_src"], lp["a_dst"], lp["a_edge"],
      lp["wt_z"], lp["wt_e"], lp["ew_src"], lp["ew_dst"], lp["ew_edge"])


def gat_final_predict(params, h, w_e, graph):
    """Last GAT layer + mean merge + graph readout + linear_h/linear_e (ONE pallas_call)."""
    lp = params["gat"][-1]
    s_src, s_dst, mask = graph
    n, fin = h.shape
    e, de = w_e.shape
    heads, _, d = lp["embed"].shape
    e_out = lp["ew_src"].shape[2]
    in_specs, shared = _layer_in_specs(n, fin, e, de, d, e_out)
    in_specs += [
        shared((128, 32)), shared((1, 32)), shared((32, 128)), shared((1, 128)),
        shared((128, 32)), shared((128, 32)), shared((1, 32)),
        shared((32, 128)), shared((1, 128)),
    ]

    grid_spec = pltpu.PrefetchScalarGridSpec(
        num_scalar_prefetch=0,
        grid=(heads,),
        in_specs=in_specs,
        out_specs=(pl.BlockSpec((1, 128), lambda hd: (0, 0)),
                   pl.BlockSpec((e, 128), lambda hd: (0, 0))),
        scratch_shapes=[pltpu.VMEM((n, d), _F32),       # mean-merged node features
                        pltpu.VMEM((e, e_out), _F32)],  # mean-merged edge features
    )
    hp, ep = pl.pallas_call(
        functools.partial(_gat_final_kernel, num_heads=heads),
        out_shape=(jax.ShapeDtypeStruct((1, 128), _F32),
                   jax.ShapeDtypeStruct((e, 128), _F32)),
        grid_spec=grid_spec,
        compiler_params=pltpu.CompilerParams(dimension_semantics=("arbitrary",)),
    )(h.astype(_F32), w_e.astype(_F32), s_src, s_dst, mask,
      lp["embed"], lp["a_src"], lp["a_dst"], lp["a_edge"],
      lp["wt_z"], lp["wt_e"], lp["ew_src"], lp["ew_dst"], lp["ew_edge"],
      params["lh1_wT"], params["lh1_b"], params["lh2_wT_pad"], params["lh2_b_pad"],
      params["le1h_wT"], params["le1e_wT"], params["le1_b"],
      params["le2_wT_pad"], params["le2_b_pad"])
    return hp[:, :3], ep[:, :1]   # slice lane-padded outputs back to [1,3] / [E,1]


def gatnet_forward(params, h, w_e, graph):
    num_layers = len(params["gat"])
    for l in range(num_layers - 1):
        h, w_e = gat_hidden_layer(h, w_e, graph, params["gat"][l])
    return gat_final_predict(params, h, w_e, graph)


# --------------------------------------------------------------------------- params / graph
def _init_w(key, out_dim, in_dim):
    # torch.nn.Linear default U(-1/sqrt(in), 1/sqrt(in)); stored transposed [in, out]
    bound = 1.0 / math.sqrt(in_dim)
    return jax.random.uniform(key, (in_dim, out_dim), _F32, -bound, bound)


def _init_b(key, out_dim, in_dim):
    bound = 1.0 / math.sqrt(in_dim)
    return jax.random.uniform(key, (out_dim,), _F32, -bound, bound)


def init_gat_head(key, in_dim, out_dim, e_in, e_out):
    k = jax.random.split(key, 4)
    return {
        "embed_wT": _init_w(k[0], out_dim, in_dim),              # embed_node  [in, D]
        "attn_wT": _init_w(k[1], 1, 2 * out_dim + e_in),         # attn_fc     [2D+De, 1]
        "tonode_wT": _init_w(k[2], out_dim, out_dim + e_in),     # to_node_fc  [D+De, D]
        "edge_wT": _init_w(k[3], e_out, 2 * out_dim + e_in),     # edge_linear [2D+De, Eo]
    }


def _stack_layer(head_params, d):
    """Stack per-head weights on a leading head axis, pre-split for the decomposed matmuls."""
    embed = jnp.stack([p["embed_wT"] for p in head_params]).astype(_BF16)   # [H, Fin, D]
    attn = jnp.stack([p["attn_wT"][:, 0] for p in head_params])             # [H, 2D+De]
    tonode = jnp.stack([p["tonode_wT"] for p in head_params])               # [H, D+De, D]
    edgew = jnp.stack([p["edge_wT"] for p in head_params])                  # [H, 2D+De, Eo]
    return {
        "embed": embed,
        "a_src": attn[:, None, :d],                 # f32 (VPU path)
        "a_dst": attn[:, None, d:2 * d],
        "a_edge": attn[:, None, 2 * d:],
        "wt_z": tonode[:, :d, :].astype(_BF16),
        "wt_e": tonode[:, d:, :].astype(_BF16),
        "ew_src": edgew[:, :d, :].astype(_BF16),
        "ew_dst": edgew[:, d:2 * d, :].astype(_BF16),
        "ew_edge": edgew[:, 2 * d:, :].astype(_BF16),
    }


def _pad_lanes(w, total):
    return jnp.pad(w, ((0, 0), (0, total - w.shape[1])))


def init_gatnet(key, in_dim, hidden_dim, num_layers, heads):
    keys = jax.random.split(key, num_layers * heads + 8)
    idx = 0
    gat = []
    raw = [init_gat_head(keys[idx + i], in_dim, hidden_dim, 12, 128) for i in range(heads)]
    gat.append(_stack_layer(raw, hidden_dim))
    idx += heads
    for _ in range(1, num_layers):
        raw = [init_gat_head(keys[idx + i], hidden_dim * heads, hidden_dim,
                             128 * heads, 128) for i in range(heads)]
        gat.append(_stack_layer(raw, hidden_dim))
        idx += heads
    k = keys[idx:idx + 8]
    lh1_wT = _init_w(k[0], 32, 128); lh1_b = _init_b(k[1], 32, 128)
    lh2_wT = _init_w(k[2], 3, 32);   lh2_b = _init_b(k[3], 3, 32)
    le1_wT = _init_w(k[4], 32, 256); le1_b = _init_b(k[5], 32, 256)
    le2_wT = _init_w(k[6], 1, 32);   le2_b = _init_b(k[7], 1, 32)
    return {
        "gat": gat,
        "lh1_wT": lh1_wT.astype(_BF16), "lh1_b": lh1_b.reshape(1, 32),
        "lh2_wT_pad": _pad_lanes(lh2_wT, 128).astype(_BF16),
        "lh2_b_pad": _pad_lanes(lh2_b.reshape(1, 3), 128),
        "le1h_wT": le1_wT[:128].astype(_BF16),   # multiplies broadcast(h_readout)
        "le1e_wT": le1_wT[128:].astype(_BF16),   # multiplies e
        "le1_b": le1_b.reshape(1, 32),
        "le2_wT_pad": _pad_lanes(le2_wT, 128).astype(_BF16),
        "le2_b_pad": _pad_lanes(le2_b.reshape(1, 1), 128),
    }


def build_graph(src, dst, n_nodes):
    """DGL graph -> dense one-hot src/dst gather matrices and dst-incidence softmax mask."""
    nids = jnp.arange(n_nodes, dtype=jnp.int32)
    s_src = (src[:, None] == nids[None, :]).astype(_BF16)   # [E, N]
    s_dst = (dst[:, None] == nids[None, :]).astype(_BF16)   # [E, N]
    mask = (dst[None, :] == nids[:, None]).astype(_F32)     # [N, E]
    return s_src, s_dst, mask


# --------------------------------------------------------------------------------------- main
if __name__ == "__main__":
    key = jax.random.PRNGKey(0)

    # hidden_dim must be 128 (linear_h is hard-coded Linear(128,32)); e_out is 128.
    N_NODES = 16
    IN_DIM = 16
    HIDDEN = 128
    HEADS = 2
    NUM_LAYERS = 2
    E_IN0 = 12

    # graph: a ring plus skip-3 edges -> every node has in-degree 2
    src_list, dst_list = [], []
    for i in range(N_NODES):
        src_list.append(i); dst_list.append((i + 1) % N_NODES)
    for i in range(N_NODES):
        src_list.append(i); dst_list.append((i + 3) % N_NODES)
    src = jnp.array(src_list, dtype=jnp.int32)
    dst = jnp.array(dst_list, dtype=jnp.int32)
    n_edges = src.shape[0]
    graph = build_graph(src, dst, N_NODES)

    k1, k2, k3 = jax.random.split(key, 3)
    h0 = jax.random.normal(k1, (N_NODES, IN_DIM), _F32)     # node features
    w0 = jax.random.normal(k2, (n_edges, E_IN0), _F32)      # edge features (e_in=12)
    params = init_gatnet(k3, IN_DIM, HIDDEN, NUM_LAYERS, HEADS)

    fwd = jax.jit(gatnet_forward)
    h_pred, e_pred = fwd(params, h0, w0, graph)
    jax.block_until_ready((h_pred, e_pred))

    assert h_pred.shape == (1, 3), h_pred.shape
    assert e_pred.shape == (n_edges, 1), e_pred.shape
    print("KERNEL_OK")
</pallas_src>

<mosaic_0001>
module attributes {stable_mosaic.version = 11 : i64} {
  func.func @_gat_hidden_kernel(%arg0: i32, %arg1: memref<16x16xf32, #tpu.memory_space<vmem>>, %arg2: memref<32x12xf32, #tpu.memory_space<vmem>>, %arg3: memref<32x16xbf16, #tpu.memory_space<vmem>>, %arg4: memref<32x16xbf16, #tpu.memory_space<vmem>>, %arg5: memref<16x32xf32, #tpu.memory_space<vmem>>, %arg6: memref<1x16x128xbf16, #tpu.memory_space<vmem>>, %arg7: memref<1x1x128xf32, #tpu.memory_space<vmem>>, %arg8: memref<1x1x128xf32, #tpu.memory_space<vmem>>, %arg9: memref<1x1x12xf32, #tpu.memory_space<vmem>>, %arg10: memref<1x128x128xbf16, #tpu.memory_space<vmem>>, %arg11: memref<1x12x128xbf16, #tpu.memory_space<vmem>>, %arg12: memref<1x128x128xbf16, #tpu.memory_space<vmem>>, %arg13: memref<1x128x128xbf16, #tpu.memory_space<vmem>>, %arg14: memref<1x12x128xbf16, #tpu.memory_space<vmem>>, %arg15: memref<16x128xf32, #tpu.memory_space<vmem>>, %arg16: memref<32x128xf32, #tpu.memory_space<vmem>>) attributes {dimension_semantics = [#tpu.dimension_semantics<parallel>], iteration_bounds = array<i64: 2>, scalar_prefetch = 0 : i64, scratch_operands = 0 : i64, tpu.core_type = #tpu.core_type<tc>, window_params = [{pipeline_mode = #tpu.pipeline_mode<synchronous>, transform_indices = @transform_0, window_bounds = array<i64: 16, 16>}, {pipeline_mode = #tpu.pipeline_mode<synchronous>, transform_indices = @transform_1, window_bounds = array<i64: 32, 12>}, {pipeline_mode = #tpu.pipeline_mode<synchronous>, transform_indices = @transform_2, window_bounds = array<i64: 32, 16>}, {pipeline_mode = #tpu.pipeline_mode<synchronous>, transform_indices = @transform_3, window_bounds = array<i64: 32, 16>}, {pipeline_mode = #tpu.pipeline_mode<synchronous>, transform_indices = @transform_4, window_bounds = array<i64: 16, 32>}, {transform_indices = @transform_5, window_bounds = array<i64: 1, 16, 128>}, {transform_indices = @transform_6, window_bounds = array<i64: 1, 1, 128>}, {transform_indices = @transform_7, window_bounds = array<i64: 1, 1, 128>}, {transform_indices = @transform_8, window_bounds = array<i64: 1, 1, 12>}, {transform_indices = @transform_9, window_bounds = array<i64: 1, 128, 128>}, {transform_indices = @transform_10, window_bounds = array<i64: 1, 12, 128>}, {transform_indices = @transform_11, window_bounds = array<i64: 1, 128, 128>}, {transform_indices = @transform_12, window_bounds = array<i64: 1, 128, 128>}, {transform_indices = @transform_13, window_bounds = array<i64: 1, 12, 128>}, {transform_indices = @transform_14, window_bounds = array<i64: 16, 128>}, {transform_indices = @transform_15, window_bounds = array<i64: 32, 128>}]} {
    %c0 = arith.constant 0 : index
    %c0_0 = arith.constant 0 : index
    %0 = vector.load %arg5[%c0, %c0_0] : memref<16x32xf32, #tpu.memory_space<vmem>>, vector<16x32xf32>
    %cst = arith.constant 5.000000e-01 : f32
    %1 = vector.broadcast %cst : f32 to vector<16x32xf32>
    %2 = arith.cmpf ogt, %0, %1 : vector<16x32xf32>
    %c0_1 = arith.constant 0 : index
    %c0_2 = arith.constant 0 : index
    %3 = vector.load %arg1[%c0_1, %c0_2] : memref<16x16xf32, #tpu.memory_space<vmem>>, vector<16x16xf32>
    %c0_3 = arith.constant 0 : index
    %c0_4 = arith.constant 0 : index
    %4 = vector.load %arg2[%c0_3, %c0_4] : memref<32x12xf32, #tpu.memory_space<vmem>>, vector<32x12xf32>
    %c0_5 = arith.constant 0 : index
    %c0_6 = arith.constant 0 : index
    %5 = vector.load %arg3[%c0_5, %c0_6] : memref<32x16xbf16, #tpu.memory_space<vmem>>, vector<32x16xbf16>
    %c0_7 = arith.constant 0 : index
    %c0_8 = arith.constant 0 : index
    %6 = vector.load %arg4[%c0_7, %c0_8] : memref<32x16xbf16, #tpu.memory_space<vmem>>, vector<32x16xbf16>
    %c0_9 = arith.constant 0 : index
    %c0_10 = arith.constant 0 : index
    %c0_11 = arith.constant 0 : index
    %7 = vector.load %arg6[%c0_9, %c0_10, %c0_11] : memref<1x16x128xbf16, #tpu.memory_space<vmem>>, vector<1x16x128xbf16>
    %8 = vector.shape_cast %7 : vector<1x16x128xbf16> to vector<16x128xbf16>
    %c0_12 = arith.constant 0 : index
    %c0_13 = arith.constant 0 : index
    %c0_14 = arith.constant 0 : index
    %9 = vector.load %arg7[%c0_12, %c0_13, %c0_14] : memref<1x1x128xf32, #tpu.memory_space<vmem>>, vector<1x1x128xf32>
    %10 = vector.shape_cast %9 : vector<1x1x128xf32> to vector<1x128xf32>
    %c0_15 = arith.constant 0 : index
    %c0_16 = arith.constant 0 : index
    %c0_17 = arith.constant 0 : index
    %11 = vector.load %arg8[%c0_15, %c0_16, %c0_17] : memref<1x1x128xf32, #tpu.memory_space<vmem>>, vector<1x1x128xf32>
    %12 = vector.shape_cast %11 : vector<1x1x128xf32> to vector<1x128xf32>
    %c0_18 = arith.constant 0 : index
    %c0_19 = arith.constant 0 : index
    %c0_20 = arith.constant 0 : index
    %13 = vector.load %arg9[%c0_18, %c0_19, %c0_20] : memref<1x1x12xf32, #tpu.memory_space<vmem>>, vector<1x1x12xf32>
    %14 = vector.shape_cast %13 : vector<1x1x12xf32> to vector<1x12xf32>
    %c0_21 = arith.constant 0 : index
    %c0_22 = arith.constant 0 : index
    %c0_23 = arith.constant 0 : index
    %15 = vector.load %arg10[%c0_21, %c0_22, %c0_23] : memref<1x128x128xbf16, #tpu.memory_space<vmem>>, vector<1x128x128xbf16>
    %16 = vector.shape_cast %15 : vector<1x128x128xbf16> to vector<128x128xbf16>
    %c0_24 = arith.constant 0 : index
    %c0_25 = arith.constant 0 : index
    %c0_26 = arith.constant 0 : index
    %17 = vector.load %arg11[%c0_24, %c0_25, %c0_26] : memref<1x12x128xbf16, #tpu.memory_space<vmem>>, vector<1x12x128xbf16>
    %18 = vector.shape_cast %17 : vector<1x12x128xbf16> to vector<12x128xbf16>
    %c0_27 = arith.constant 0 : index
    %c0_28 = arith.constant 0 : index
    %c0_29 = arith.constant 0 : index
    %19 = vector.load %arg12[%c0_27, %c0_28, %c0_29] : memref<1x128x128xbf16, #tpu.memory_space<vmem>>, vector<1x128x128xbf16>
    %20 = vector.shape_cast %19 : vector<1x128x128xbf16> to vector<128x128xbf16>
    %c0_30 = arith.constant 0 : index
    %c0_31 = arith.constant 0 : index
    %c0_32 = arith.constant 0 : index
    %21 = vector.load %arg13[%c0_30, %c0_31, %c0_32] : memref<1x128x128xbf16, #tpu.memory_space<vmem>>, vector<1x128x128xbf16>
    %22 = vector.shape_cast %21 : vector<1x128x128xbf16> to vector<128x128xbf16>
    %c0_33 = arith.constant 0 : index
    %c0_34 = arith.constant 0 : index
    %c0_35 = arith.constant 0 : index
    %23 = vector.load %arg14[%c0_33, %c0_34, %c0_35] : memref<1x12x128xbf16, #tpu.memory_space<vmem>>, vector<1x12x128xbf16>
    %24 = vector.shape_cast %23 : vector<1x12x128xbf16> to vector<12x128xbf16>
    %25 = arith.truncf %3 : vector<16x16xf32> to vector<16x16xbf16>
    %cst_36 = arith.constant dense<0.000000e+00> : vector<16x128xf32>
    %26 = tpu.matmul %25, %8, %cst_36 {dimension_numbers = #tpu.dot_dimension_numbers<[1], [0], [0], [1], [0, 0, 1, 1], [], []>} : vector<16x16xbf16>, vector<16x128xbf16>, vector<16x128xf32> -> vector<16x128xf32>
    %27 = arith.truncf %26 : vector<16x128xf32> to vector<16x128xbf16>
    %cst_37 = arith.constant dense<0.000000e+00> : vector<32x128xf32>
    %28 = tpu.matmul %5, %27, %cst_37 {dimension_numbers = #tpu.dot_dimension_numbers<[1], [0], [0], [1], [0, 0, 1, 1], [], []>} : vector<32x16xbf16>, vector<16x128xbf16>, vector<32x128xf32> -> vector<32x128xf32>
    %29 = arith.truncf %26 : vector<16x128xf32> to vector<16x128xbf16>
    %cst_38 = arith.constant dense<0.000000e+00> : vector<32x128xf32>
    %30 = tpu.matmul %6, %29, %cst_38 {dimension_numbers = #tpu.dot_dimension_numbers<[1], [0], [0], [1], [0, 0, 1, 1], [], []>} : vector<32x16xbf16>, vector<16x128xbf16>, vector<32x128xf32> -> vector<32x128xf32>
    %31 = vector.broadcast %10 : vector<1x128xf32> to vector<32x128xf32>
    %32 = arith.mulf %28, %31 : vector<32x128xf32>
    %cst_39 = arith.constant dense<0.000000e+00> : vector<32xf32>
    %33 = vector.multi_reduction <add>, %32, %cst_39 [1] : vector<32x128xf32> to vector<32xf32>
    %34 = vector.shape_cast %33 : vector<32xf32> to vector<32x1xf32>
    %35 = vector.broadcast %12 : vector<1x128xf32> to vector<32x128xf32>
    %36 = arith.mulf %30, %35 : vector<32x128xf32>
    %cst_40 = arith.constant dense<0.000000e+00> : vector<32xf32>
    %37 = vector.multi_reduction <add>, %36, %cst_40 [1] : vector<32x128xf32> to vector<32xf32>
    %38 = vector.shape_cast %37 : vector<32xf32> to vector<32x1xf32>
    %39 = arith.addf %34, %38 : vector<32x1xf32>
    %40 = vector.broadcast %14 : vector<1x12xf32> to vector<32x12xf32>
    %41 = arith.mulf %4, %40 : vector<32x12xf32>
    %cst_41 = arith.constant dense<0.000000e+00> : vector<32xf32>
    %42 = vector.multi_reduction <add>, %41, %cst_41 [1] : vector<32x12xf32> to vector<32xf32>
    %43 = vector.shape_cast %42 : vector<32xf32> to vector<32x1xf32>
    %44 = arith.addf %39, %43 : vector<32x1xf32>
    %cst_42 = arith.constant 0.000000e+00 : f32
    %45 = vector.broadcast %cst_42 : f32 to vector<32x1xf32>
    %46 = arith.cmpf oge, %44, %45 : vector<32x1xf32>
    %cst_43 = arith.constant 1.000000e-01 : f32
    %47 = vector.broadcast %cst_43 : f32 to vector<32x1xf32>
    %48 = arith.mulf %47, %44 : vector<32x1xf32>
    %49 = arith.select %46, %44, %48 : vector<32x1xi1>, vector<32x1xf32>
    %50 = arith.truncf %28 : vector<32x128xf32> to vector<32x128xbf16>
    %cst_44 = arith.constant dense<0.000000e+00> : vector<32x128xf32>
    %51 = tpu.matmul %50, %16, %cst_44 {dimension_numbers = #tpu.dot_dimension_numbers<[1], [0], [0], [1], [0, 0, 1, 1], [], []>} : vector<32x128xbf16>, vector<128x128xbf16>, vector<32x128xf32> -> vector<32x128xf32>
    %52 = arith.truncf %4 : vector<32x12xf32> to vector<32x12xbf16>
    %cst_45 = arith.constant dense<0.000000e+00> : vector<32x128xf32>
    %53 = tpu.matmul %52, %18, %cst_45 {dimension_numbers = #tpu.dot_dimension_numbers<[1], [0], [0], [1], [0, 0, 1, 1], [], []>} : vector<32x12xbf16>, vector<12x128xbf16>, vector<32x128xf32> -> vector<32x128xf32>
    %54 = arith.addf %51, %53 : vector<32x128xf32>
    %55 = vector.shape_cast %49 : vector<32x1xf32> to vector<32xf32>
    %56 = vector.shape_cast %55 : vector<32xf32> to vector<1x32xf32>
    %57 = vector.shape_cast %56 : vector<1x32xf32> to vector<1x32xf32>
    %58 = vector.broadcast %57 : vector<1x32xf32> to vector<16x32xf32>
    %cst_46 = arith.constant -1.000000e+30 : f32
    %59 = vector.broadcast %cst_46 : f32 to vector<16x32xf32>
    %60 = arith.select %2, %58, %59 : vector<16x32xi1>, vector<16x32xf32>
    %cst_47 = arith.constant dense<0xFF800000> : vector<16xf32>
    %61 = vector.multi_reduction <maximumf>, %60, %cst_47 [1] : vector<16x32xf32> to vector<16xf32>
    %62 = vector.shape_cast %61 : vector<16xf32> to vector<16x1xf32>
    %63 = vector.broadcast %62 : vector<16x1xf32> to vector<16x32xf32>
    %64 = arith.subf %60, %63 : vector<16x32xf32>
    %65 = math.exp %64 : vector<16x32xf32>
    %cst_48 = arith.constant 0.000000e+00 : f32
    %66 = vector.broadcast %cst_48 : f32 to vector<16x32xf32>
    %67 = arith.select %2, %65, %66 : vector<16x32xi1>, vector<16x32xf32>
    %cst_49 = arith.constant dense<0.000000e+00> : vector<16xf32>
    %68 = vector.multi_reduction <add>, %67, %cst_49 [1] : vector<16x32xf32> to vector<16xf32>
    %69 = vector.shape_cast %68 : vector<16xf32> to vector<16x1xf32>
    %cst_50 = arith.constant 9.99999968E-21 : f32
    %70 = vector.broadcast %cst_50 : f32 to vector<16x1xf32>
    %71 = arith.maximumf %69, %70 : vector<16x1xf32>
    %72 = tpu.reciprocal %71 {approx = true} : vector<16x1xf32> -> vector<16x1xf32>
    %73 = vector.broadcast %72 : vector<16x1xf32> to vector<16x32xf32>
    %74 = arith.mulf %67, %73 : vector<16x32xf32>
    %75 = arith.truncf %74 : vector<16x32xf32> to vector<16x32xbf16>
    %76 = arith.truncf %54 : vector<32x128xf32> to vector<32x128xbf16>
    %cst_51 = arith.constant dense<0.000000e+00> : vector<16x128xf32>
    %77 = tpu.matmul %75, %76, %cst_51 {dimension_numbers = #tpu.dot_dimension_numbers<[1], [0], [0], [1], [0, 0, 1, 1], [], []>} : vector<16x32xbf16>, vector<32x128xbf16>, vector<16x128xf32> -> vector<16x128xf32>
    %78 = arith.truncf %77 : vector<16x128xf32> to vector<16x128xbf16>
    %cst_52 = arith.constant dense<0.000000e+00> : vector<32x128xf32>
    %79 = tpu.matmul %5, %78, %cst_52 {dimension_numbers = #tpu.dot_dimension_numbers<[1], [0], [0], [1], [0, 0, 1, 1], [], []>} : vector<32x16xbf16>, vector<16x128xbf16>, vector<32x128xf32> -> vector<32x128xf32>
    %80 = arith.truncf %77 : vector<16x128xf32> to vector<16x128xbf16>
    %cst_53 = arith.constant dense<0.000000e+00> : vector<32x128xf32>
    %81 = tpu.matmul %6, %80, %cst_53 {dimension_numbers = #tpu.dot_dimension_numbers<[1], [0], [0], [1], [0, 0, 1, 1], [], []>} : vector<32x16xbf16>, vector<16x128xbf16>, vector<32x128xf32> -> vector<32x128xf32>
    %82 = arith.truncf %79 : vector<32x128xf32> to vector<32x128xbf16>
    %cst_54 = arith.constant dense<0.000000e+00> : vector<32x128xf32>
    %83 = tpu.matmul %82, %20, %cst_54 {dimension_numbers = #tpu.dot_dimension_numbers<[1], [0], [0], [1], [0, 0, 1, 1], [], []>} : vector<32x128xbf16>, vector<128x128xbf16>, vector<32x128xf32> -> vector<32x128xf32>
    %84 = arith.truncf %81 : vector<32x128xf32> to vector<32x128xbf16>
    %cst_55 = arith.constant dense<0.000000e+00> : vector<32x128xf32>
    %85 = tpu.matmul %84, %22, %cst_55 {dimension_numbers = #tpu.dot_dimension_numbers<[1], [0], [0], [1], [0, 0, 1, 1], [], []>} : vector<32x128xbf16>, vector<128x128xbf16>, vector<32x128xf32> -> vector<32x128xf32>
    %86 = arith.addf %83, %85 : vector<32x128xf32>
    %87 = arith.truncf %4 : vector<32x12xf32> to vector<32x12xbf16>
    %cst_56 = arith.constant dense<0.000000e+00> : vector<32x128xf32>
    %88 = tpu.matmul %87, %24, %cst_56 {dimension_numbers = #tpu.dot_dimension_numbers<[1], [0], [0], [1], [0, 0, 1, 1], [], []>} : vector<32x12xbf16>, vector<12x128xbf16>, vector<32x128xf32> -> vector<32x128xf32>
    %89 = arith.addf %86, %88 : vector<32x128xf32>
    %c0_57 = arith.constant 0 : index
    %c0_58 = arith.constant 0 : index
    %90 = vector.load %arg16[%c0_57, %c0_58] : memref<32x128xf32, #tpu.memory_space<vmem>>, vector<32x128xf32>
    tpu.vector_store %arg16[%c0_57, %c0_58], %89 {strides = array<i32>} : memref<32x128xf32, #tpu.memory_space<vmem>>, vector<32x128xf32>,
    %cst_59 = arith.constant 0.000000e+00 : f32
    %91 = vector.broadcast %cst_59 : f32 to vector<16x128xf32>
    %92 = arith.cmpf ogt, %77, %91 : vector<16x128xf32>
    %93 = math.exp %77 : vector<16x128xf32>
    %cst_60 = arith.constant 1.000000e+00 : f32
    %94 = vector.broadcast %cst_60 : f32 to vector<16x128xf32>
    %95 = arith.subf %93, %94 : vector<16x128xf32>
    %96 = arith.select %92, %77, %95 : vector<16x128xi1>, vector<16x128xf32>
    %c0_61 = arith.constant 0 : index
    %c0_62 = arith.constant 0 : index
    %97 = vector.load %arg15[%c0_61, %c0_62] : memref<16x128xf32, #tpu.memory_space<vmem>>, vector<16x128xf32>
    tpu.vector_store %arg15[%c0_61, %c0_62], %96 {strides = array<i32>} : memref<16x128xf32, #tpu.memory_space<vmem>>, vector<16x128xf32>,
    return
  }
  func.func @transform_0(%arg0: i32) -> (i32, i32) {
    %c0_i32 = arith.constant 0 : i32
    %c0_i32_0 = arith.constant 0 : i32
    %c0_i32_1 = arith.constant 0 : i32
    return %c0_i32, %c0_i32_0 : i32, i32
  }
  func.func @transform_1(%arg0: i32) -> (i32, i32) {
    %c0_i32 = arith.constant 0 : i32
    %c0_i32_0 = arith.constant 0 : i32
    %c0_i32_1 = arith.constant 0 : i32
    return %c0_i32, %c0_i32_0 : i32, i32
  }
  func.func @transform_2(%arg0: i32) -> (i32, i32) {
    %c0_i32 = arith.constant 0 : i32
    %c0_i32_0 = arith.constant 0 : i32
    %c0_i32_1 = arith.constant 0 : i32
    return %c0_i32, %c0_i32_0 : i32, i32
  }
  func.func @transform_3(%arg0: i32) -> (i32, i32) {
    %c0_i32 = arith.constant 0 : i32
    %c0_i32_0 = arith.constant 0 : i32
    %c0_i32_1 = arith.constant 0 : i32
    return %c0_i32, %c0_i32_0 : i32, i32
  }
  func.func @transform_4(%arg0: i32) -> (i32, i32) {
    %c0_i32 = arith.constant 0 : i32
    %c0_i32_0 = arith.constant 0 : i32
    %c0_i32_1 = arith.constant 0 : i32
    return %c0_i32, %c0_i32_0 : i32, i32
  }
  func.func @transform_5(%arg0: i32) -> (i32, i32, i32) {
    %c0_i32 = arith.constant 0 : i32
    %c0_i32_0 = arith.constant 0 : i32
    %c0_i32_1 = arith.constant 0 : i32
    return %arg0, %c0_i32, %c0_i32_0 : i32, i32, i32
  }
  func.func @transform_6(%arg0: i32) -> (i32, i32, i32) {
    %c0_i32 = arith.constant 0 : i32
    %c0_i32_0 = arith.constant 0 : i32
    %c0_i32_1 = arith.constant 0 : i32
    return %arg0, %c0_i32, %c0_i32_0 : i32, i32, i32
  }
  func.func @transform_7(%arg0: i32) -> (i32, i32, i32) {
    %c0_i32 = arith.constant 0 : i32
    %c0_i32_0 = arith.constant 0 : i32
    %c0_i32_1 = arith.constant 0 : i32
    return %arg0, %c0_i32, %c0_i32_0 : i32, i32, i32
  }
  func.func @transform_8(%arg0: i32) -> (i32, i32, i32) {
    %c0_i32 = arith.constant 0 : i32
    %c0_i32_0 = arith.constant 0 : i32
    %c0_i32_1 = arith.constant 0 : i32
    return %arg0, %c0_i32, %c0_i32_0 : i32, i32, i32
  }
  func.func @transform_9(%arg0: i32) -> (i32, i32, i32) {
    %c0_i32 = arith.constant 0 : i32
    %c0_i32_0 = arith.constant 0 : i32
    %c0_i32_1 = arith.constant 0 : i32
    return %arg0, %c0_i32, %c0_i32_0 : i32, i32, i32
  }
  func.func @transform_10(%arg0: i32) -> (i32, i32, i32) {
    %c0_i32 = arith.constant 0 : i32
    %c0_i32_0 = arith.constant 0 : i32
    %c0_i32_1 = arith.constant 0 : i32
    return %arg0, %c0_i32, %c0_i32_0 : i32, i32, i32
  }
  func.func @transform_11(%arg0: i32) -> (i32, i32, i32) {
    %c0_i32 = arith.constant 0 : i32
    %c0_i32_0 = arith.constant 0 : i32
    %c0_i32_1 = arith.constant 0 : i32
    return %arg0, %c0_i32, %c0_i32_0 : i32, i32, i32
  }
  func.func @transform_12(%arg0: i32) -> (i32, i32, i32) {
    %c0_i32 = arith.constant 0 : i32
    %c0_i32_0 = arith.constant 0 : i32
    %c0_i32_1 = arith.constant 0 : i32
    return %arg0, %c0_i32, %c0_i32_0 : i32, i32, i32
  }
  func.func @transform_13(%arg0: i32) -> (i32, i32, i32) {
    %c0_i32 = arith.constant 0 : i32
    %c0_i32_0 = arith.constant 0 : i32
    %c0_i32_1 = arith.constant 0 : i32
    return %arg0, %c0_i32, %c0_i32_0 : i32, i32, i32
  }
  func.func @transform_14(%arg0: i32) -> (i32, i32) {
    %c0_i32 = arith.constant 0 : i32
    %c0_i32_0 = arith.constant 0 : i32
    return %c0_i32, %arg0 : i32, i32
  }
  func.func @transform_15(%arg0: i32) -> (i32, i32) {
    %c0_i32 = arith.constant 0 : i32
    %c0_i32_0 = arith.constant 0 : i32
    return %c0_i32, %arg0 : i32, i32
  }
}

module attributes {stable_mosaic.version = 11 : i64} {
  func.func @_gat_final_kernel(%arg0: i32, %arg1: memref<16x256xf32, #tpu.memory_space<vmem>>, %arg2: memref<32x256xf32, #tpu.memory_space<vmem>>, %arg3: memref<32x16xbf16, #tpu.memory_space<vmem>>, %arg4: memref<32x16xbf16, #tpu.memory_space<vmem>>, %arg5: memref<16x32xf32, #tpu.memory_space<vmem>>, %arg6: memref<1x256x128xbf16, #tpu.memory_space<vmem>>, %arg7: memref<1x1x128xf32, #tpu.memory_space<vmem>>, %arg8: memref<1x1x128xf32, #tpu.memory_space<vmem>>, %arg9: memref<1x1x256xf32, #tpu.memory_space<vmem>>, %arg10: memref<1x128x128xbf16, #tpu.memory_space<vmem>>, %arg11: memref<1x256x128xbf16, #tpu.memory_space<vmem>>, %arg12: memref<1x128x128xbf16, #tpu.memory_space<vmem>>, %arg13: memref<1x128x128xbf16, #tpu.memory_space<vmem>>, %arg14: memref<1x256x128xbf16, #tpu.memory_space<vmem>>, %arg15: memref<128x32xbf16, #tpu.memory_space<vmem>>, %arg16: memref<1x32xf32, #tpu.memory_space<vmem>>, %arg17: memref<32x128xbf16, #tpu.memory_space<vmem>>, %arg18: memref<1x128xf32, #tpu.memory_space<vmem>>, %arg19: memref<128x32xbf16, #tpu.memory_space<vmem>>, %arg20: memref<128x32xbf16, #tpu.memory_space<vmem>>, %arg21: memref<1x32xf32, #tpu.memory_space<vmem>>, %arg22: memref<32x128xbf16, #tpu.memory_space<vmem>>, %arg23: memref<1x128xf32, #tpu.memory_space<vmem>>, %arg24: memref<1x128xf32, #tpu.memory_space<vmem>>, %arg25: memref<32x128xf32, #tpu.memory_space<vmem>>, %arg26: memref<16x128xf32, #tpu.memory_space<vmem>>, %arg27: memref<32x128xf32, #tpu.memory_space<vmem>>) attributes {dimension_semantics = [#tpu.dimension_semantics<arbitrary>], iteration_bounds = array<i64: 2>, scalar_prefetch = 0 : i64, scratch_operands = 2 : i64, tpu.core_type = #tpu.core_type<tc>, window_params = [{pipeline_mode = #tpu.pipeline_mode<synchronous>, transform_indices = @transform_0, window_bounds = array<i64: 16, 256>}, {pipeline_mode = #tpu.pipeline_mode<synchronous>, transform_indices = @transform_1, window_bounds = array<i64: 32, 256>}, {pipeline_mode = #tpu.pipeline_mode<synchronous>, transform_indices = @transform_2, window_bounds = array<i64: 32, 16>}, {pipeline_mode = #tpu.pipeline_mode<synchronous>, transform_indices = @transform_3, window_bounds = array<i64: 32, 16>}, {pipeline_mode = #tpu.pipeline_mode<synchronous>, transform_indices = @transform_4, window_bounds = array<i64: 16, 32>}, {transform_indices = @transform_5, window_bounds = array<i64: 1, 256, 128>}, {transform_indices = @transform_6, window_bounds = array<i64: 1, 1, 128>}, {transform_indices = @transform_7, window_bounds = array<i64: 1, 1, 128>}, {transform_indices = @transform_8, window_bounds = array<i64: 1, 1, 256>}, {transform_indices = @transform_9, window_bounds = array<i64: 1, 128, 128>}, {transform_indices = @transform_10, window_bounds = array<i64: 1, 256, 128>}, {transform_indices = @transform_11, window_bounds = array<i64: 1, 128, 128>}, {transform_indices = @transform_12, window_bounds = array<i64: 1, 128, 128>}, {transform_indices = @transform_13, window_bounds = array<i64: 1, 256, 128>}, {pipeline_mode = #tpu.pipeline_mode<synchronous>, transform_indices = @transform_14, window_bounds = array<i64: 128, 32>}, {pipeline_mode = #tpu.pipeline_mode<synchronous>, transform_indices = @transform_15, window_bounds = array<i64: 1, 32>}, {pipeline_mode = #tpu.pipeline_mode<synchronous>, transform_indices = @transform_16, window_bounds = array<i64: 32, 128>}, {pipeline_mode = #tpu.pipeline_mode<synchronous>, transform_indices = @transform_17, window_bounds = array<i64: 1, 128>}, {pipeline_mode = #tpu.pipeline_mode<synchronous>, transform_indices = @transform_18, window_bounds = array<i64: 128, 32>}, {pipeline_mode = #tpu.pipeline_mode<synchronous>, transform_indices = @transform_19, window_bounds = array<i64: 128, 32>}, {pipeline_mode = #tpu.pipeline_mode<synchronous>, transform_indices = @transform_20, window_bounds = array<i64: 1, 32>}, {pipeline_mode = #tpu.pipeline_mode<synchronous>, transform_indices = @transform_21, window_bounds = array<i64: 32, 128>}, {pipeline_mode = #tpu.pipeline_mode<synchronous>, transform_indices = @transform_22, window_bounds = array<i64: 1, 128>}, {pipeline_mode = #tpu.pipeline_mode<synchronous>, transform_indices = @transform_23, window_bounds = array<i64: 1, 128>}, {pipeline_mode = #tpu.pipeline_mode<synchronous>, transform_indices = @transform_24, window_bounds = array<i64: 32, 128>}]} {
    %c0_i32 = arith.constant 0 : i32
    %0 = arith.cmpi eq, %arg0, %c0_i32 : i32
    %1 = arith.extui %0 : i1 to i32
    %c0_i32_0 = arith.constant 0 : i32
    %2 = arith.cmpi ne, %1, %c0_i32_0 : i32
    scf.if %2 {
      %cst_69 = arith.constant 0.000000e+00 : f32
      %106 = vector.broadcast %cst_69 : f32 to vector<16x128xf32>
      %c0_70 = arith.constant 0 : index
      %c0_71 = arith.constant 0 : index
      %107 = vector.load %arg26[%c0_70, %c0_71] : memref<16x128xf32, #tpu.memory_space<vmem>>, vector<16x128xf32>
      tpu.vector_store %arg26[%c0_70, %c0_71], %106 {strides = array<i32>} : memref<16x128xf32, #tpu.memory_space<vmem>>, vector<16x128xf32>,
      %cst_72 = arith.constant 0.000000e+00 : f32
      %108 = vector.broadcast %cst_72 : f32 to vector<32x128xf32>
      %c0_73 = arith.constant 0 : index
      %c0_74 = arith.constant 0 : index
      %109 = vector.load %arg27[%c0_73, %c0_74] : memref<32x128xf32, #tpu.memory_space<vmem>>, vector<32x128xf32>
      tpu.vector_store %arg27[%c0_73, %c0_74], %108 {strides = array<i32>} : memref<32x128xf32, #tpu.memory_space<vmem>>, vector<32x128xf32>,
    } else {
    }
    %c0 = arith.constant 0 : index
    %c0_1 = arith.constant 0 : index
    %3 = vector.load %arg5[%c0, %c0_1] : memref<16x32xf32, #tpu.memory_space<vmem>>, vector<16x32xf32>
    %cst = arith.constant 5.000000e-01 : f32
    %4 = vector.broadcast %cst : f32 to vector<16x32xf32>
    %5 = arith.cmpf ogt, %3, %4 : vector<16x32xf32>
    %c0_2 = arith.constant 0 : index
    %c0_3 = arith.constant 0 : index
    %6 = vector.load %arg1[%c0_2, %c0_3] : memref<16x256xf32, #tpu.memory_space<vmem>>, vector<16x256xf32>
    %c0_4 = arith.constant 0 : index
    %c0_5 = arith.constant 0 : index
    %7 = vector.load %arg2[%c0_4, %c0_5] : memref<32x256xf32, #tpu.memory_space<vmem>>, vector<32x256xf32>
    %c0_6 = arith.constant 0 : index
    %c0_7 = arith.constant 0 : index
    %8 = vector.load %arg3[%c0_6, %c0_7] : memref<32x16xbf16, #tpu.memory_space<vmem>>, vector<32x16xbf16>
    %c0_8 = arith.constant 0 : index
    %c0_9 = arith.constant 0 : index
    %9 = vector.load %arg4[%c0_8, %c0_9] : memref<32x16xbf16, #tpu.memory_space<vmem>>, vector<32x16xbf16>
    %c0_10 = arith.constant 0 : index
    %c0_11 = arith.constant 0 : index
    %c0_12 = arith.constant 0 : index
    %10 = vector.load %arg6[%c0_10, %c0_11, %c0_12] : memref<1x256x128xbf16, #tpu.memory_space<vmem>>, vector<1x256x128xbf16>
    %11 = vector.shape_cast %10 : vector<1x256x128xbf16> to vector<256x128xbf16>
    %c0_13 = arith.constant 0 : index
    %c0_14 = arith.constant 0 : index
    %c0_15 = arith.constant 0 : index
    %12 = vector.load %arg7[%c0_13, %c0_14, %c0_15] : memref<1x1x128xf32, #tpu.memory_space<vmem>>, vector<1x1x128xf32>
    %13 = vector.shape_cast %12 : vector<1x1x128xf32> to vector<1x128xf32>
    %c0_16 = arith.constant 0 : index
    %c0_17 = arith.constant 0 : index
    %c0_18 = arith.constant 0 : index
    %14 = vector.load %arg8[%c0_16, %c0_17, %c0_18] : memref<1x1x128xf32, #tpu.memory_space<vmem>>, vector<1x1x128xf32>
    %15 = vector.shape_cast %14 : vector<1x1x128xf32> to vector<1x128xf32>
    %c0_19 = arith.constant 0 : index
    %c0_20 = arith.constant 0 : index
    %c0_21 = arith.constant 0 : index
    %16 = vector.load %arg9[%c0_19, %c0_20, %c0_21] : memref<1x1x256xf32, #tpu.memory_space<vmem>>, vector<1x1x256xf32>
    %17 = vector.shape_cast %16 : vector<1x1x256xf32> to vector<1x256xf32>
    %c0_22 = arith.constant 0 : index
    %c0_23 = arith.constant 0 : index
    %c0_24 = arith.constant 0 : index
    %18 = vector.load %arg10[%c0_22, %c0_23, %c0_24] : memref<1x128x128xbf16, #tpu.memory_space<vmem>>, vector<1x128x128xbf16>
    %19 = vector.shape_cast %18 : vector<1x128x128xbf16> to vector<128x128xbf16>
    %c0_25 = arith.constant 0 : index
    %c0_26 = arith.constant 0 : index
    %c0_27 = arith.constant 0 : index
    %20 = vector.load %arg11[%c0_25, %c0_26, %c0_27] : memref<1x256x128xbf16, #tpu.memory_space<vmem>>, vector<1x256x128xbf16>
    %21 = vector.shape_cast %20 : vector<1x256x128xbf16> to vector<256x128xbf16>
    %c0_28 = arith.constant 0 : index
    %c0_29 = arith.constant 0 : index
    %c0_30 = arith.constant 0 : index
    %22 = vector.load %arg12[%c0_28, %c0_29, %c0_30] : memref<1x128x128xbf16, #tpu.memory_space<vmem>>, vector<1x128x128xbf16>
    %23 = vector.shape_cast %22 : vector<1x128x128xbf16> to vector<128x128xbf16>
    %c0_31 = arith.constant 0 : index
    %c0_32 = arith.constant 0 : index
    %c0_33 = arith.constant 0 : index
    %24 = vector.load %arg13[%c0_31, %c0_32, %c0_33] : memref<1x128x128xbf16, #tpu.memory_space<vmem>>, vector<1x128x128xbf16>
    %25 = vector.shape_cast %24 : vector<1x128x128xbf16> to vector<128x128xbf16>
    %c0_34 = arith.constant 0 : index
    %c0_35 = arith.constant 0 : index
    %c0_36 = arith.constant 0 : index
    %26 = vector.load %arg14[%c0_34, %c0_35, %c0_36] : memref<1x256x128xbf16, #tpu.memory_space<vmem>>, vector<1x256x128xbf16>
    %27 = vector.shape_cast %26 : vector<1x256x128xbf16> to vector<256x128xbf16>
    %28 = arith.truncf %6 : vector<16x256xf32> to vector<16x256xbf16>
    %cst_37 = arith.constant dense<0.000000e+00> : vector<16x128xf32>
    %29 = tpu.matmul %28, %11, %cst_37 {dimension_numbers = #tpu.dot_dimension_numbers<[1], [0], [0], [1], [0, 0, 1, 1], [], []>} : vector<16x256xbf16>, vector<256x128xbf16>, vector<16x128xf32> -> vector<16x128xf32>
    %30 = arith.truncf %29 : vector<16x128xf32> to vector<16x128xbf16>
    %cst_38 = arith.constant dense<0.000000e+00> : vector<32x128xf32>
    %31 = tpu.matmul %8, %30, %cst_38 {dimension_numbers = #tpu.dot_dimension_numbers<[1], [0], [0], [1], [0, 0, 1, 1], [], []>} : vector<32x16xbf16>, vector<16x128xbf16>, vector<32x128xf32> -> vector<32x128xf32>
    %32 = arith.truncf %29 : vector<16x128xf32> to vector<16x128xbf16>
    %cst_39 = arith.constant dense<0.000000e+00> : vector<32x128xf32>
    %33 = tpu.matmul %9, %32, %cst_39 {dimension_numbers = #tpu.dot_dimension_numbers<[1], [0], [0], [1], [0, 0, 1, 1], [], []>} : vector<32x16xbf16>, vector<16x128xbf16>, vector<32x128xf32> -> vector<32x128xf32>
    %34 = vector.broadcast %13 : vector<1x128xf32> to vector<32x128xf32>
    %35 = arith.mulf %31, %34 : vector<32x128xf32>
    %cst_40 = arith.constant dense<0.000000e+00> : vector<32xf32>
    %36 = vector.multi_reduction <add>, %35, %cst_40 [1] : vector<32x128xf32> to vector<32xf32>
    %37 = vector.shape_cast %36 : vector<32xf32> to vector<32x1xf32>
    %38 = vector.broadcast %15 : vector<1x128xf32> to vector<32x128xf32>
    %39 = arith.mulf %33, %38 : vector<32x128xf32>
    %cst_41 = arith.constant dense<0.000000e+00> : vector<32xf32>
    %40 = vector.multi_reduction <add>, %39, %cst_41 [1] : vector<32x128xf32> to vector<32xf32>
    %41 = vector.shape_cast %40 : vector<32xf32> to vector<32x1xf32>
    %42 = arith.addf %37, %41 : vector<32x1xf32>
    %43 = vector.broadcast %17 : vector<1x256xf32> to vector<32x256xf32>
    %44 = arith.mulf %7, %43 : vector<32x256xf32>
    %cst_42 = arith.constant dense<0.000000e+00> : vector<32xf32>
    %45 = vector.multi_reduction <add>, %44, %cst_42 [1] : vector<32x256xf32> to vector<32xf32>
    %46 = vector.shape_cast %45 : vector<32xf32> to vector<32x1xf32>
    %47 = arith.addf %42, %46 : vector<32x1xf32>
    %cst_43 = arith.constant 0.000000e+00 : f32
    %48 = vector.broadcast %cst_43 : f32 to vector<32x1xf32>
    %49 = arith.cmpf oge, %47, %48 : vector<32x1xf32>
    %cst_44 = arith.constant 1.000000e-01 : f32
    %50 = vector.broadcast %cst_44 : f32 to vector<32x1xf32>
    %51 = arith.mulf %50, %47 : vector<32x1xf32>
    %52 = arith.select %49, %47, %51 : vector<32x1xi1>, vector<32x1xf32>
    %53 = arith.truncf %31 : vector<32x128xf32> to vector<32x128xbf16>
    %cst_45 = arith.constant dense<0.000000e+00> : vector<32x128xf32>
    %54 = tpu.matmul %53, %19, %cst_45 {dimension_numbers = #tpu.dot_dimension_numbers<[1], [0], [0], [1], [0, 0, 1, 1], [], []>} : vector<32x128xbf16>, vector<128x128xbf16>, vector<32x128xf32> -> vector<32x128xf32>
    %55 = arith.truncf %7 : vector<32x256xf32> to vector<32x256xbf16>
    %cst_46 = arith.constant dense<0.000000e+00> : vector<32x128xf32>
    %56 = tpu.matmul %55, %21, %cst_46 {dimension_numbers = #tpu.dot_dimension_numbers<[1], [0], [0], [1], [0, 0, 1, 1], [], []>} : vector<32x256xbf16>, vector<256x128xbf16>, vector<32x128xf32> -> vector<32x128xf32>
    %57 = arith.addf %54, %56 : vector<32x128xf32>
    %58 = vector.shape_cast %52 : vector<32x1xf32> to vector<32xf32>
    %59 = vector.shape_cast %58 : vector<32xf32> to vector<1x32xf32>
    %60 = vector.shape_cast %59 : vector<1x32xf32> to vector<1x32xf32>
    %61 = vector.broadcast %60 : vector<1x32xf32> to vector<16x32xf32>
    %cst_47 = arith.constant -1.000000e+30 : f32
    %62 = vector.broadcast %cst_47 : f32 to vector<16x32xf32>
    %63 = arith.select %5, %61, %62 : vector<16x32xi1>, vector<16x32xf32>
    %cst_48 = arith.constant dense<0xFF800000> : vector<16xf32>
    %64 = vector.multi_reduction <maximumf>, %63, %cst_48 [1] : vector<16x32xf32> to vector<16xf32>
    %65 = vector.shape_cast %64 : vector<16xf32> to vector<16x1xf32>
    %66 = vector.broadcast %65 : vector<16x1xf32> to vector<16x32xf32>
    %67 = arith.subf %63, %66 : vector<16x32xf32>
    %68 = math.exp %67 : vector<16x32xf32>
    %cst_49 = arith.constant 0.000000e+00 : f32
    %69 = vector.broadcast %cst_49 : f32 to vector<16x32xf32>
    %70 = arith.select %5, %68, %69 : vector<16x32xi1>, vector<16x32xf32>
    %cst_50 = arith.constant dense<0.000000e+00> : vector<16xf32>
    %71 = vector.multi_reduction <add>, %70, %cst_50 [1] : vector<16x32xf32> to vector<16xf32>
    %72 = vector.shape_cast %71 : vector<16xf32> to vector<16x1xf32>
    %cst_51 = arith.constant 9.99999968E-21 : f32
    %73 = vector.broadcast %cst_51 : f32 to vector<16x1xf32>
    %74 = arith.maximumf %72, %73 : vector<16x1xf32>
    %75 = tpu.reciprocal %74 {approx = true} : vector<16x1xf32> -> vector<16x1xf32>
    %76 = vector.broadcast %75 : vector<16x1xf32> to vector<16x32xf32>
    %77 = arith.mulf %70, %76 : vector<16x32xf32>
    %78 = arith.truncf %77 : vector<16x32xf32> to vector<16x32xbf16>
    %79 = arith.truncf %57 : vector<32x128xf32> to vector<32x128xbf16>
    %cst_52 = arith.constant dense<0.000000e+00> : vector<16x128xf32>
    %80 = tpu.matmul %78, %79, %cst_52 {dimension_numbers = #tpu.dot_dimension_numbers<[1], [0], [0], [1], [0, 0, 1, 1], [], []>} : vector<16x32xbf16>, vector<32x128xbf16>, vector<16x128xf32> -> vector<16x128xf32>
    %81 = arith.truncf %80 : vector<16x128xf32> to vector<16x128xbf16>
    %cst_53 = arith.constant dense<0.000000e+00> : vector<32x128xf32>
    %82 = tpu.matmul %8, %81, %cst_53 {dimension_numbers = #tpu.dot_dimension_numbers<[1], [0], [0], [1], [0, 0, 1, 1], [], []>} : vector<32x16xbf16>, vector<16x128xbf16>, vector<32x128xf32> -> vector<32x128xf32>
    %83 = arith.truncf %80 : vector<16x128xf32> to vector<16x128xbf16>
    %cst_54 = arith.constant dense<0.000000e+00> : vector<32x128xf32>
    %84 = tpu.matmul %9, %83, %cst_54 {dimension_numbers = #tpu.dot_dimension_numbers<[1], [0], [0], [1], [0, 0, 1, 1], [], []>} : vector<32x16xbf16>, vector<16x128xbf16>, vector<32x128xf32> -> vector<32x128xf32>
    %85 = arith.truncf %82 : vector<32x128xf32> to vector<32x128xbf16>
    %cst_55 = arith.constant dense<0.000000e+00> : vector<32x128xf32>
    %86 = tpu.matmul %85, %23, %cst_55 {dimension_numbers = #tpu.dot_dimension_numbers<[1], [0], [0], [1], [0, 0, 1, 1], [], []>} : vector<32x128xbf16>, vector<128x128xbf16>, vector<32x128xf32> -> vector<32x128xf32>
    %87 = arith.truncf %84 : vector<32x128xf32> to vector<32x128xbf16>
    %cst_56 = arith.constant dense<0.000000e+00> : vector<32x128xf32>
    %88 = tpu.matmul %87, %25, %cst_56 {dimension_numbers = #tpu.dot_dimension_numbers<[1], [0], [0], [1], [0, 0, 1, 1], [], []>} : vector<32x128xbf16>, vector<128x128xbf16>, vector<32x128xf32> -> vector<32x128xf32>
    %89 = arith.addf %86, %88 : vector<32x128xf32>
    %90 = arith.truncf %7 : vector<32x256xf32> to vector<32x256xbf16>
    %cst_57 = arith.constant dense<0.000000e+00> : vector<32x128xf32>
    %91 = tpu.matmul %90, %27, %cst_57 {dimension_numbers = #tpu.dot_dimension_numbers<[1], [0], [0], [1], [0, 0, 1, 1], [], []>} : vector<32x256xbf16>, vector<256x128xbf16>, vector<32x128xf32> -> vector<32x128xf32>
    %92 = arith.addf %89, %91 : vector<32x128xf32>
    %c0_58 = arith.constant 0 : index
    %c0_59 = arith.constant 0 : index
    %93 = vector.load %arg26[%c0_58, %c0_59] : memref<16x128xf32, #tpu.memory_space<vmem>>, vector<16x128xf32>
    %cst_60 = arith.constant 5.000000e-01 : f32
    %94 = vector.broadcast %cst_60 : f32 to vector<16x128xf32>
    %95 = arith.mulf %80, %94 : vector<16x128xf32>
    %96 = arith.addf %93, %95 : vector<16x128xf32>
    %c0_61 = arith.constant 0 : index
    %c0_62 = arith.constant 0 : index
    %97 = vector.load %arg26[%c0_61, %c0_62] : memref<16x128xf32, #tpu.memory_space<vmem>>, vector<16x128xf32>
    tpu.vector_store %arg26[%c0_61, %c0_62], %96 {strides = array<i32>} : memref<16x128xf32, #tpu.memory_space<vmem>>, vector<16x128xf32>,
    %c0_63 = arith.constant 0 : index
    %c0_64 = arith.constant 0 : index
    %98 = vector.load %arg27[%c0_63, %c0_64] : memref<32x128xf32, #tpu.memory_space<vmem>>, vector<32x128xf32>
    %cst_65 = arith.constant 5.000000e-01 : f32
    %99 = vector.broadcast %cst_65 : f32 to vector<32x128xf32>
    %100 = arith.mulf %92, %99 : vector<32x128xf32>
    %101 = arith.addf %98, %100 : vector<32x128xf32>
    %c0_66 = arith.constant 0 : index
    %c0_67 = arith.constant 0 : index
    %102 = vector.load %arg27[%c0_66, %c0_67] : memref<32x128xf32, #tpu.memory_space<vmem>>, vector<32x128xf32>
    tpu.vector_store %arg27[%c0_66, %c0_67], %101 {strides = array<i32>} : memref<32x128xf32, #tpu.memory_space<vmem>>, vector<32x128xf32>,
    %c1_i32 = arith.constant 1 : i32
    %103 = arith.cmpi eq, %arg0, %c1_i32 : i32
    %104 = arith.extui %103 : i1 to i32
    %c0_i32_68 = arith.constant 0 : i32
    %105 = arith.cmpi ne, %104, %c0_i32_68 : i32
    scf.if %105 {
      %c0_69 = arith.constant 0 : index
      %c0_70 = arith.constant 0 : index
      %106 = vector.load %arg26[%c0_69, %c0_70] : memref<16x128xf32, #tpu.memory_space<vmem>>, vector<16x128xf32>
      %c0_71 = arith.constant 0 : index
      %c0_72 = arith.constant 0 : index
      %107 = vector.load %arg27[%c0_71, %c0_72] : memref<32x128xf32, #tpu.memory_space<vmem>>, vector<32x128xf32>
      %cst_73 = arith.constant dense<0.000000e+00> : vector<128xf32>
      %108 = vector.multi_reduction <add>, %106, %cst_73 [0] : vector<16x128xf32> to vector<128xf32>
      %109 = vector.shape_cast %108 : vector<128xf32> to vector<1x128xf32>
      %cst_74 = arith.constant 1.600000e+01 : f32
      %110 = vector.broadcast %cst_74 : f32 to vector<1x128xf32>
      %111 = arith.divf %109, %110 : vector<1x128xf32>
      %c0_75 = arith.constant 0 : index
      %c0_76 = arith.constant 0 : index
      %112 = vector.load %arg15[%c0_75, %c0_76] : memref<128x32xbf16, #tpu.memory_space<vmem>>, vector<128x32xbf16>
      %113 = arith.truncf %111 : vector<1x128xf32> to vector<1x128xbf16>
      %cst_77 = arith.constant dense<0.000000e+00> : vector<1x32xf32>
      %114 = tpu.matmul %113, %112, %cst_77 {dimension_numbers = #tpu.dot_dimension_numbers<[1], [0], [0], [1], [0, 0, 1, 1], [], []>} : vector<1x128xbf16>, vector<128x32xbf16>, vector<1x32xf32> -> vector<1x32xf32>
      %c0_78 = arith.constant 0 : index
      %c0_79 = arith.constant 0 : index
      %115 = vector.load %arg16[%c0_78, %c0_79] : memref<1x32xf32, #tpu.memory_space<vmem>>, vector<1x32xf32>
      %116 = arith.addf %114, %115 : vector<1x32xf32>
      %cst_80 = arith.constant 0.000000e+00 : f32
      %117 = vector.broadcast %cst_80 : f32 to vector<1x32xf32>
      %118 = arith.maximumf %116, %117 : vector<1x32xf32>
      %c0_81 = arith.constant 0 : index
      %c0_82 = arith.constant 0 : index
      %119 = vector.load %arg17[%c0_81, %c0_82] : memref<32x128xbf16, #tpu.memory_space<vmem>>, vector<32x128xbf16>
      %120 = arith.truncf %118 : vector<1x32xf32> to vector<1x32xbf16>
      %cst_83 = arith.constant dense<0.000000e+00> : vector<1x128xf32>
      %121 = tpu.matmul %120, %119, %cst_83 {dimension_numbers = #tpu.dot_dimension_numbers<[1], [0], [0], [1], [0, 0, 1, 1], [], []>} : vector<1x32xbf16>, vector<32x128xbf16>, vector<1x128xf32> -> vector<1x128xf32>
      %c0_84 = arith.constant 0 : index
      %c0_85 = arith.constant 0 : index
      %122 = vector.load %arg18[%c0_84, %c0_85] : memref<1x128xf32, #tpu.memory_space<vmem>>, vector<1x128xf32>
      %123 = arith.addf %121, %122 : vector<1x128xf32>
      %c0_86 = arith.constant 0 : index
      %c0_87 = arith.constant 0 : index
      %124 = vector.load %arg24[%c0_86, %c0_87] : memref<1x128xf32, #tpu.memory_space<vmem>>, vector<1x128xf32>
      tpu.vector_store %arg24[%c0_86, %c0_87], %123 {strides = array<i32>} : memref<1x128xf32, #tpu.memory_space<vmem>>, vector<1x128xf32>,
      %c0_88 = arith.constant 0 : index
      %c0_89 = arith.constant 0 : index
      %125 = vector.load %arg19[%c0_88, %c0_89] : memref<128x32xbf16, #tpu.memory_space<vmem>>, vector<128x32xbf16>
      %126 = arith.truncf %111 : vector<1x128xf32> to vector<1x128xbf16>
      %cst_90 = arith.constant dense<0.000000e+00> : vector<1x32xf32>
      %127 = tpu.matmul %126, %125, %cst_90 {dimension_numbers = #tpu.dot_dimension_numbers<[1], [0], [0], [1], [0, 0, 1, 1], [], []>} : vector<1x128xbf16>, vector<128x32xbf16>, vector<1x32xf32> -> vector<1x32xf32>
      %c0_91 = arith.constant 0 : index
      %c0_92 = arith.constant 0 : index
      %128 = vector.load %arg20[%c0_91, %c0_92] : memref<128x32xbf16, #tpu.memory_space<vmem>>, vector<128x32xbf16>
      %129 = arith.truncf %107 : vector<32x128xf32> to vector<32x128xbf16>
      %cst_93 = arith.constant dense<0.000000e+00> : vector<32x32xf32>
      %130 = tpu.matmul %129, %128, %cst_93 {dimension_numbers = #tpu.dot_dimension_numbers<[1], [0], [0], [1], [0, 0, 1, 1], [], []>} : vector<32x128xbf16>, vector<128x32xbf16>, vector<32x32xf32> -> vector<32x32xf32>
      %131 = vector.broadcast %127 : vector<1x32xf32> to vector<32x32xf32>
      %132 = arith.addf %130, %131 : vector<32x32xf32>
      %c0_94 = arith.constant 0 : index
      %c0_95 = arith.constant 0 : index
      %133 = vector.load %arg21[%c0_94, %c0_95] : memref<1x32xf32, #tpu.memory_space<vmem>>, vector<1x32xf32>
      %134 = vector.broadcast %133 : vector<1x32xf32> to vector<32x32xf32>
      %135 = arith.addf %132, %134 : vector<32x32xf32>
      %cst_96 = arith.constant 0.000000e+00 : f32
      %136 = vector.broadcast %cst_96 : f32 to vector<32x32xf32>
      %137 = arith.maximumf %135, %136 : vector<32x32xf32>
      %c0_97 = arith.constant 0 : index
      %c0_98 = arith.constant 0 : index
      %138 = vector.load %arg22[%c0_97, %c0_98] : memref<32x128xbf16, #tpu.memory_space<vmem>>, vector<32x128xbf16>
      %139 = arith.truncf %137 : vector<32x32xf32> to vector<32x32xbf16>
      %cst_99 = arith.constant dense<0.000000e+00> : vector<32x128xf32>
      %140 = tpu.matmul %139, %138, %cst_99 {dimension_numbers = #tpu.dot_dimension_numbers<[1], [0], [0], [1], [0, 0, 1, 1], [], []>} : vector<32x32xbf16>, vector<32x128xbf16>, vector<32x128xf32> -> vector<32x128xf32>
      %c0_100 = arith.constant 0 : index
      %c0_101 = arith.constant 0 : index
      %141 = vector.load %arg23[%c0_100, %c0_101] : memref<1x128xf32, #tpu.memory_space<vmem>>, vector<1x128xf32>
      %142 = vector.broadcast %141 : vector<1x128xf32> to vector<32x128xf32>
      %143 = arith.addf %140, %142 : vector<32x128xf32>
      %c0_102 = arith.constant 0 : index
      %c0_103 = arith.constant 0 : index
      %144 = vector.load %arg25[%c0_102, %c0_103] : memref<32x128xf32, #tpu.memory_space<vmem>>, vector<32x128xf32>
      tpu.vector_store %arg25[%c0_102, %c0_103], %143 {strides = array<i32>} : memref<32x128xf32, #tpu.memory_space<vmem>>, vector<32x128xf32>,
    } else {
    }
    return
  }
  func.func @transform_0(%arg0: i32) -> (i32, i32) {
    %c0_i32 = arith.constant 0 : i32
    %c0_i32_0 = arith.constant 0 : i32
    %c0_i32_1 = arith.constant 0 : i32
    return %c0_i32, %c0_i32_0 : i32, i32
  }
  func.func @transform_1(%arg0: i32) -> (i32, i32) {
    %c0_i32 = arith.constant 0 : i32
    %c0_i32_0 = arith.constant 0 : i32
    %c0_i32_1 = arith.constant 0 : i32
    return %c0_i32, %c0_i32_0 : i32, i32
  }
  func.func @transform_2(%arg0: i32) -> (i32, i32) {
    %c0_i32 = arith.constant 0 : i32
    %c0_i32_0 = arith.constant 0 : i32
    %c0_i32_1 = arith.constant 0 : i32
    return %c0_i32, %c0_i32_0 : i32, i32
  }
  func.func @transform_3(%arg0: i32) -> (i32, i32) {
    %c0_i32 = arith.constant 0 : i32
    %c0_i32_0 = arith.constant 0 : i32
    %c0_i32_1 = arith.constant 0 : i32
    return %c0_i32, %c0_i32_0 : i32, i32
  }
  func.func @transform_4(%arg0: i32) -> (i32, i32) {
    %c0_i32 = arith.constant 0 : i32
    %c0_i32_0 = arith.constant 0 : i32
    %c0_i32_1 = arith.constant 0 : i32
    return %c0_i32, %c0_i32_0 : i32, i32
  }
  func.func @transform_5(%arg0: i32) -> (i32, i32, i32) {
    %c0_i32 = arith.constant 0 : i32
    %c0_i32_0 = arith.constant 0 : i32
    %c0_i32_1 = arith.constant 0 : i32
    return %arg0, %c0_i32, %c0_i32_0 : i32, i32, i32
  }
  func.func @transform_6(%arg0: i32) -> (i32, i32, i32) {
    %c0_i32 = arith.constant 0 : i32
    %c0_i32_0 = arith.constant 0 : i32
    %c0_i32_1 = arith.constant 0 : i32
    return %arg0, %c0_i32, %c0_i32_0 : i32, i32, i32
  }
  func.func @transform_7(%arg0: i32) -> (i32, i32, i32) {
    %c0_i32 = arith.constant 0 : i32
    %c0_i32_0 = arith.constant 0 : i32
    %c0_i32_1 = arith.constant 0 : i32
    return %arg0, %c0_i32, %c0_i32_0 : i32, i32, i32
  }
  func.func @transform_8(%arg0: i32) -> (i32, i32, i32) {
    %c0_i32 = arith.constant 0 : i32
    %c0_i32_0 = arith.constant 0 : i32
    %c0_i32_1 = arith.constant 0 : i32
    return %arg0, %c0_i32, %c0_i32_0 : i32, i32, i32
  }
  func.func @transform_9(%arg0: i32) -> (i32, i32, i32) {
    %c0_i32 = arith.constant 0 : i32
    %c0_i32_0 = arith.constant 0 : i32
    %c0_i32_1 = arith.constant 0 : i32
    return %arg0, %c0_i32, %c0_i32_0 : i32, i32, i32
  }
  func.func @transform_10(%arg0: i32) -> (i32, i32, i32) {
    %c0_i32 = arith.constant 0 : i32
    %c0_i32_0 = arith.constant 0 : i32
    %c0_i32_1 = arith.constant 0 : i32
    return %arg0, %c0_i32, %c0_i32_0 : i32, i32, i32
  }
  func.func @transform_11(%arg0: i32) -> (i32, i32, i32) {
    %c0_i32 = arith.constant 0 : i32
    %c0_i32_0 = arith.constant 0 : i32
    %c0_i32_1 = arith.constant 0 : i32
    return %arg0, %c0_i32, %c0_i32_0 : i32, i32, i32
  }
  func.func @transform_12(%arg0: i32) -> (i32, i32, i32) {
    %c0_i32 = arith.constant 0 : i32
    %c0_i32_0 = arith.constant 0 : i32
    %c0_i32_1 = arith.constant 0 : i32
    return %arg0, %c0_i32, %c0_i32_0 : i32, i32, i32
  }
  func.func @transform_13(%arg0: i32) -> (i32, i32, i32) {
    %c0_i32 = arith.constant 0 : i32
    %c0_i32_0 = arith.constant 0 : i32
    %c0_i32_1 = arith.constant 0 : i32
    return %arg0, %c0_i32, %c0_i32_0 : i32, i32, i32
  }
  func.func @transform_14(%arg0: i32) -> (i32, i32) {
    %c0_i32 = arith.constant 0 : i32
    %c0_i32_0 = arith.constant 0 : i32
    %c0_i32_1 = arith.constant 0 : i32
    return %c0_i32, %c0_i32_0 : i32, i32
  }
  func.func @transform_15(%arg0: i32) -> (i32, i32) {
    %c0_i32 = arith.constant 0 : i32
    %c0_i32_0 = arith.constant 0 : i32
    %c0_i32_1 = arith.constant 0 : i32
    return %c0_i32, %c0_i32_0 : i32, i32
  }
  func.func @transform_16(%arg0: i32) -> (i32, i32) {
    %c0_i32 = arith.constant 0 : i32
    %c0_i32_0 = arith.constant 0 : i32
    %c0_i32_1 = arith.constant 0 : i32
    return %c0_i32, %c0_i32_0 : i32, i32
  }
  func.func @transform_17(%arg0: i32) -> (i32, i32) {
    %c0_i32 = arith.constant 0 : i32
    %c0_i32_0 = arith.constant 0 : i32
    %c0_i32_1 = arith.constant 0 : i32
    return %c0_i32, %c0_i32_0 : i32, i32
  }
  func.func @transform_18(%arg0: i32) -> (i32, i32) {
    %c0_i32 = arith.constant 0 : i32
    %c0_i32_0 = arith.constant 0 : i32
    %c0_i32_1 = arith.constant 0 : i32
    return %c0_i32, %c0_i32_0 : i32, i32
  }
  func.func @transform_19(%arg0: i32) -> (i32, i32) {
    %c0_i32 = arith.constant 0 : i32
    %c0_i32_0 = arith.constant 0 : i32
    %c0_i32_1 = arith.constant 0 : i32
    return %c0_i32, %c0_i32_0 : i32, i32
  }
  func.func @transform_20(%arg0: i32) -> (i32, i32) {
    %c0_i32 = arith.constant 0 : i32
    %c0_i32_0 = arith.constant 0 : i32
    %c0_i32_1 = arith.constant 0 : i32
    return %c0_i32, %c0_i32_0 : i32, i32
  }
  func.func @transform_21(%arg0: i32) -> (i32, i32) {
    %c0_i32 = arith.constant 0 : i32
    %c0_i32_0 = arith.constant 0 : i32
    %c0_i32_1 = arith.constant 0 : i32
    return %c0_i32, %c0_i32_0 : i32, i32
  }
  func.func @transform_22(%arg0: i32) -> (i32, i32) {
    %c0_i32 = arith.constant 0 : i32
    %c0_i32_0 = arith.constant 0 : i32
    %c0_i32_1 = arith.constant 0 : i32
    return %c0_i32, %c0_i32_0 : i32, i32
  }
  func.func @transform_23(%arg0: i32) -> (i32, i32) {
    %c0_i32 = arith.constant 0 : i32
    %c0_i32_0 = arith.constant 0 : i32
    %c0_i32_1 = arith.constant 0 : i32
    return %c0_i32, %c0_i32_0 : i32, i32
  }
  func.func @transform_24(%arg0: i32) -> (i32, i32) {
    %c0_i32 = arith.constant 0 : i32
    %c0_i32_0 = arith.constant 0 : i32
    %c0_i32_1 = arith.constant 0 : i32
    return %c0_i32, %c0_i32_0 : i32, i32
  }
}

</mosaic_0001>

<bundles_post_ra>
// kernel: gatnet_forward.2
= control target key start
LH: loop header
LB: loop body
LE: loop exit
PB: predicated region body
PF: predicated region fallthrough
CT: control target
= control target key end

     0   :  { %s3402_s0 = inlined_call_operand.hbm [shape: f32[16,16], index: 0, kind: input, shape index: {}]   ;;  %s3403_s1 = inlined_call_operand.vmem [shape: f32[32,12], index: 1, kind: input, shape index: {}]   ;;  %s3404_s2 = inlined_call_operand.vmem [shape: bf16[32,16], index: 2, kind: input, shape index: {}]   ;;  %s3405_s3 = inlined_call_operand.vmem [shape: bf16[32,16], index: 3, kind: input, shape index: {}]   ;;  %s3406_s4 = inlined_call_operand.vmem [shape: f32[16,32], index: 4, kind: input, shape index: {}]   ;;  %s3407_s5 = inlined_call_operand.hbm [shape: bf16[2,16,128], index: 5, kind: input, shape index: {}]   ;;  %s3408_s6 = inlined_call_operand.hbm [shape: f32[2,1,128], index: 6, kind: input, shape index: {}]   ;;  %s3409_s7 = inlined_call_operand.hbm [shape: f32[2,1,128], index: 7, kind: input, shape index: {}]   ;;  %s3410_s8 = inlined_call_operand.hbm [shape: f32[2,1,12], index: 8, kind: input, shape index: {}]   ;;  %s3411_s9 = inlined_call_operand.hbm [shape: bf16[2,128,128], index: 9, kind: input, shape index: {}]   ;;  %s3412_s10 = inlined_call_operand.vmem [shape: bf16[2,12,128], index: 10, kind: input, shape index: {}]   ;;  %s3413_s11 = inlined_call_operand.hbm [shape: bf16[2,128,128], index: 11, kind: input, shape index: {}]   ;;  %s3414_s12 = inlined_call_operand.hbm [shape: bf16[2,128,128], index: 12, kind: input, shape index: {}]   ;;  %s3415_s13 = inlined_call_operand.vmem [shape: bf16[2,12,128], index: 13, kind: input, shape index: {}]   ;;  %s3416_s14 = inlined_call_operand.vmem [shape: f32[16,256], index: 14, kind: output, shape index: {0}]   ;;  %s3417_s15 = inlined_call_operand.vmem [shape: f32[32,256], index: 15, kind: output, shape index: {1}]  }
   0x1   :  { %3437 = sst [smem:[#allocation27_spill]] %s3403_s1 }
   0x2   :  { %3438 = sst [smem:[#allocation28_spill]] %s3404_s2 }
   0x3   :  { %3439 = sst [smem:[#allocation29_spill]] %s3405_s3 }
   0x4   :  { %3440 = sst [smem:[#allocation30_spill]] %s3406_s4 }
   0x5   :  { %3441 = sst [smem:[#allocation31_spill]] %s3407_s5 }
   0x6   :  { %3442 = sst [smem:[#allocation32_spill]] %s3409_s7 }
   0x7   :  { %3443 = sst [smem:[#allocation33_spill]] %s3411_s9 }
   0x8   :  { %3444 = sst [smem:[#allocation34_spill]] %s3412_s10 }
   0x9   :  { %3445 = sst [smem:[#allocation35_spill]] %s3415_s13 }
   0xa   :  { %3446 = sst [smem:[#allocation36_spill]] %s3416_s14 }
   0xb   :  { %3447 = sst [smem:[#allocation37_spill]] %s3417_s15 }
   0xc   :  { %21 = vsyncpa [#allocation3], 0 }
   0xd   :  { %22 = vsyncpa [#allocation5], 0 }
   0xe   :  { %24 = vsyncpa [#allocation5 + $0x1], 0 }
   0xf   :  { %25 = vsyncpa [#allocation8], 0 }
  0x10   :  { %27 = vsyncpa [#allocation8 + $0x1], 0 }
  0x11   :  { %28 = vsyncpa [#allocation11], 0 }
  0x12   :  { %30 = vsyncpa [#allocation11 + $0x1], 0 }
  0x13   :  { %31 = vsyncpa [#allocation14], 0 }
  0x14   :  { %33 = vsyncpa [#allocation14 + $0x1], 0  ;;  %s2882_s18 = smov 0   ;;  %s2884_s19 = smov 0  }
  0x15   :  { %s2886_s20 = smov 0   ;;  %s2888_s21 = smov 0  }
  0x16 LB: > { %3448 = sst [smem:[#allocation22_spill]] %s2782_s20  ;;  %s2903_s22 = sadd.s32 1, %s2786_s21   ;;  %s2786_s21 = sphi %s2888_s21, %s3487_s21   ;;  %s2782_s20 = sphi %s2886_s20, %s3489_s20   ;;  %s2778_s19 = sphi %s2884_s19, %s3491_s19   ;;  %s2774_s18 = sphi %s2882_s18, %s3490_s18  }
  0x17   : > { %3449 = sst [smem:[#allocation23_spill]] %s2903_s22  ;;  %s151_s23 = sadd.s32 1, %s2782_s20 }
  0x18   : > { %s148_s24 = ssub.s32 %s2786_s21, %s2903_s22  ;;  %p3420_p0 = scmp.ne.s32.totalorder %s2782_s20, %s2778_s19 }
  0x19   : > { %p149_p1 = scmp.eq.s32.totalorder %s148_s24, 0  ;;  %p159_p2 = scmp.eq.s32.totalorder %s2786_s21, 0 }
  0x1a   : > { %p2430_p3 = scmp.lt.s32.totalorder %s2786_s21, 2  ;;  %s2919_s26 = sand.u32 1, %s2786_s21  }
  0x1b   : > { %s2913_s25 = scalar_select %p149_p1, %s2782_s20, %s151_s23  }
  0x1c   : > { %p160_p4 = por %p159_p2, %p3420_p0  ;;  %s2922_s27 = sand.u32 1, %s2782_s20  }
  0x1d   : > { %3450 = sst [smem:[#allocation24_spill]] %s2913_s25  ;;  %s2131_s28 = sshll.u32 %s2922_s27, 3 }
  0x1e   : > { %s2214_s29 = sshll.u32 %s2786_s21, 7  ;;  %s3451_s5 = sld [smem:[#allocation31_spill]] }
  0x1f   : > { %s477_s23 = scalar_lea.vmem [#allocation4], %s2131_s28  ;;  %p2931_p5 = pnand %p2430_p3, %p160_p4 }
  0x20   : > { %s484_s24 = sshll.u32 %s477_s23, 4  ;;  %s2935_s24 = int_to_ptr.vmem [resolvable:$true] %s484_s24 }
  0x21   : > { %p2942_p7 = pneg %p2931_p5 }
  0x24   : > { %s2929_s17 = scalar_lea.hbm %s3451_s5, %s2214_s29  ;;  %s2519_s16 = scalar_lea.hbm %s3451_s5, 256 }
  0x25   : > { %s2514_s15 = scalar_lea.hbm %s2929_s17, 128  ;;  %p2520_p10 = scmp.lt.s32.totalorder %s2929_s17, %s3451_s5 }
  0x26   : > { %p2515_p6 = scmp.ne.s32.totalorder %s2929_s17, %s2514_s15  ;;  %p2521_p11 = scmp.lt.s32.totalorder %s2519_s16, %s2514_s15 }
  0x28   : > { %p2517_p8 = pnand %p2942_p7, %p2515_p6  ;;  %p2522_p12 = por %p2521_p11, %p2520_p10 }
  0x2a   : > { %p2518_p9 = pneg %p2517_p8 }
  0x2c   : > { %p2523_p13 = pnand %p2522_p12, %p2518_p9 }
  0x2e   : > { %2526 = shalt.err (!%p2523_p13)
}
  0x2f   : > { %s2527_s22 = scalar_lea.vmem %s2935_s24, 128  ;;  %s2788_s13 = smov [#allocation4]  }
  0x30   : > { %p2528_p1 = scmp.ne.s32.totalorder %s2935_s24, %s2527_s22  ;;  %s2532_s28 = sshll.u32 %s2788_s13, 4  ;;  %s2533_s28 = int_to_ptr.vmem [resolvable:$false] %s2532_s28 }
  0x31   : > { %s2534_s29 = scalar_lea.vmem %s2533_s28, 256  ;;  %p2535_p4 = scmp.lt.s32.totalorder %s2935_s24, %s2533_s28 }
  0x32   : > { %p2530_p2 = pnand %p2528_p1, %p2942_p7  ;;  %p2536_p6 = scmp.lt.s32.totalorder %s2534_s29, %s2527_s22 }
  0x34   : > { %p2531_p3 = pneg %p2530_p2  ;;  %p2537_p8 = por %p2536_p6, %p2535_p4 }
  0x36   : > { %p2538_p0 = pnand %p2537_p8, %p2531_p3 }
  0x38   : > { %2541 = shalt.err (!%p2538_p0)
}
  0x39   : > { %s3423_s14 = smov 64   ;;  %s3425_s15 = smov 4  }
  0x3a   : > { %s3454_s13 = scalar_lea.sflag [#allocation5], %s2919_s26  ;;  %s2970_s22 = sshll.u32 %s2786_s21, 4 }
  0x3b   : > { %2410 = dma.hbm_to_vmem [thread:$0]  (!%p2931_p5), %s2929_s17, 128, %s2935_s24, %s3454_s13, %s3423_s14, %s3423_s14, %s3425_s15  }
  0x3c   : > { %s3455_s7 = sld [smem:[#allocation32_spill]]  ;;  %s514_s29 = scalar_lea.vmem [#allocation7], %s2922_s27 }
  0x3d   : > { %s521_s5 = sshll.u32 %s514_s29, 4  ;;  %s2980_s4 = sshll.u32 %s2922_s27, 6  ;;  %s522_s5 = int_to_ptr.vmem [resolvable:$true] %s521_s5 }
  0x42   : > { %s2976_s28 = scalar_lea.hbm %s3455_s7, %s2970_s22  ;;  %s2547_s13 = scalar_lea.hbm %s3455_s7, 32 }
  0x43   : > { %s2542_s1 = scalar_lea.hbm %s2976_s28, 16  ;;  %p2548_p11 = scmp.lt.s32.totalorder %s2976_s28, %s3455_s7 }
  0x44   : > { %p2543_p0 = scmp.ne.s32.totalorder %s2976_s28, %s2542_s1  ;;  %p2549_p12 = scmp.lt.s32.totalorder %s2547_s13, %s2542_s1 }
  0x46   : > { %p2545_p9 = pnand %p2543_p0, %p2942_p7  ;;  %p2550_p13 = por %p2549_p12, %p2548_p11 }
  0x48   : > { %p2546_p10 = pneg %p2545_p9 }
  0x4a   : > { %p2551_p1 = pnand %p2550_p13, %p2546_p10 }
  0x4c   : > { %2554 = shalt.err (!%p2551_p1)
}
  0x4d   : > { %s2555_s29 = scalar_lea.vmem %s522_s5, 16  ;;  %s2791_s14 = smov [#allocation7]  }
  0x4e   : > { %p2556_p2 = scmp.ne.s32.totalorder %s522_s5, %s2555_s29  ;;  %s2560_s15 = sshll.u32 %s2791_s14, 4  ;;  %s2561_s15 = int_to_ptr.vmem [resolvable:$false] %s2560_s15 }
  0x4f   : > { %s2562_s10 = scalar_lea.vmem %s2561_s15, 32  ;;  %p2563_p6 = scmp.lt.s32.totalorder %s522_s5, %s2561_s15 }
  0x50   : > { %p2558_p3 = pnand %p2556_p2, %p2942_p7  ;;  %p2564_p8 = scmp.lt.s32.totalorder %s2562_s10, %s2555_s29 }
  0x52   : > { %p2559_p4 = pneg %p2558_p3  ;;  %p2565_p0 = por %p2564_p8, %p2563_p6 }
  0x54   : > { %p2566_p9 = pnand %p2565_p0, %p2559_p4 }
  0x56   : > { %2569 = shalt.err (!%p2566_p9)
}
  0x57   : > { %s3456_s1 = scalar_lea.sflag [#allocation8], %s2919_s26  ;;  %s3002_s17 = sshll.u32 %s2786_s21, 10 }
  0x58   : > { %2416 = dma.hbm_to_vmem [thread:$0]  (!%p2931_p5), %s2976_s28, 16, %s522_s5, %s3456_s1  }
  0x59   : > { %s3457_s9 = sld [smem:[#allocation33_spill]]  ;;  %s549_s15 = scalar_lea.vmem [#allocation10], %s2980_s4 }
  0x5a   : > { %s556_s13 = sshll.u32 %s549_s15, 4  ;;  %s3427_s16 = scalar_lea.sflag [#allocation11], %s2919_s26  ;;  %s3011_s13 = int_to_ptr.vmem [resolvable:$true] %s556_s13 }
  0x5f   : > { %s3008_s10 = scalar_lea.hbm %s3457_s9, %s3002_s17  ;;  %s2575_s29 = scalar_lea.hbm %s3457_s9, 2048 }
  0x60   : > { %s2570_s23 = scalar_lea.hbm %s3008_s10, 1024  ;;  %p2576_p13 = scmp.lt.s32.totalorder %s3008_s10, %s3457_s9 }
  0x61   : > { %p2571_p10 = scmp.ne.s32.totalorder %s3008_s10, %s2570_s23  ;;  %p2577_p1 = scmp.lt.s32.totalorder %s2575_s29, %s2570_s23 }
  0x63   : > { %p2573_p11 = pnand %p2571_p10, %p2942_p7  ;;  %p2578_p2 = por %p2577_p1, %p2576_p13 }
  0x65   : > { %p2574_p12 = pneg %p2573_p11 }
  0x67   : > { %p2579_p3 = pnand %p2578_p2, %p2574_p12 }
  0x69   : > { %2582 = shalt.err (!%p2579_p3)
}
  0x6a   : > { %s2583_s24 = scalar_lea.vmem %s3011_s13, 1024  ;;  %s2792_s15 = smov [#allocation10]  }
  0x6b   : > { %p2584_p4 = scmp.ne.s32.totalorder %s3011_s13, %s2583_s24  ;;  %s2588_s5 = sshll.u32 %s2792_s15, 4  ;;  %s2589_s5 = int_to_ptr.vmem [resolvable:$false] %s2588_s5 }
  0x6c   : > { %s2590_s28 = scalar_lea.vmem %s2589_s5, 2048  ;;  %p2591_p0 = scmp.lt.s32.totalorder %s3011_s13, %s2589_s5 }
  0x6d   : > { %p2586_p6 = pnand %p2584_p4, %p2942_p7  ;;  %p2592_p9 = scmp.lt.s32.totalorder %s2590_s28, %s2583_s24 }
  0x6f   : > { %p2587_p8 = pneg %p2586_p6  ;;  %p2593_p10 = por %p2592_p9, %p2591_p0 }
  0x71   : > { %p2594_p11 = pnand %p2593_p10, %p2587_p8 }
  0x73   : > { %2597 = shalt.err (!%p2594_p11)
}
  0x74   : > { %s3458_s23 = smov 4   ;;  %s3459_s29 = smov 64  }
  0x75   : > { %2422 = dma.hbm_to_vmem [thread:$0]  (!%p2931_p5), %s3008_s10, 1024, %s3011_s13, %s3427_s16, %s3459_s29, %s3459_s29, %s3458_s23  }
  0x76   : > { %s3040_s1 = sadd.s32 4294967295, %s2786_s21   ;;  %p164_p12 = scmp.ne.s32.totalorder %s2778_s19, %s2774_s18 }
  0x77   : > { %p3428_p13 = scmp.eq.s32.totalorder %s3040_s1, 0  ;;  %p396_p1 = scmp.eq.s32.totalorder %s3040_s1, 1 }
  0x78   : > { %p2128_p2 = scmp.ge.s32.totalorder %s2786_s21, 1  ;;  %p435_p4 = scmp.lt.s32.totalorder %s2786_s21, 3 }
  0x79   : > { %p3049_p3 = por %p3428_p13, %p164_p12  ;;  %p3462_p6 = scmp.ne.s32.totalorder %s2782_s20, %s2778_s19 }
  0x7a   : > { %p3061_p0 = pnand %p2128_p2, %p435_p4  ;;  %s2793_s18 = smov [#allocation2]  }
  0x7b   : > { %s3460_s14 = scalar_select %p3049_p3, 1, 0 }
  0x7c   : > { %p3057_p8 = por %p396_p1, %p3462_p6  ;;  %s447_s24 = sshll.u32 %s2793_s18, 4  ;;  %s448_s24 = int_to_ptr.vmem [resolvable:$true] %s447_s24 }
  0x7d   : > { %3461 = sst [smem:[#allocation25_spill]] %s3460_s14  ;;  %p2403_p9 = pneg %p3061_p0 }
  0x7e   : > { %s3463_s10 = scalar_select %p3057_p8, 1, 0 }
  0x7f   : > { %s3465_s13 = scalar_select %p3061_p0, 1, 0 }
  0x80   : > { %3464 = sst [smem:[#allocation26_spill]] %s3463_s10  ;;  %p3069_p10 = pnand %p2403_p9, %p3428_p13 }
  0x81   : > { %s3077_s28 = scalar_lea.hbm %s3408_s6, %s2970_s22  ;;  %s497_s16 = scalar_lea.vmem [#allocation6], %s2922_s27 }
  0x82   : > { %s504_s7 = sshll.u32 %s497_s16, 4  ;;  %p2600_p11 = pneg %p3069_p10  ;;  %s3080_s7 = int_to_ptr.vmem [resolvable:$true] %s504_s7 }
  0x83   : > { %s2609_s18 = scalar_lea.vmem %s448_s24, 256  ;;  %p2617_p4 = scmp.lt.s32.totalorder %s448_s24, %s448_s24 }
  0x84   : > { %p2610_p12 = scmp.ne.s32.totalorder %s448_s24, %s2609_s18  ;;  %p2618_p6 = scmp.lt.s32.totalorder %s2609_s18, %s2609_s18 }
  0x86   : > { %p2612_p1 = pnand %p2610_p12, %p2600_p11  ;;  %p2619_p9 = por %p2618_p6, %p2617_p4 }
  0x88   : > { %p2613_p2 = pneg %p2612_p1 }
  0x8a   : > { %p2620_p13 = pnand %p2619_p9, %p2613_p2 }
  0x8c   : > { %2623 = shalt.err (!%p2620_p13)
}
  0x8d   : > { %s2794_s9 = smov 128   ;;  %s2795_s16 = smov 8  }
  0x8e   : > { %2406 = dma.hbm_to_vmem [thread:$0]  (!%p3069_p10), %s3402_s0, 256, %s448_s24, [#allocation3], %s2794_s9, %s2794_s9, %s2795_s16  }
  0x8f   : > { %s2624_s20 = scalar_lea.hbm %s3077_s28, 16  ;;  %s2629_s3 = scalar_lea.hbm %s3408_s6, 32 }
  0x90   : > { %p2625_p11 = scmp.ne.s32.totalorder %s3077_s28, %s2624_s20  ;;  %p2630_p13 = scmp.lt.s32.totalorder %s3077_s28, %s3408_s6 }
  0x91   : > { %p2631_p2 = scmp.lt.s32.totalorder %s2629_s3, %s2624_s20 }
  0x92   : > { %p2627_p12 = pnand %p2625_p11, %p2942_p7 }
  0x93   : > { %p2632_p4 = por %p2631_p2, %p2630_p13 }
  0x94   : > { %p2628_p1 = pneg %p2627_p12 }
  0x96   : > { %p2633_p6 = pnand %p2632_p4, %p2628_p1 }
  0x98   : > { %2636 = shalt.err (!%p2633_p6)
}
  0x99   : > { %s2637_s9 = scalar_lea.vmem %s3080_s7, 16  ;;  %s2796_s24 = smov [#allocation6]  }
  0x9a   : > { %p2638_p10 = scmp.ne.s32.totalorder %s3080_s7, %s2637_s9  ;;  %s2642_s10 = sshll.u32 %s2796_s24, 4  ;;  %s2643_s10 = int_to_ptr.vmem [resolvable:$false] %s2642_s10 }
  0x9b   : > { %s2644_s15 = scalar_lea.vmem %s2643_s10, 32  ;;  %p2645_p12 = scmp.lt.s32.totalorder %s3080_s7, %s2643_s10 }
  0x9c   : > { %p2640_p9 = pnand %p2638_p10, %p2942_p7  ;;  %p2646_p8 = scmp.lt.s32.totalorder %s2644_s15, %s2637_s9 }
  0x9e   : > { %p2641_p11 = pneg %p2640_p9  ;;  %p2647_p3 = por %p2646_p8, %p2645_p12 }
  0xa0   : > { %p2648_p0 = pnand %p2647_p3, %p2641_p11 }
  0xa2   : > { %2651 = shalt.err (!%p2648_p0)
}
  0xa3   : > { %s3467_s2 = scalar_lea.sflag [#allocation5], %s2919_s26  ;;  %s536_s14 = scalar_lea.hbm %s3410_s8, %s2970_s22 }
  0xa4   : > { %2413 = dma.hbm_to_vmem [thread:$0]  (!%p2931_p5), %s3077_s28, 16, %s3080_s7, %s3467_s2  }
  0xa5   : > { %s531_s16 = scalar_lea.vmem [#allocation9], %s2922_s27  ;;  %s2652_s5 = scalar_lea.hbm %s536_s14, 16 }
  0xa6   : > { %s538_s21 = sshll.u32 %s531_s16, 4  ;;  %p2653_p3 = scmp.ne.s32.totalorder %s536_s14, %s2652_s5  ;;  %s539_s21 = int_to_ptr.vmem [resolvable:$true] %s538_s21 }
  0xa7   : > { %s2657_s24 = scalar_lea.hbm %s3410_s8, 32  ;;  %p2658_p1 = scmp.lt.s32.totalorder %s536_s14, %s3410_s8 }
  0xa8   : > { %p2655_p8 = pnand %p2653_p3, %p2942_p7  ;;  %p2659_p13 = scmp.lt.s32.totalorder %s2657_s24, %s2652_s5 }
  0xaa   : > { %p2656_p0 = pneg %p2655_p8  ;;  %p2660_p2 = por %p2659_p13, %p2658_p1 }
  0xac   : > { %p2661_p4 = pnand %p2660_p2, %p2656_p0 }
  0xae   : > { %2664 = shalt.err (!%p2661_p4)
}
  0xaf   : > { %s2665_s7 = scalar_lea.vmem %s539_s21, 16  ;;  %s2797_s22 = smov [#allocation9]  }
  0xb0   : > { %p2666_p6 = scmp.ne.s32.totalorder %s539_s21, %s2665_s7  ;;  %s2670_s28 = sshll.u32 %s2797_s22, 4  ;;  %s2671_s28 = int_to_ptr.vmem [resolvable:$false] %s2670_s28 }
  0xb1   : > { %s2672_s2 = scalar_lea.vmem %s2671_s28, 32  ;;  %p2673_p11 = scmp.lt.s32.totalorder %s539_s21, %s2671_s28 }
  0xb2   : > { %p2668_p10 = pnand %p2666_p6, %p2942_p7  ;;  %p2674_p12 = scmp.lt.s32.totalorder %s2672_s2, %s2665_s7 }
  0xb4   : > { %p2669_p9 = pneg %p2668_p10  ;;  %p2675_p3 = por %p2674_p12, %p2673_p11 }
  0xb6   : > { %p2676_p8 = pnand %p2675_p3, %p2669_p9 }
  0xb8   : > { %2679 = shalt.err (!%p2676_p8)
}
  0xb9   : > { %s3468_s3 = scalar_lea.sflag [#allocation8], %s2919_s26  ;;  %s3134_s5 = scalar_lea.hbm %s3413_s11, %s3002_s17 }
  0xba   : > { %2419 = dma.hbm_to_vmem [thread:$0]  (!%p2931_p5), %s536_s14, 16, %s539_s21, %s3468_s3  }
  0xbb   : > { %s578_s18 = scalar_lea.vmem [#allocation12], %s2980_s4  ;;  %s2680_s24 = scalar_lea.hbm %s3134_s5, 1024 }
  0xbc   : > { %s585_s9 = sshll.u32 %s578_s18, 4  ;;  %p2681_p0 = scmp.ne.s32.totalorder %s3134_s5, %s2680_s24  ;;  %s586_s9 = int_to_ptr.vmem [resolvable:$true] %s585_s9 }
  0xbd   : > { %s2685_s14 = scalar_lea.hbm %s3413_s11, 2048  ;;  %p2686_p2 = scmp.lt.s32.totalorder %s3134_s5, %s3413_s11 }
  0xbe   : > { %p2683_p1 = pnand %p2681_p0, %p2942_p7  ;;  %p2687_p4 = scmp.lt.s32.totalorder %s2685_s14, %s2680_s24 }
  0xc0   : > { %p2684_p13 = pneg %p2683_p1  ;;  %p2688_p6 = por %p2687_p4, %p2686_p2 }
  0xc2   : > { %p2689_p10 = pnand %p2688_p6, %p2684_p13 }
  0xc4   : > { %2692 = shalt.err (!%p2689_p10)
}
  0xc5   : > { %s2693_s22 = scalar_lea.vmem %s586_s9, 1024  ;;  %s2798_s28 = smov [#allocation12]  }
  0xc6   : > { %p2694_p9 = scmp.ne.s32.totalorder %s586_s9, %s2693_s22  ;;  %s2698_s2 = sshll.u32 %s2798_s28, 4  ;;  %s2699_s2 = int_to_ptr.vmem [resolvable:$false] %s2698_s2 }
  0xc7   : > { %s2700_s3 = scalar_lea.vmem %s2699_s2, 2048  ;;  %p2701_p3 = scmp.lt.s32.totalorder %s586_s9, %s2699_s2 }
  0xc8   : > { %p2696_p11 = pnand %p2694_p9, %p2942_p7  ;;  %p2702_p8 = scmp.lt.s32.totalorder %s2700_s3, %s2693_s22 }
  0xca   : > { %p2697_p12 = pneg %p2696_p11  ;;  %p2703_p0 = por %p2702_p8, %p2701_p3 }
  0xcc   : > { %p2704_p1 = pnand %p2703_p0, %p2697_p12 }
  0xce   : > { %2707 = shalt.err (!%p2704_p1)
}
  0xcf   : > { %s3469_s20 = scalar_lea.sflag [#allocation11], %s2919_s26  ;;  %s3162_s24 = scalar_lea.hbm %s3414_s12, %s3002_s17 }
  0xd0   : > { %2425 = dma.hbm_to_vmem [thread:$0]  (!%p2931_p5), %s3134_s5, 1024, %s586_s9, %s3469_s20, %s3459_s29, %s3459_s29, %s3458_s23  }
  0xd1   : > { %s599_s10 = scalar_lea.vmem [#allocation13], %s2980_s4  ;;  %s596_s14 = scalar_lea.sflag [#allocation14], %s2922_s27 }
  0xd2   : > { %s606_s15 = sshll.u32 %s599_s10, 4  ;;  %s2708_s26 = scalar_lea.hbm %s3162_s24, 1024  ;;  %s3165_s15 = int_to_ptr.vmem [resolvable:$true] %s606_s15 }
  0xd3   : > { %p2709_p13 = scmp.ne.s32.totalorder %s3162_s24, %s2708_s26  ;;  %s2713_s9 = scalar_lea.hbm %s3414_s12, 2048 }
  0xd4   : > { %p2714_p6 = scmp.lt.s32.totalorder %s3162_s24, %s3414_s12  ;;  %p2715_p10 = scmp.lt.s32.totalorder %s2713_s9, %s2708_s26 }
  0xd5   : > { %p2711_p2 = pnand %p2709_p13, %p2942_p7 }
  0xd6   : > { %p2716_p9 = por %p2715_p10, %p2714_p6 }
  0xd7   : > { %p2712_p4 = pneg %p2711_p2 }
  0xd9   : > { %p2717_p11 = pnand %p2716_p9, %p2712_p4 }
  0xdb   : > { %2720 = shalt.err (!%p2717_p11)
}
  0xdc   : > { %s2721_s4 = scalar_lea.vmem %s3165_s15, 1024  ;;  %s2799_s27 = smov [#allocation13]  }
  0xdd   : > { %p2722_p12 = scmp.ne.s32.totalorder %s3165_s15, %s2721_s4  ;;  %s2726_s22 = sshll.u32 %s2799_s27, 4  ;;  %s2727_s22 = int_to_ptr.vmem [resolvable:$false] %s2726_s22 }
  0xde   : > { %s2728_s28 = scalar_lea.vmem %s2727_s22, 2048  ;;  %p2729_p0 = scmp.lt.s32.totalorder %s3165_s15, %s2727_s22 }
  0xdf   : > { %p2724_p3 = pnand %p2722_p12, %p2942_p7  ;;  %p2730_p1 = scmp.lt.s32.totalorder %s2728_s28, %s2721_s4 }
  0xe1   : > { %p2725_p8 = pneg %p2724_p3  ;;  %p2731_p13 = por %p2730_p1, %p2729_p0 }
  0xe3   : > { %p2732_p2 = pnand %p2731_p13, %p2725_p8 }
  0xe5   : > { %2735 = shalt.err (!%p2732_p2)
}
  0xe6   : > { %2428 = dma.hbm_to_vmem [thread:$0]  (!%p2931_p5), %s3162_s24, 1024, %s3165_s15, %s596_s14, %s3459_s29, %s3459_s29, %s3458_s23  }
  0xe7   : > { %p3470_p7 = scmp.ne.s32.totalorder %s3465_s13, 0 }
  0xe8   : > { %p3471_p4 = scmp.eq.s32.totalorder (!%p3470_p7), %s3040_s1, 0 }
  0xe9   : > { %626 = sbr.rel (%p3470_p7) target bundleno = 1781 (0x6f5), region = 76 }
  0xee   : > { %2753 = dma.done.wait (%p3471_p4), [#allocation3], 256   ;;  %p3472_p6 = pmov %p3471_p4 }
  0xef   : > { %s3473_s30 = sld [smem:[#allocation25_spill]]  ;;  %s632_s2 = sand.u32 1, %s3040_s1  }
  0xf0   : > { %2755 = vsyncadd (%p3472_p6), [#allocation3], 4294967040  ;;  %s3199_s25 = sand.u32 1, %s2778_s19   ;;  %s633_s20 = scalar_lea.sflag [#allocation5], %s632_s2 }
  0xf1   : > { %s2148_s3 = sshll.u32 %s3199_s25, 3 }
  0xf2   : > { %s636_s16 = scalar_lea.vmem [#allocation4], %s2148_s3 }
  0xf5   : > { %p3474_p5 = scmp.ne.s32.totalorder %s3473_s30, 0 }
  0xf7   : > { %2757 = dma.done.wait (%p3474_p5), %s633_s20, 144  }
  0xf8   : > { %2759 = vsyncadd (%p3474_p5), %s633_s20, 4294967152  ;;  %s644_s23 = scalar_lea.vmem [#allocation6], %s3199_s25  ;;  %s650_s29 = scalar_lea.sflag [#allocation8], %s632_s2 }
  0xf9   : > { %s652_s13 = scalar_lea.vmem [#allocation7], %s3199_s25 }
  0xfa   : > { %2761 = dma.done.wait (%p3474_p5), %s650_s29, 32  }
  0xfb   : > { %2763 = vsyncadd (%p3474_p5), %s650_s29, 4294967264  ;;  %s2149_s18 = sshll.u32 %s3199_s25, 6  ;;  %s660_s24 = scalar_lea.vmem [#allocation9], %s3199_s25 }
  0xfc   : > { %s666_s10 = scalar_lea.sflag [#allocation11], %s632_s2  ;;  %s3214_s15 = scalar_lea.vmem [#allocation10], %s2149_s18 }
  0xfd   : > { %2765 = dma.done.wait (%p3474_p5), %s666_s10, 2048  }
  0xfe   : > { %2767 = vsyncadd (%p3474_p5), %s666_s10, 4294965248  ;;  %s3220_s14 = scalar_lea.vmem [#allocation12], %s2149_s18  ;;  %s684_s26 = scalar_lea.sflag [#allocation14], %s3199_s25 }
  0xff   : > { %s3223_s21 = scalar_lea.vmem [#allocation13], %s2149_s18 }
 0x100   : > { %2769 = dma.done.wait (%p3474_p5), %s684_s26, 1024  }
 0x101   : > { %2771 = vsyncadd (%p3474_p5), %s684_s26, 4294966272  ;;  %v2800_v0 = vmov 0.0   ;;  %vm2801_vm0 = vmmov 0   ;;  %v2471_v1 = vld [vmem:[%s636_s16] sm:$0xff]   ;;  %v789_v2 = vld [vmem:[#allocation2] sm:$0xff]  ;;  %vm867_vm1 = vcmask 130048  }
 0x102   : > { %2273 = vmatprep.subr.bf16.mxu0 %v2800_v0  ;;  %2275 = vmatprep.mubr.msk.bf16.mxu0 %vm2801_vm0, %v2800_v0  ;;  %v790_v3 = vld [vmem:[#allocation2 + $0x8] sm:$0xff]  ;;  %s3475_s7 = sld [smem:[#allocation28_spill]]  ;;  %v3250_v8 = vld [vmem:[%s660_s24] ss:$0 sm:$0xff]  ;;  %vm1093_vm2 = vcmask 97280   ;;  %v2477_v23 = vld [vmem:[%s3214_s15 + $0x30] sm:$0xff]  }
 0x103   : > { %2274 = vmatpush3.bf16.msra.mxu0 %v2471_v1  ;;  %v860_v4 = vpack.c.bf16 %v790_v3, %v789_v2  ;;  %s3476_s27 = sld [smem:[#allocation29_spill]]  ;;  %v2476_v19 = vld [vmem:[%s3214_s15 + $0x38] sm:$0xff]   ;;  %v2478_v24 = vld [vmem:[%s3214_s15 + $0x28] sm:$0xff]   ;;  %v2479_v25 = vld [vmem:[%s3214_s15 + $0x20] sm:$0xff]   ;;  %p774_p10 = scmp.lt.s32.totalorder %s3040_s1, 1  ;;  %vm1137_vm3 = vcmask 1045504   ;;  %v1291_v3 = vlaneseq }
 0x104   : > { %s3477_s30 = sld [smem:[#allocation27_spill]]  ;;  %v2480_v26 = vld [vmem:[%s3214_s15 + $0x18] sm:$0xff]   ;;  %v2481_v27 = vld [vmem:[%s3214_s15 + $0x10] sm:$0xff]   ;;  %v2482_v28 = vld [vmem:[%s3214_s15 + $0x8] sm:$0xff]   ;;  %vm1302_vm6 = vcmask 130112   ;;  %vm1309_vm9 = vcmask 195712  }
 0x105   : > { %s3286_s24 = scalar_select %p774_p10, %s3040_s1, 1  ;;  %v2484_v30 = vld [vmem:[%s3214_s15] sm:$0xff]   ;;  %v2169_v35 = vld [vmem:[%s652_s13] ss:$0 sm:$0xff]  ;;  %vm1316_vm10 = vcmask 261312   ;;  %vm1333_vm13 = vcmask 261120  }
 0x106   : > { %2276 = vmatmul.mubr.msk.bf16.vlgmr.msra.gmra.mxu0 %vm867_vm1, %v860_v4  ;;  %s3478_s9 = sld [smem:[#allocation34_spill]]  ;;  %v2168_v36 = vld [vmem:[%s644_s23] ss:$0 sm:$0xff]  ;;  %s2152_s16 = sshll.u32 %s3199_s25, 4 }
 0x107   : > { %s2218_s10 = sshll.u32 %s3286_s24, 3  ;;  %s3479_s15 = sld [smem:[#allocation30_spill]] }
 0x108   : > { %v3236_v5 = vld [vmem:[%s3475_s7] sm:$0xff]   ;;  %v3265_v21 = vld [vmem:[%s3475_s7 + $0x8] sm:$0xff]   ;;  %s3351_s29 = scalar_lea.vmem [#allocation15], %s2152_s16  ;;  %s3480_s5 = sld [smem:[#allocation35_spill]] }
 0x109   : > { %v3241_v6 = vld [vmem:[%s3476_s27] sm:$0xff]   ;;  %2281 = vmatprep.mubr.msk.bf16.mxu1 %vm867_vm1, %v3236_v5  ;;  %v3270_v22 = vld [vmem:[%s3476_s27 + $0x8] sm:$0xff]  }
 0x10a   : > { %2287 = vmatprep.mubr.msk.bf16.mxu0 %vm867_vm1, %v3241_v6  ;;  %v792_v7 = vld [vmem:[%s3477_s30 + $0x8] sm:$0xff]  ;;  %v791_v9 = vld [vmem:[%s3477_s30] sm:$0xff]  ;;  %v793_v32 = vld [vmem:[%s3477_s30 + $0x10] sm:$0xff] }
 0x10b   : > { %v1090_v10 = vmul.f32 %v3250_v8, %v792_v7  ;;  %v1089_v11 = vmul.f32 %v3250_v8, %v791_v9  ;;  %v3257_v12 = vpack.c.bf16 %v792_v7, %v791_v9  ;;  %v794_v33 = vld [vmem:[%s3477_s30 + $0x18] sm:$0xff]  ;;  %v1091_v53 = vmul.f32 %v3250_v8, %v793_v32 }
 0x10c   : > { %s778_s17 = scalar_lea.vmem %s3478_s9, %s2218_s10  ;;  %v3303_v34 = vpack.c.bf16 %v794_v33, %v793_v32  ;;  %v1092_v54 = vmul.f32 %v3250_v8, %v794_v33  ;;  %v1292_v9 = vand.u32 127, %v1291_v3 }
 0x10d   : > { %v1097_v13 = vsel %vm1093_vm2, %v1090_v10, 0.0  ;;  %v1094_v14 = vsel %vm1093_vm2, %v1089_v11, 0.0  ;;  %v2483_v29 = vld [vmem:[%s778_s17] sm:$0x3f]   ;;  %v1100_v57 = vsel %vm1093_vm2, %v1091_v53, 0.0  ;;  %v1294_v10 = vshrl.u32 %v1291_v3, 7 }
 0x10e   : > { %1098 = vadd.xlane.f32.xlu1 %v1097_v13  ;;  %1095 = vadd.xlane.f32.xlu0 %v1094_v14  ;;  %v1139_v31 = vsel %vm1137_vm3, %v2483_v29, 0  ;;  %v1103_v58 = vsel %vm1093_vm2, %v1092_v54, 0.0  ;;  %v1297_v14 = vadd.s32 4294967288, %v1292_v9  ;;  %s783_s9 = scalar_lea.vmem %s3480_s5, %s2218_s10 }
 0x197   : > { %v1099_v59 = vpop.xlane.xlu1 %1098  ;;  %v1096_v60 = vpop.xlane.xlu0 %1095 }
 0x1c6   : > { %v905_v15 = vpop.f32.mrf.mxu0 }
 0x1c8   : > { %v2277_v16 = vpop.f32.mrf.mxu0 }
 0x1ca   : > { %v908_v17 = vpop.f32.mrf.mxu0 }
 0x1cb   : > { %v912_v18 = vpack.c.bf16 %v908_v17, %v905_v15  ;;  %v1304_v17 = vadd.s32 4294967280, %v1292_v9 }
 0x1cc   : > { %v2278_v20 = vpop.f32.mrf.mxu0 }
 0x1cd   : > { %2279 = vmatprep.subr.bf16.mxu1 %v912_v18  ;;  %2285 = vmatprep.subr.bf16.mxu0 %v912_v18  ;;  %v1307_v32 = vsub.s32 %v1304_v17, %v1294_v10 }
 0x1ce   : > { %2280 = vmatpush3.bf16.msra.mxu1 %v912_v18  ;;  %2286 = vmatpush3.bf16.msra.mxu0 %v912_v18  ;;  %v1311_v18 = vadd.s32 4294967272, %v1292_v9 }
 0x1cf   : > { %2297 = vmatprep.subr.bf16.mxu0 %v2476_v19  ;;  %2383 = vmatprep.subr.msk.bf16.mxu1 %vm1137_vm3, %v2483_v29 }
 0x1d0   : > { %v1314_v33 = vsub.s32 %v1311_v18, %v1294_v10 }
 0x1d1   : > { %2282 = vmatmul.mubr.msk.bf16.vlgmr.msra.gmra.mxu1 %vm867_vm1, %v3265_v21  ;;  %2288 = vmatmul.mubr.msk.bf16.vlgmr.msra.gmra.mxu0 %vm867_vm1, %v3270_v22 }
 0x1d2   : > { %2298 = vmatpush3.bf16.msra.mxu0 %v2476_v19  ;;  %2293 = vmatprep.mubr.msk.bf16.mxu1 %vm1093_vm2, %v3257_v12 }
 0x1d3   : > { %2299 = vmatprep.subr.bf16.mxu0 %v2477_v23  ;;  %2292 = vmatpush3.bf16.msra.mxu1 %v1139_v31 }
 0x1d4   : > { %2317 = vmatprep.subr.bf16.mxu1 %v2800_v0 }
 0x1d6   : > { %2300 = vmatpush3.bf16.msra.mxu0 %v2477_v23 }
 0x1d7   : > { %2301 = vmatprep.subr.bf16.mxu0 %v2478_v24 }
 0x1d9   : > { %2294 = vmatmul.mubr.msk.bf16.vlgmr.msra.gmra.mxu1 %vm1093_vm2, %v3303_v34 }
 0x1da   : > { %2302 = vmatpush3.bf16.msra.mxu0 %v2478_v24  ;;  %2321 = vmatprep.mubr.msk.bf16.mxu1 %vm2801_vm0, %v2800_v0  ;;  %v1295_v24 = vsub.s32 %v1292_v9, %v1294_v10 }
 0x1db   : > { %2303 = vmatprep.subr.bf16.mxu0 %v2479_v25 }
 0x1de   : > { %2304 = vmatpush3.bf16.msra.mxu0 %v2479_v25 }
 0x1df   : > { %2305 = vmatprep.subr.bf16.mxu0 %v2480_v26 }
 0x1e2   : > { %2306 = vmatpush3.bf16.msra.mxu0 %v2480_v26  ;;  %v1300_v26 = vsub.s32 %v1297_v14, %v1294_v10 }
 0x1e3   : > { %2307 = vmatprep.subr.bf16.mxu0 %v2481_v27 }
 0x1e6   : > { %2308 = vmatpush3.bf16.msra.mxu0 %v2481_v27 }
 0x1e7   : > { %2309 = vmatprep.subr.bf16.mxu0 %v2482_v28 }
 0x1ea   : > { %2310 = vmatpush3.bf16.msra.mxu0 %v2482_v28 }
 0x1eb   : > { %2311 = vmatprep.subr.bf16.mxu0 %v2484_v30 }
 0x1ee   : > { %2312 = vmatpush3.bf16.msra.mxu0 %v2484_v30 }
 0x291   : > { %v2283_v37 = vpop.f32.mrf.mxu1  ;;  %v2289_v38 = vpop.f32.mrf.mxu0 }
 0x292   : > { %v1069_v39 = vmul.f32 %v2289_v38, %v2169_v35  ;;  %v1051_v40 = vmul.f32 %v2283_v37, %v2168_v36 }
 0x293   : > { %v963_v41 = vpop.f32.mrf.mxu1  ;;  %v1028_v42 = vpop.f32.mrf.mxu0 }
 0x294   : > { %1057 = vadd.xlane.f32.xlu0 %v1051_v40  ;;  %1075 = vadd.xlane.f32.xlu1 %v1069_v39  ;;  %v1067_v44 = vmul.f32 %v2169_v35, %v1028_v42  ;;  %v1049_v45 = vmul.f32 %v2168_v36, %v963_v41  ;;  %v786_v40 = vld [vmem:[%s3479_s15 + $0x8] sm:$0xff] }
 0x295   : > { %v2284_v43 = vpop.f32.mrf.mxu1  ;;  %v2290_v46 = vpop.f32.mrf.mxu0  ;;  %vm788_vm11 = vcmp.gt.f32.partialorder %v786_v40, 0.5 }
 0x296   : > { %v1123_v49 = vpack.c.bf16 %v2284_v43, %v2283_v37  ;;  %v1070_v50 = vmul.f32 %v2290_v46, %v2169_v35  ;;  %v1052_v51 = vmul.f32 %v2284_v43, %v2168_v36 }
 0x297   : > { %v966_v47 = vpop.f32.mrf.mxu1  ;;  %v1031_v52 = vpop.f32.mrf.mxu0 }
 0x298   : > { %v1122_v48 = vpack.c.bf16 %v966_v47, %v963_v41  ;;  %1053 = vadd.xlane.f32.xlu0 %v1049_v45  ;;  %1071 = vadd.xlane.f32.xlu1 %v1067_v44  ;;  %v1068_v55 = vmul.f32 %v2169_v35, %v1031_v52  ;;  %v1050_v56 = vmul.f32 %v2168_v36, %v966_v47  ;;  %v785_v41 = vld [vmem:[%s3479_s15] sm:$0xff] }
 0x299   : > { %vm787_vm12 = vcmp.gt.f32.partialorder %v785_v41, 0.5  ;;  %v2295_v53 = vpop.f32.mrf.mxu1 }
 0x29a   : > { %2313 = vmatprep.mubr.bf16.mxu0 %v1122_v48 }
 0x29b   : > { %2314 = vmatmul.mubr.bf16.vlgmr.msra.gmra.mxu0 %v1123_v49  ;;  %v1175_v54 = vpop.f32.mrf.mxu1 }
 0x29c   : > { %1059 = vadd.xlane.f32.xlu0 %v1052_v51  ;;  %1077 = vadd.xlane.f32.xlu1 %v1070_v50 }
 0x2a0   : > { %1055 = vadd.xlane.f32.xlu0 %v1050_v56  ;;  %1073 = vadd.xlane.f32.xlu1 %v1068_v55  ;;  %v2296_v56 = vpop.f32.mrf.mxu1 }
 0x2a4   : > { %1101 = vadd.xlane.f32.xlu0 %v1100_v57  ;;  %1104 = vadd.xlane.f32.xlu1 %v1103_v58 }
 0x31d   : > { %v1058_v61 = vpop.xlane.xlu0 %1057  ;;  %v1076_v62 = vpop.xlane.xlu1 %1075 }
 0x31e   : > { %v1081_v19 = vadd.f32 %v1076_v62, %v1058_v61 }
 0x321   : > { %v1054_v63 = vpop.xlane.xlu0 %1053  ;;  %v1072_v1 = vpop.xlane.xlu1 %1071 }
 0x322   : > { %v1079_v2 = vadd.f32 %v1072_v1, %v1054_v63 }
 0x324   : > { %v1106_v4 = vadd.f32 %v1096_v60, %v1079_v2 }
 0x325   : > { %v1060_v7 = vpop.xlane.xlu0 %1059  ;;  %v1078_v8 = vpop.xlane.xlu1 %1077 }
 0x326   : > { %v1114_v11 = vmul.f32 0.1, %v1106_v4  ;;  %vm1110_vm4 = vcmp.ge.f32.partialorder %v1106_v4, 0.0  ;;  %v1082_v20 = vadd.f32 %v1078_v8, %v1060_v7 }
 0x328   : > { %v1118_v25 = vsel %vm1110_vm4, %v1106_v4, %v1114_v11 }
 0x329   : > { %v1056_v13 = vpop.xlane.xlu0 %1055  ;;  %v1074_v15 = vpop.xlane.xlu1 %1073  ;;  %v1296_v37 = vrot.slane %v1118_v25, %v1295_v24 }
 0x32a   : > { %v1080_v16 = vadd.f32 %v1074_v15, %v1056_v13 }
 0x32c   : > { %v1107_v23 = vadd.f32 %v1099_v59, %v1080_v16  ;;  %v1178_v59 = vpop.f32.mrf.mxu1 }
 0x32d   : > { %v1102_v27 = vpop.xlane.xlu0 %1101  ;;  %v1105_v28 = vpop.xlane.xlu1 %1104 }
 0x32e   : > { %vm1111_vm5 = vcmp.ge.f32.partialorder %v1107_v23, 0.0  ;;  %v1115_v29 = vmul.f32 0.1, %v1107_v23  ;;  %v1108_v30 = vadd.f32 %v1102_v27, %v1081_v19  ;;  %v1109_v31 = vadd.f32 %v1105_v28, %v1082_v20 }
 0x330   : > { %v1119_v35 = vsel %vm1111_vm5, %v1107_v23, %v1115_v29  ;;  %vm1112_vm7 = vcmp.ge.f32.partialorder %v1108_v30, 0.0  ;;  %v1116_v36 = vmul.f32 0.1, %v1108_v30  ;;  %vm1113_vm8 = vcmp.ge.f32.partialorder %v1109_v31, 0.0  ;;  %v2485_v29 = vld [vmem:[%s3220_s14 + $0x38] sm:$0xff]  }
 0x331   : > { %v1301_v38 = vrot.slane %v1119_v35, %v1300_v26  ;;  %v1117_v39 = vmul.f32 0.1, %v1109_v31  ;;  %2357 = vmatprep.subr.bf16.mxu0 %v2485_v29  ;;  %v2494_v35 = vld [vmem:[%s3220_s14 + $0x10] sm:$0xff]  }
 0x332   : > { %v1120_v42 = vsel %vm1112_vm7, %v1108_v30, %v1116_v36  ;;  %v2486_v30 = vld [vmem:[%s3220_s14 + $0x30] sm:$0xff]   ;;  %2358 = vmatpush3.bf16.msra.mxu0 %v2485_v29 }
 0x333   : > { %v1308_v43 = vrot.slane %v1120_v42, %v1307_v32  ;;  %v1121_v44 = vsel %vm1113_vm8, %v1109_v31, %v1117_v39  ;;  %v1303_v45 = vsel %vm1302_vm6, %v1301_v38, %v1296_v37  ;;  %2359 = vmatprep.subr.bf16.mxu0 %v2486_v30  ;;  %v2488_v31 = vld [vmem:[%s3220_s14 + $0x28] sm:$0xff]   ;;  %v2490_v32 = vld [vmem:[%s3220_s14 + $0x20] sm:$0xff]   ;;  %v2487_v42 = vld [vmem:[%s3223_s21 + $0x38] sm:$0xff]  }
 0x334   : > { %v1315_v46 = vrot.slane %v1121_v44, %v1314_v33  ;;  %v2492_v33 = vld [vmem:[%s3220_s14 + $0x18] sm:$0xff]  }
 0x335   : > { %v1310_v47 = vsel %vm1309_vm9, %v1308_v43, %v1303_v45  ;;  %v2489_v45 = vld [vmem:[%s3223_s21 + $0x30] sm:$0xff]  }
 0x336   : > { %v1317_v48 = vsel %vm1316_vm10, %v1315_v46, %v1310_v47  ;;  %2360 = vmatpush3.bf16.msra.mxu0 %v2486_v30 }
 0x337   : > { %v1332_v49 = vsel %vm788_vm11, %v1317_v48, -1e+30  ;;  %v1331_v50 = vsel %vm787_vm12, %v1317_v48, -1e+30  ;;  %2361 = vmatprep.subr.bf16.mxu0 %v2488_v31 }
 0x338   : > { %v1337_v51 = vsel %vm1333_vm13, %v1332_v49, -inf  ;;  %v1334_v52 = vsel %vm1333_vm13, %v1331_v50, -inf }
 0x339   : > { %1338 = vmax.xlane.f32.xlu1 %v1337_v51  ;;  %1335 = vmax.xlane.f32.xlu0 %v1334_v52  ;;  %v2497_v51 = vld [vmem:[%s3223_s21 + $0x10] sm:$0xff]   ;;  %v2498_v52 = vld [vmem:[%s3220_s14] sm:$0xff]  }
 0x33a   : > { %2362 = vmatpush3.bf16.msra.mxu0 %v2488_v31 }
 0x33b   : > { %2363 = vmatprep.subr.bf16.mxu0 %v2490_v32 }
 0x33e   : > { %2364 = vmatpush3.bf16.msra.mxu0 %v2490_v32 }
 0x33f   : > { %2365 = vmatprep.subr.bf16.mxu0 %v2492_v33 }
 0x342   : > { %2366 = vmatpush3.bf16.msra.mxu0 %v2492_v33 }
 0x343   : > { %2367 = vmatprep.subr.bf16.mxu0 %v2494_v35 }
 0x346   : > { %2368 = vmatpush3.bf16.msra.mxu0 %v2494_v35 }
 0x35b   : > { %v2315_v55 = vpop.f32.mrf.mxu0 }
 0x35c   : > { %v1281_v60 = vadd.f32 %v2315_v55, %v2295_v53  ;;  %v2499_v53 = vld [vmem:[%s3223_s21 + $0x8] sm:$0xff]   ;;  %v2501_v55 = vld [vmem:[%s783_s9] sm:$0x3f]  }
 0x35d   : > { %v1272_v57 = vpop.f32.mrf.mxu0 }
 0x35e   : > { %v1273_v2 = vadd.f32 %v1272_v57, %v1175_v54  ;;  %v2500_v54 = vld [vmem:[%s3223_s21] sm:$0xff]  }
 0x35f   : > { %v2316_v58 = vpop.f32.mrf.mxu0 }
 0x360   : > { %v1284_v61 = vadd.f32 %v2316_v58, %v2296_v56 }
 0x361   : > { %v1275_v62 = vpop.f32.mrf.mxu0 }
 0x362   : > { %v1362_v63 = vpack.c.bf16 %v1284_v61, %v1281_v60  ;;  %v1276_v1 = vadd.f32 %v1275_v62, %v1178_v59 }
 0x364   : > { %2318 = vmatpush3.bf16.msra.mxu1 %v1362_v63  ;;  %v1361_v3 = vpack.c.bf16 %v1276_v1, %v1273_v2 }
 0x365   : > { %2319 = vmatprep.subr.bf16.mxu1 %v2800_v0 }
 0x368   : > { %2320 = vmatpush3.bf16.msra.mxu1 %v1361_v3 }
 0x3c2   : > { %v1339_v4 = vpop.xlane.xlu1 %1338  ;;  %v1336_v7 = vpop.xlane.xlu0 %1335 }
 0x3c3   : > { %v1341_v8 = vsub.f32 %v1332_v49, %v1339_v4  ;;  %v1340_v9 = vsub.f32 %v1331_v50, %v1336_v7  ;;  %v2495_v49 = vld [vmem:[%s3223_s21 + $0x18] sm:$0xff]   ;;  %v2496_v50 = vld [vmem:[%s3220_s14 + $0x8] sm:$0xff]   ;;  %v1710_v7 = vsel %vm1137_vm3, %v2501_v55, 0  ;;  %s2153_s14 = sshll.u32 %s3199_s25, 5  ;;  %s3481_s25 = sld [smem:[#allocation26_spill]] }
 0x3c4   : > { %2369 = vmatprep.subr.bf16.mxu0 %v2496_v50 }
 0x3c5   : > { %v1344_v10 = vmul.f32 1.442695, %v1341_v8  ;;  %v1342_v11 = vmul.f32 1.442695, %v1340_v9  ;;  %2370 = vmatpush3.bf16.msra.mxu0 %v2496_v50 }
 0x3c6   : > { %2371 = vmatprep.subr.bf16.mxu0 %v2498_v52 }
 0x3c7   : > { %2502 = vpow2.f32 %v1344_v10 }
 0x3c8   : > { %2504 = vpow2.f32 %v1342_v11 }
 0x3c9   : > { %2372 = vmatpush3.bf16.msra.mxu0 %v2498_v52  ;;  %p3482_p9 = scmp.ne.s32.totalorder %s3481_s25, 0 }
 0x3ca   : > { %s2210_s24 = sshll.u32 (%p3482_p9), %s3040_s1, 3  ;;  %s3483_s4 = sld [smem:[#allocation36_spill]] (%p3482_p9) }
 0x3d0   : > { %s1793_s22 = scalar_lea.vmem (%p3482_p9), %s3483_s4, %s2210_s24 }
 0x3d4   : > { %v2503_v13 = vpop.eup %2502 }
 0x3d5   : > { %v2505_v14 = vpop.eup %2504  ;;  %v1347_v15 = vsel %vm788_vm11, %v2503_v13, 0.0 }
 0x3d6   : > { %v1351_v16 = vsel %vm1333_vm13, %v1347_v15, 0.0  ;;  %v1346_v17 = vsel %vm787_vm12, %v2505_v14, 0.0 }
 0x3d7   : > { %1352 = vadd.xlane.f32.xlu1 %v1351_v16  ;;  %v1348_v0 = vsel %vm1333_vm13, %v1346_v17, 0.0 }
 0x3d8   : > { %1349 = vadd.xlane.f32.xlu0 %v1348_v0 }
 0x460   : > { %v1353_v18 = vpop.xlane.xlu1 %1352 }
 0x461   : > { %v1355_v19 = vmax.f32 %v1353_v18, 1e-20  ;;  %v1350_v20 = vpop.xlane.xlu0 %1349 }
 0x462   : > { %v1354_v23 = vmax.f32 %v1350_v20, 1e-20 }
 0x463   : > { %2506 = vrcp.f32 %v1355_v19 }
 0x464   : > { %2508 = vrcp.f32 %v1354_v23 }
 0x470   : > { %v2507_v24 = vpop.eup %2506 }
 0x471   : > { %v2509_v25 = vpop.eup %2508  ;;  %v1359_v26 = vmul.f32 %v2507_v24, %v1347_v15 }
 0x472   : > { %v1358_v27 = vmul.f32 %v2509_v25, %v1346_v17 }
 0x474   : > { %v1360_v28 = vpack.c.bf16 %v1359_v26, %v1358_v27 }
 0x476   : > { %2322 = vmatmul.mubr.msk.bf16.vlgmr.msra.gmra.mxu1 %vm1333_vm13, %v1360_v28 }
 0x477   : > { %2327 = vmatprep.mubr.msk.bf16.mxu1 %vm867_vm1, %v3236_v5 }
 0x536   : > { %v1400_v5 = vpop.f32.mrf.mxu1 }
 0x537   : > { %v1771_v36 = vmul.f32 1.442695, %v1400_v5  ;;  %vm1769_vm14 = vcmp.gt.f32.partialorder %v1400_v5, 0.0 }
 0x538   : > { %v2323_v37 = vpop.f32.mrf.mxu1 }
 0x539   : > { %2510 = vpow2.f32 %v1771_v36 }
 0x53a   : > { %v1403_v38 = vpop.f32.mrf.mxu1 }
 0x53b   : > { %v1407_v39 = vpack.c.bf16 %v1403_v38, %v1400_v5  ;;  %v1773_v40 = vmul.f32 1.442695, %v1403_v38  ;;  %vm1770_vm15 = vcmp.gt.f32.partialorder %v1403_v38, 0.0 }
 0x53c   : > { %v2324_v41 = vpop.f32.mrf.mxu1 }
 0x53d   : > { %2512 = vpow2.f32 %v1773_v40  ;;  %2325 = vmatprep.subr.bf16.mxu1 %v1407_v39 }
 0x53e   : > { %2326 = vmatpush3.bf16.msra.mxu1 %v1407_v39 }
 0x53f   : > { %2331 = vmatprep.subr.bf16.mxu1 %v1407_v39 }
 0x541   : > { %2328 = vmatmul.mubr.msk.bf16.vlgmr.msra.gmra.mxu1 %vm867_vm1, %v3265_v21  ;;  %v2491_v21 = vld [vmem:[%s3223_s21 + $0x28] sm:$0xff]  }
 0x542   : > { %2332 = vmatpush3.bf16.msra.mxu1 %v1407_v39  ;;  %2333 = vmatprep.mubr.msk.bf16.mxu1 %vm867_vm1, %v3241_v6 }
 0x543   : > { %2337 = vmatprep.subr.bf16.mxu1 %v2487_v42 }
 0x546   : > { %v2511_v43 = vpop.eup %2510 }
 0x547   : > { %v2206_v44 = vadd.f32 -1.0, %v2511_v43 }
 0x549   : > { %v1777_v46 = vsel %vm1769_vm14, %v1400_v5, %v2206_v44  ;;  %2334 = vmatmul.mubr.msk.bf16.vlgmr.msra.gmra.mxu1 %vm867_vm1, %v3270_v22  ;;  %v2493_v22 = vld [vmem:[%s3223_s21 + $0x20] sm:$0xff]   ;;  %s773_s21 = scalar_lea.vmem [#allocation16], %s2153_s14 }
 0x54a   : > { %v2513_v47 = vpop.eup %2512  ;;  %1779 = vst [vmem:[%s3351_s29] sm:$0xff] %v1777_v46  ;;  %2338 = vmatpush3.bf16.msra.mxu1 %v2487_v42 }
 0x54b   : > { %v2207_v6 = vadd.f32 -1.0, %v2513_v47  ;;  %2339 = vmatprep.subr.bf16.mxu1 %v2489_v45 }
 0x54d   : > { %v1778_v48 = vsel %vm1770_vm15, %v1403_v38, %v2207_v6 }
 0x54e   : > { %1780 = vst [vmem:[%s3351_s29 + $0x8] sm:$0xff] %v1778_v48  ;;  %2340 = vmatpush3.bf16.msra.mxu1 %v2489_v45 }
 0x54f   : > { %2341 = vmatprep.subr.bf16.mxu1 %v2491_v21 }
 0x551   : > { %v1824_v28 = vld [vmem:[%s3351_s29] sm:$0xff] (%p3482_p9) }
 0x552   : > { %2342 = vmatpush3.bf16.msra.mxu1 %v2491_v21  ;;  %1825 = vst [vmem:[%s1793_s22] sm:$0xff] (%p3482_p9), %v1824_v28 }
 0x553   : > { %2343 = vmatprep.subr.bf16.mxu1 %v2493_v22 }
 0x555   : > { %v1826_v29 = vld [vmem:[%s3351_s29 + $0x8] sm:$0xff] (%p3482_p9) }
 0x556   : > { %2344 = vmatpush3.bf16.msra.mxu1 %v2493_v22  ;;  %1827 = vst [vmem:[%s1793_s22 + $0x10] sm:$0xff] (%p3482_p9), %v1826_v29 }
 0x557   : > { %2345 = vmatprep.subr.bf16.mxu1 %v2495_v49 }
 0x55a   : > { %2346 = vmatpush3.bf16.msra.mxu1 %v2495_v49 }
 0x55b   : > { %2347 = vmatprep.subr.bf16.mxu1 %v2497_v51 }
 0x55e   : > { %2348 = vmatpush3.bf16.msra.mxu1 %v2497_v51 }
 0x55f   : > { %2349 = vmatprep.subr.bf16.mxu1 %v2499_v53 }
 0x562   : > { %2350 = vmatpush3.bf16.msra.mxu1 %v2499_v53 }
 0x563   : > { %2351 = vmatprep.subr.bf16.mxu1 %v2500_v54 }
 0x566   : > { %2352 = vmatpush3.bf16.msra.mxu1 %v2500_v54 }
 0x567   : > { %2384 = vmatprep.subr.msk.bf16.mxu1 %vm1137_vm3, %v2501_v55 }
 0x601   : > { %v2329_v56 = vpop.f32.mrf.mxu1 }
 0x603   : > { %v1442_v57 = vpop.f32.mrf.mxu1 }
 0x605   : > { %v2330_v58 = vpop.f32.mrf.mxu1 }
 0x606   : > { %v1507_v61 = vpack.c.bf16 %v2330_v58, %v2329_v56 }
 0x607   : > { %v1445_v59 = vpop.f32.mrf.mxu1 }
 0x608   : > { %v1506_v60 = vpack.c.bf16 %v1445_v59, %v1442_v57 }
 0x609   : > { %v2335_v62 = vpop.f32.mrf.mxu1 }
 0x60a   : > { %2373 = vmatprep.mubr.bf16.mxu0 %v1506_v60 }
 0x60b   : > { %v1491_v63 = vpop.f32.mrf.mxu1  ;;  %2374 = vmatmul.mubr.bf16.vlgmr.msra.gmra.mxu0 %v1507_v61 }
 0x60d   : > { %v2336_v1 = vpop.f32.mrf.mxu1 }
 0x60e   : > { %v1509_v4 = vpack.c.bf16 %v2336_v1, %v2335_v62 }
 0x60f   : > { %v1494_v2 = vpop.f32.mrf.mxu1 }
 0x610   : > { %v1508_v3 = vpack.c.bf16 %v1494_v2, %v1491_v63 }
 0x612   : > { %2353 = vmatprep.mubr.bf16.mxu1 %v1508_v3 }
 0x613   : > { %2354 = vmatmul.mubr.bf16.vlgmr.msra.gmra.mxu1 %v1509_v4 }
 0x614   : > { %2378 = vmatpush3.bf16.msra.mxu1 %v1710_v7  ;;  %2379 = vmatprep.mubr.msk.bf16.mxu1 %vm1093_vm2, %v3257_v12 }
 0x61b   : > { %2380 = vmatmul.mubr.msk.bf16.vlgmr.msra.gmra.mxu1 %vm1093_vm2, %v3303_v34 }
 0x6cb   : > { %v2375_v8 = vpop.f32.mrf.mxu0 }
 0x6cd   : > { %v1689_v11 = vpop.f32.mrf.mxu0 }
 0x6cf   : > { %v2376_v16 = vpop.f32.mrf.mxu0 }
 0x6d1   : > { %v1692_v23 = vpop.f32.mrf.mxu0 }
 0x6d3   : > { %v2355_v9 = vpop.f32.mrf.mxu1 }
 0x6d4   : > { %v1698_v15 = vadd.f32 %v2375_v8, %v2355_v9 }
 0x6d5   : > { %v1592_v10 = vpop.f32.mrf.mxu1 }
 0x6d6   : > { %v1690_v0 = vadd.f32 %v1689_v11, %v1592_v10 }
 0x6d7   : > { %v2356_v13 = vpop.f32.mrf.mxu1 }
 0x6d8   : > { %v1701_v20 = vadd.f32 %v2376_v16, %v2356_v13 }
 0x6d9   : > { %v1595_v14 = vpop.f32.mrf.mxu1 }
 0x6da   : > { %v1693_v34 = vadd.f32 %v1692_v23, %v1595_v14 }
 0x6db   : > { %v2381_v17 = vpop.f32.mrf.mxu1 }
 0x6dc   : > { %v1763_v18 = vadd.f32 %v2381_v17, %v1698_v15 }
 0x6dd   : > { %v1746_v19 = vpop.f32.mrf.mxu1 }
 0x6de   : > { %1767 = vst [vmem:[%s773_s21 + $0x10] sm:$0xff] %v1763_v18  ;;  %v1761_v12 = vadd.f32 %v1746_v19, %v1690_v0 }
 0x6df   : > { %v2382_v24 = vpop.f32.mrf.mxu1 }
 0x6e0   : > { %1765 = vst [vmem:[%s773_s21] sm:$0xff] %v1761_v12  ;;  %v1764_v25 = vadd.f32 %v2382_v24, %v1701_v20  ;;  %1791 = sbr.rel (!%p3482_p9) target bundleno = 1765 (0x6e5), region = 112 }
 0x6e1   : > { %v1749_v26 = vpop.f32.mrf.mxu1 }
 0x6e2   : > { %1768 = vst [vmem:[%s773_s21 + $0x18] sm:$0xff] %v1764_v25  ;;  %v1762_v27 = vadd.f32 %v1749_v26, %v1693_v34 }
 0x6e4   : > { %1766 = vst [vmem:[%s773_s21 + $0x8] sm:$0xff] %v1762_v27 }
 0x6e5 PF: > { %s3484_s28 = sld [smem:[#allocation26_spill]] }
 0x6eb   : > { %p3485_p11 = scmp.ne.s32.totalorder %s3484_s28, 0 }
 0x6ec   : > { %s2211_s2 = sshll.u32 (%p3485_p11), %s3040_s1, 3  ;;  %v1870_v30 = vld [vmem:[%s773_s21] sm:$0xff] (%p3485_p11)  ;;  %v1872_v31 = vld [vmem:[%s773_s21 + $0x8] sm:$0xff] (%p3485_p11)  ;;  %v1874_v32 = vld [vmem:[%s773_s21 + $0x10] sm:$0xff] (%p3485_p11)  ;;  %s3486_s3 = sld [smem:[#allocation37_spill]] (%p3485_p11) }
 0x6ed   : > { %1833 = sbr.rel (!%p3485_p11) target bundleno = 1781 (0x6f5), region = 150  ;;  %v1876_v33 = vld [vmem:[%s773_s21 + $0x18] sm:$0xff] (%p3485_p11) }
 0x6f2   : > { %s1835_s20 = scalar_lea.vmem %s3486_s3, %s2211_s2 }
 0x6f3   : > { %1871 = vst [vmem:[%s1835_s20] sm:$0xff] %v1870_v30  ;;  %1873 = vst [vmem:[%s1835_s20 + $0x10] sm:$0xff] %v1872_v31 }
 0x6f4   : > { %1875 = vst [vmem:[%s1835_s20 + $0x20] sm:$0xff] %v1874_v32  ;;  %1877 = vst [vmem:[%s1835_s20 + $0x30] sm:$0xff] %v1876_v33 }
 0x6f5 PF: > { %s3487_s21 = sld [smem:[#allocation23_spill]]  ;;  %s3490_s18 = smov %s2778_s19 }
 0x6f6   : > { %s3488_s16 = sld [smem:[#allocation22_spill]] }
 0x6f7   : > { %s3489_s20 = sld [smem:[#allocation24_spill]] }
 0x6fb   : > { %p36_p12 = scmp.ge.s32.totalorder %s3487_s21, 4  }
 0x6fc   : > { %s3491_s19 = smov %s3488_s16 }
 0x6fd   :  { %38 = sbr.rel (!%p36_p12) target bundleno = 22 (0x16), region = 287 }
 0x702   :  { %1900 = vsyncpa [#allocation3], 1 }
 0x703   :  { %1902 = vsyncpa [#allocation3 + $0x1], 1 }
 0x704   :  { %1903 = vsyncpa [#allocation5], 1 }
 0x705   :  { %1905 = vsyncpa [#allocation5 + $0x1], 1 }
 0x706   :  { %1906 = vsyncpa [#allocation8], 1 }
 0x707   :  { %1908 = vsyncpa [#allocation8 + $0x1], 1 }
 0x708   :  { %1909 = vsyncpa [#allocation11], 1 }
 0x709   :  { %1911 = vsyncpa [#allocation11 + $0x1], 1 }
 0x70a   :  { %1912 = vsyncpa [#allocation14], 1 }
 0x70b   :  { %1914 = vsyncpa [#allocation14 + $0x1], 1 }

// kernel: gatnet_forward.3
= control target key start
LH: loop header
LB: loop body
LE: loop exit
PB: predicated region body
PF: predicated region fallthrough
CT: control target
= control target key end

     0   :  { %s5139_s0 = inlined_call_operand.vmem [shape: f32[16,256], index: 0, kind: input, shape index: {}]   ;;  %s5140_s1 = inlined_call_operand.vmem [shape: f32[32,256], index: 1, kind: input, shape index: {}]   ;;  %s5141_s2 = inlined_call_operand.vmem [shape: bf16[32,16], index: 2, kind: input, shape index: {}]   ;;  %s5142_s3 = inlined_call_operand.vmem [shape: bf16[32,16], index: 3, kind: input, shape index: {}]   ;;  %s5143_s4 = inlined_call_operand.vmem [shape: f32[16,32], index: 4, kind: input, shape index: {}]   ;;  %s5144_s5 = inlined_call_operand.vmem [shape: bf16[2,256,128], index: 5, kind: input, shape index: {}]   ;;  %s5145_s6 = inlined_call_operand.hbm [shape: f32[2,1,128], index: 6, kind: input, shape index: {}]   ;;  %s5146_s7 = inlined_call_operand.hbm [shape: f32[2,1,128], index: 7, kind: input, shape index: {}]   ;;  %s5147_s8 = inlined_call_operand.hbm [shape: f32[2,1,256], index: 8, kind: input, shape index: {}]   ;;  %s5148_s9 = inlined_call_operand.vmem [shape: bf16[2,128,128], index: 9, kind: input, shape index: {}]   ;;  %s5149_s10 = inlined_call_operand.vmem [shape: bf16[2,256,128], index: 10, kind: input, shape index: {}]   ;;  %s5150_s11 = inlined_call_operand.hbm [shape: bf16[2,128,128], index: 11, kind: input, shape index: {}]   ;;  %s5151_s12 = inlined_call_operand.hbm [shape: bf16[2,128,128], index: 12, kind: input, shape index: {}]   ;;  %s5152_s13 = inlined_call_operand.vmem [shape: bf16[2,256,128], index: 13, kind: input, shape index: {}]   ;;  %s5153_s14 = inlined_call_operand.vmem [shape: bf16[128,32], index: 14, kind: input, shape index: {}]   ;;  %s5154_s15 = inlined_call_operand.hbm [shape: f32[1,32], index: 15, kind: input, shape index: {}]   ;;  %s5155_s16 = inlined_call_operand.hbm [shape: bf16[32,128], index: 16, kind: input, shape index: {}]   ;;  %s5156_s17 = inlined_call_operand.hbm [shape: f32[1,128], index: 17, kind: input, shape index: {}]   ;;  %s5157_s18 = inlined_call_operand.vmem [shape: bf16[128,32], index: 18, kind: input, shape index: {}]   ;;  %s5158_s19 = inlined_call_operand.vmem [shape: bf16[128,32], index: 19, kind: input, shape index: {}]   ;;  %s5159_s20 = inlined_call_operand.hbm [shape: f32[1,32], index: 20, kind: input, shape index: {}]   ;;  %s5160_s21 = inlined_call_operand.hbm [shape: bf16[32,128], index: 21, kind: input, shape index: {}]   ;;  %s5161_s22 = inlined_call_operand.hbm [shape: f32[1,128], index: 22, kind: input, shape index: {}]   ;;  %s5162_s23 = inlined_call_operand.hbm [shape: f32[1,128], index: 23, kind: output, shape index: {0}]   ;;  %s5163_s24 = inlined_call_operand.vmem [shape: f32[32,128], index: 24, kind: output, shape index: {1}]  }
   0x1   :  { %5197 = sst [smem:[#allocation33_spill]] %s5139_s0 }
   0x2   :  { %5198 = sst [smem:[#allocation34_spill]] %s5140_s1 }
   0x3   :  { %5199 = sst [smem:[#allocation35_spill]] %s5141_s2 }
   0x4   :  { %5200 = sst [smem:[#allocation36_spill]] %s5142_s3 }
   0x5   :  { %5201 = sst [smem:[#allocation37_spill]] %s5143_s4 }
   0x6   :  { %5202 = sst [smem:[#allocation38_spill]] %s5144_s5 }
   0x7   :  { %5203 = sst [smem:[#allocation39_spill]] %s5145_s6 }
   0x8   :  { %5204 = sst [smem:[#allocation40_spill]] %s5146_s7 }
   0x9   :  { %5205 = sst [smem:[#allocation41_spill]] %s5147_s8 }
   0xa   :  { %5206 = sst [smem:[#allocation42_spill]] %s5148_s9 }
   0xb   :  { %5207 = sst [smem:[#allocation43_spill]] %s5149_s10 }
   0xc   :  { %5208 = sst [smem:[#allocation44_spill]] %s5150_s11 }
   0xd   :  { %5209 = sst [smem:[#allocation45_spill]] %s5152_s13 }
   0xe   :  { %5210 = sst [smem:[#allocation46_spill]] %s5153_s14 }
   0xf   :  { %5211 = sst [smem:[#allocation47_spill]] %s5154_s15 }
  0x10   :  { %5212 = sst [smem:[#allocation48_spill]] %s5155_s16 }
  0x11   :  { %5213 = sst [smem:[#allocation49_spill]] %s5156_s17 }
  0x12   :  { %5214 = sst [smem:[#allocation50_spill]] %s5157_s18 }
  0x13   :  { %5215 = sst [smem:[#allocation51_spill]] %s5158_s19 }
  0x14   :  { %5216 = sst [smem:[#allocation52_spill]] %s5159_s20 }
  0x15   :  { %5217 = sst [smem:[#allocation53_spill]] %s5160_s21 }
  0x16   :  { %5218 = sst [smem:[#allocation54_spill]] %s5161_s22 }
  0x17   :  { %5219 = sst [smem:[#allocation55_spill]] %s5162_s23 }
  0x18   :  { %5220 = sst [smem:[#allocation56_spill]] %s5163_s24 }
  0x19   :  { %30 = vsyncpa [#allocation5], 0 }
  0x1a   :  { %32 = vsyncpa [#allocation5 + $0x1], 0 }
  0x1b   :  { %33 = vsyncpa [#allocation8], 0 }
  0x1c   :  { %35 = vsyncpa [#allocation8 + $0x1], 0 }
  0x1d   :  { %36 = vsyncpa [#allocation11], 0 }
  0x1e   :  { %38 = vsyncpa [#allocation11 + $0x1], 0 }
  0x1f   :  { %39 = vsyncpa [#allocation14], 0 }
  0x20   :  { %40 = vsyncpa [#allocation17], 0 }
  0x21   :  { %41 = vsyncpa [#allocation20], 0 }
  0x22   :  { %42 = vsyncpa [#allocation6], 0  ;;  %s4444_s5 = smov 0   ;;  %s4446_s26 = smov 0  }
  0x23   :  { %s4448_s27 = smov 0   ;;  %s4450_s28 = smov 0  }
  0x24 LB: > { %5221 = sst [smem:[#allocation30_spill]] %s4294_s27  ;;  %s4300_s6 = smov [#allocation13]   ;;  %s4298_s28 = sphi %s4450_s28, %s5272_s28   ;;  %s4294_s27 = sphi %s4448_s27, %s5274_s27   ;;  %s4290_s26 = sphi %s4446_s26, %s5276_s26   ;;  %s4286_s5 = sphi %s4444_s5, %s5275_s5  }
  0x25   : > { %s654_s2 = sshll.u32 %s4300_s6, 4  ;;  %s4465_s29 = sadd.s32 4294967295, %s4298_s28   ;;  %s655_s2 = int_to_ptr.vmem [resolvable:$true] %s654_s2 }
  0x26   : > { %p3178_p0 = scmp.ge.s32.totalorder %s4298_s28, 1  ;;  %p5173_p1 = scmp.eq.s32.totalorder %s4465_s29, 0 }
  0x27   : > { %p623_p2 = scmp.lt.s32.totalorder %s4298_s28, 3  ;;  %s4301_s7 = smov [#allocation16]  }
  0x28   : > { %s678_s30 = sshll.u32 %s4301_s7, 4  ;;  %s4302_s25 = smov [#allocation19]   ;;  %s679_s30 = int_to_ptr.vmem [resolvable:$true] %s678_s30 }
  0x29   : > { %p4471_p4 = pnand %p3178_p0, %p623_p2  ;;  %s705_s8 = sshll.u32 %s4302_s25, 4  ;;  %s4483_s8 = int_to_ptr.vmem [resolvable:$true] %s705_s8 }
  0x2a   : > { %s3931_s1 = scalar_lea.vmem %s655_s2, 16  ;;  %s3938_s6 = scalar_lea.vmem %s655_s2, 32 }
  0x2b   : > { %s5222_s0 = scalar_select %p4471_p4, 1, 0 }
  0x2c   : > { %p3712_p5 = pneg %p4471_p4  ;;  %p3932_p8 = scmp.ne.s32.totalorder %s655_s2, %s3931_s1 }
  0x2d   : > { %p3939_p11 = scmp.lt.s32.totalorder %s655_s2, %s655_s2  ;;  %p3940_p12 = scmp.lt.s32.totalorder %s3938_s6, %s3931_s1 }
  0x2e   : > { %p4479_p6 = pnand %p3712_p5, %p5173_p1 }
  0x2f   : > { %p3941_p13 = por %p3940_p12, %p3939_p11 }
  0x30   : > { %s5223_s3 = scalar_select %p4479_p6, 1, 0 }
  0x31   : > { %p4487_p7 = pneg %p4479_p6 }
  0x33   : > { %s5224_s4 = scalar_select %p4487_p7, 1, 0 }
  0x34   : > { %p3934_p9 = pnand %p3932_p8, %p4487_p7 }
  0x36   : > { %p3935_p10 = pneg %p3934_p9 }
  0x38   : > { %p3942_p0 = pnand %p3941_p13, %p3935_p10 }
  0x3a   : > { %3945 = shalt.err (!%p3942_p0)
}
  0x3b   : > { %s5225_s15 = sld [smem:[#allocation47_spill]]  ;;  %s3957_s23 = scalar_lea.vmem %s679_s30, 16 }
  0x3c   : > { %p3958_p2 = scmp.ne.s32.totalorder %s679_s30, %s3957_s23  ;;  %s3964_s24 = scalar_lea.vmem %s679_s30, 32 }
  0x3d   : > { %p3965_p8 = scmp.lt.s32.totalorder %s679_s30, %s679_s30  ;;  %p3966_p9 = scmp.lt.s32.totalorder %s3964_s24, %s3957_s23 }
  0x3e   : > { %p3960_p5 = pnand %p3958_p2, %p4487_p7 }
  0x3f   : > { %p3967_p1 = por %p3966_p9, %p3965_p8 }
  0x40   : > { %p3961_p3 = pneg %p3960_p5 }
  0x41   : > { %3715 = dma.hbm_to_vmem [thread:$0]  (!%p4479_p6), %s5225_s15, 16, %s655_s2, [#allocation14]  }
  0x42   : > { %p3968_p4 = pnand %p3967_p1, %p3961_p3 }
  0x44   : > { %3971 = shalt.err (!%p3968_p4)
}
  0x45   : > { %s5226_s17 = sld [smem:[#allocation49_spill]]  ;;  %s3983_s2 = scalar_lea.vmem %s4483_s8, 256 }
  0x46   : > { %p3984_p10 = scmp.ne.s32.totalorder %s4483_s8, %s3983_s2  ;;  %p3991_p13 = scmp.lt.s32.totalorder %s4483_s8, %s4483_s8 }
  0x47   : > { %p3992_p0 = scmp.lt.s32.totalorder %s3983_s2, %s3983_s2 }
  0x48   : > { %p3986_p11 = pnand %p3984_p10, %p4487_p7 }
  0x49   : > { %p3993_p1 = por %p3992_p0, %p3991_p13 }
  0x4a   : > { %p3987_p12 = pneg %p3986_p11 }
  0x4b   : > { %3721 = dma.hbm_to_vmem [thread:$0]  (!%p4479_p6), %s5226_s17, 16, %s679_s30, [#allocation17]  }
  0x4c   : > { %p3994_p3 = pnand %p3993_p1, %p3987_p12 }
  0x4e   : > { %3997 = shalt.err (!%p3994_p3)
}
  0x4f   : > { %s5175_s23 = smov 64   ;;  %s5177_s24 = smov 4  }
  0x50   : > { %s5227_s21 = sld [smem:[#allocation53_spill]]  ;;  %s4521_s25 = sadd.s32 1, %s4298_s28  }
  0x51   : > { %5228 = sst [smem:[#allocation31_spill]] %s4521_s25  ;;  %s183_s1 = ssub.s32 %s4298_s28, %s4521_s25 }
  0x52   : > { %s186_s6 = sadd.s32 1, %s4294_s27  ;;  %p184_p4 = scmp.eq.s32.totalorder %s183_s1, 0 }
  0x53   : > { %p193_p2 = scmp.ne.s32.totalorder %s4294_s27, %s4290_s26  ;;  %p194_p5 = scmp.eq.s32.totalorder %s4298_s28, 0 }
  0x54   : > { %p199_p8 = scmp.ne.s32.totalorder %s4290_s26, %s4286_s5  ;;  %p5230_p10 = scmp.eq.s32.totalorder %s4465_s29, 0 }
  0x55   : > { %s4532_s2 = scalar_select %p184_p4, %s4294_s27, %s186_s6  }
  0x56   : > { %3727 = dma.hbm_to_vmem [thread:$0]  (!%p4479_p6), %s5227_s21, 256, %s4483_s8, [#allocation20], %s5175_s23, %s5175_s23, %s5177_s24  }
  0x57   : > { %5229 = sst [smem:[#allocation32_spill]] %s4532_s2  ;;  %p195_p9 = por %p194_p5, %p193_p2 }
  0x58   : > { %p4536_p11 = por %p5230_p10, %p199_p8  ;;  %p3753_p12 = scmp.lt.s32.totalorder %s4298_s28, 2 }
  0x59   : > { %s4542_s8 = sand.u32 1, %s4294_s27   ;;  %s5182_s30 = sshll.u32 %s4298_s28, 4 }
  0x5a   : > { %s5231_s15 = scalar_select %p4536_p11, 1, 0 }
  0x5b   : > { %s5184_s7 = sand.u32 1, %s4298_s28   ;;  %p4546_p13 = pnand %p3753_p12, %p195_p9 }
  0x5c   : > { %s5233_s23 = sld [smem:[#allocation40_spill]]  ;;  %s758_s17 = scalar_lea.vmem [#allocation7], %s4542_s8 }
  0x5d   : > { %s5232_s1 = scalar_select %p4546_p13, 1, 0 }
  0x5e   : > { %s765_s21 = sshll.u32 %s758_s17, 4  ;;  %s4560_s2 = scalar_lea.sflag [#allocation8], %s5184_s7  ;;  %s766_s21 = int_to_ptr.vmem [resolvable:$true] %s765_s21 }
  0x5f   : > { %p4566_p1 = pneg %p4546_p13 }
  0x62   : > { %s4555_s24 = scalar_lea.hbm %s5233_s23, %s5182_s30  ;;  %s4003_s30 = scalar_lea.hbm %s5233_s23, 32 }
  0x63   : > { %s3998_s27 = scalar_lea.hbm %s4555_s24, 16  ;;  %p4004_p2 = scmp.lt.s32.totalorder %s4555_s24, %s5233_s23 }
  0x64   : > { %p3999_p0 = scmp.ne.s32.totalorder %s4555_s24, %s3998_s27  ;;  %p4005_p5 = scmp.lt.s32.totalorder %s4003_s30, %s3998_s27 }
  0x66   : > { %p4001_p3 = pnand %p4566_p1, %p3999_p0  ;;  %p4006_p8 = por %p4005_p5, %p4004_p2 }
  0x68   : > { %p4002_p4 = pneg %p4001_p3 }
  0x6a   : > { %p4007_p9 = pnand %p4006_p8, %p4002_p4 }
  0x6c   : > { %4010 = shalt.err (!%p4007_p9)
}
  0x6d   : > { %s4011_s7 = scalar_lea.vmem %s766_s21, 16  ;;  %s4305_s19 = smov [#allocation7]  }
  0x6e   : > { %p4012_p10 = scmp.ne.s32.totalorder %s766_s21, %s4011_s7  ;;  %s4016_s14 = sshll.u32 %s4305_s19, 4  ;;  %s4017_s14 = int_to_ptr.vmem [resolvable:$false] %s4016_s14 }
  0x6f   : > { %s4018_s13 = scalar_lea.vmem %s4017_s14, 32  ;;  %p4019_p0 = scmp.lt.s32.totalorder %s766_s21, %s4017_s14 }
  0x70   : > { %p4014_p12 = pnand %p4012_p10, %p4566_p1  ;;  %p4020_p3 = scmp.lt.s32.totalorder %s4018_s13, %s4011_s7 }
  0x72   : > { %p4015_p11 = pneg %p4014_p12  ;;  %p4021_p6 = por %p4020_p3, %p4019_p0 }
  0x74   : > { %p4022_p7 = pnand %p4021_p6, %p4015_p11 }
  0x76   : > { %4025 = shalt.err (!%p4022_p7)
}
  0x77   : > { %3737 = dma.hbm_to_vmem [thread:$0]  (!%p4546_p13), %s4555_s24, 16, %s766_s21, %s4560_s2  }
  0x78   : > { %s5193_s18 = sshll.u32 %s4542_s8, 6  ;;  %s3342_s27 = sshll.u32 %s4298_s28, 10 }
  0x79   : > { %s5235_s11 = sld [smem:[#allocation44_spill]]  ;;  %s811_s13 = scalar_lea.vmem [#allocation10], %s5193_s18 }
  0x7a   : > { %s818_s7 = sshll.u32 %s811_s13, 4  ;;  %s4599_s17 = scalar_lea.hbm %s5151_s12, %s3342_s27  ;;  %s4594_s7 = int_to_ptr.vmem [resolvable:$true] %s818_s7 }
  0x7b   : > { %s5236_s21 = sand.u32 1, %s4298_s28  }
  0x7c   : > { %s4603_s24 = scalar_lea.sflag [#allocation11], %s5236_s21 }
  0x7f   : > { %s4590_s14 = scalar_lea.hbm %s5235_s11, %s3342_s27  ;;  %s4031_s18 = scalar_lea.hbm %s5235_s11, 2048 }
  0x80   : > { %s4026_s23 = scalar_lea.hbm %s4590_s14, 1024  ;;  %p4032_p4 = scmp.lt.s32.totalorder %s4590_s14, %s5235_s11 }
  0x81   : > { %p4027_p6 = scmp.ne.s32.totalorder %s4590_s14, %s4026_s23  ;;  %p4033_p2 = scmp.lt.s32.totalorder %s4031_s18, %s4026_s23 }
  0x83   : > { %p4029_p7 = pnand %p4027_p6, %p4566_p1  ;;  %p4034_p5 = por %p4033_p2, %p4032_p4 }
  0x85   : > { %p4030_p11 = pneg %p4029_p7 }
  0x87   : > { %p4035_p8 = pnand %p4034_p5, %p4030_p11 }
  0x89   : > { %4038 = shalt.err (!%p4035_p8)
}
  0x8a   : > { %s4039_s27 = scalar_lea.vmem %s4594_s7, 1024  ;;  %s4306_s5 = smov [#allocation10]  }
  0x8b   : > { %p4040_p9 = scmp.ne.s32.totalorder %s4594_s7, %s4039_s27  ;;  %s4044_s6 = sshll.u32 %s4306_s5, 4  ;;  %s4045_s6 = int_to_ptr.vmem [resolvable:$false] %s4044_s6 }
  0x8c   : > { %s4046_s21 = scalar_lea.vmem %s4045_s6, 2048  ;;  %p4047_p0 = scmp.lt.s32.totalorder %s4594_s7, %s4045_s6 }
  0x8d   : > { %p4042_p10 = pnand %p4040_p9, %p4566_p1  ;;  %p4048_p3 = scmp.lt.s32.totalorder %s4046_s21, %s4039_s27 }
  0x8f   : > { %p4043_p12 = pneg %p4042_p10  ;;  %p4049_p6 = por %p4048_p3, %p4047_p0 }
  0x91   : > { %p4050_p7 = pnand %p4049_p6, %p4043_p12 }
  0x93   : > { %4053 = shalt.err (!%p4050_p7)
}
  0x94   : > { %s5237_s10 = smov 4   ;;  %s5238_s23 = smov 64  }
  0x95   : > { %3743 = dma.hbm_to_vmem [thread:$0]  (!%p4546_p13), %s4590_s14, 1024, %s4594_s7, %s4603_s24, %s5238_s23, %s5238_s23, %s5237_s10  }
  0x96   : > { %s5239_s18 = sshll.u32 %s4542_s8, 6  ;;  %s4307_s13 = smov [#allocation15]  }
  0x97   : > { %s832_s19 = scalar_lea.vmem [#allocation12], %s5239_s18  ;;  %s664_s27 = sshll.u32 %s4307_s13, 4  ;;  %s665_s27 = int_to_ptr.vmem [resolvable:$true] %s664_s27 }
  0x98   : > { %s839_s30 = sshll.u32 %s832_s19, 4  ;;  %s4065_s5 = scalar_lea.vmem %s665_s27, 256  ;;  %s4631_s30 = int_to_ptr.vmem [resolvable:$true] %s839_s30 }
  0x99   : > { %p4066_p11 = scmp.ne.s32.totalorder %s665_s27, %s4065_s5  ;;  %p5240_p4 = scmp.ne.s32.totalorder %s5224_s4, 0 }
  0x9a   : > { %p4073_p8 = scmp.lt.s32.totalorder %s665_s27, %s665_s27  ;;  %p4074_p9 = scmp.lt.s32.totalorder %s4065_s5, %s4065_s5 }
  0x9b   : > { %p4068_p2 = pnand %p4066_p11, %p5240_p4 }
  0x9c   : > { %p4075_p10 = por %p4074_p9, %p4073_p8 }
  0x9d   : > { %p4069_p5 = pneg %p4068_p2 }
  0x9f   : > { %p4076_p12 = pnand %p4075_p10, %p4069_p5 }
  0xa1   : > { %4079 = shalt.err (!%p4076_p12)
}
  0xa2   : > { %p5241_p0 = scmp.ne.s32.totalorder %s5223_s3, 0  ;;  %s5242_s16 = sld [smem:[#allocation48_spill]] }
  0xa3   : > { %s4308_s6 = smov [#allocation18]   ;;  %s4309_s18 = smov [#allocation21]  }
  0xa4   : > { %s695_s21 = sshll.u32 %s4308_s6, 4  ;;  %s719_s19 = sshll.u32 %s4309_s18, 4  ;;  %s696_s21 = int_to_ptr.vmem [resolvable:$true] %s695_s21  ;;  %s720_s19 = int_to_ptr.vmem [resolvable:$true] %s719_s19 }
  0xa5   : > { %s4091_s13 = scalar_lea.vmem %s696_s21, 16  ;;  %s4098_s5 = scalar_lea.vmem %s696_s21, 32 }
  0xa6   : > { %p4092_p3 = scmp.ne.s32.totalorder %s696_s21, %s4091_s13  ;;  %p4099_p11 = scmp.lt.s32.totalorder %s696_s21, %s696_s21 }
  0xa7   : > { %p4100_p2 = scmp.lt.s32.totalorder %s4098_s5, %s4091_s13 }
  0xa8   : > { %3718 = dma.hbm_to_vmem [thread:$0]  (!%p5241_p0), %s5242_s16, 256, %s665_s27, [#allocation14], %s5238_s23, %s5238_s23, %s5237_s10  }
  0xa9   : > { %p4094_p6 = pnand %p4092_p3, %p5240_p4  ;;  %p4101_p5 = por %p4100_p2, %p4099_p11 }
  0xab   : > { %p4095_p7 = pneg %p4094_p6 }
  0xad   : > { %p4102_p8 = pnand %p4101_p5, %p4095_p7 }
  0xaf   : > { %4105 = shalt.err (!%p4102_p8)
}
  0xb0   : > { %s5243_s20 = sld [smem:[#allocation52_spill]]  ;;  %s4117_s7 = scalar_lea.vmem %s720_s19, 16 }
  0xb1   : > { %p4118_p9 = scmp.ne.s32.totalorder %s720_s19, %s4117_s7  ;;  %s4124_s6 = scalar_lea.vmem %s720_s19, 32 }
  0xb2   : > { %p4125_p3 = scmp.lt.s32.totalorder %s720_s19, %s720_s19  ;;  %p4126_p6 = scmp.lt.s32.totalorder %s4124_s6, %s4117_s7 }
  0xb3   : > { %p4120_p10 = pnand %p4118_p9, %p5240_p4 }
  0xb4   : > { %p4127_p13 = por %p4126_p6, %p4125_p3 }
  0xb5   : > { %p4121_p12 = pneg %p4120_p10 }
  0xb6   : > { %3724 = dma.hbm_to_vmem [thread:$0]  (!%p5241_p0), %s5243_s20, 16, %s696_s21, [#allocation17]  }
  0xb7   : > { %p4128_p11 = pnand %p4127_p13, %p4121_p12 }
  0xb9   : > { %4131 = shalt.err (!%p4128_p11)
}
  0xba   : > { %s5244_s22 = sld [smem:[#allocation54_spill]]  ;;  %s5245_s4 = sshll.u32 %s4298_s28, 4 }
  0xbb   : > { %s5246_s14 = sld [smem:[#allocation39_spill]]  ;;  %s741_s7 = scalar_lea.vmem [#allocation4], %s4542_s8 }
  0xbc   : > { %s748_s3 = sshll.u32 %s741_s7, 4  ;;  %s3188_s6 = sshll.u32 %s4542_s8, 1  ;;  %s749_s3 = int_to_ptr.vmem [resolvable:$true] %s748_s3 }
  0xbd   : > { %s739_s18 = scalar_lea.sflag [#allocation5], %s4542_s8 }
  0xc0   : > { %3730 = dma.hbm_to_vmem [thread:$0]  (!%p5241_p0), %s5244_s22, 16, %s720_s19, [#allocation20]  }
  0xc1   : > { %s4662_s27 = scalar_lea.hbm %s5246_s14, %s5245_s4  ;;  %s4137_s16 = scalar_lea.hbm %s5246_s14, 32 }
  0xc2   : > { %s4132_s13 = scalar_lea.hbm %s4662_s27, 16  ;;  %p4138_p0 = scmp.lt.s32.totalorder %s4662_s27, %s5246_s14 }
  0xc3   : > { %p4133_p13 = scmp.ne.s32.totalorder %s4662_s27, %s4132_s13  ;;  %p4139_p2 = scmp.lt.s32.totalorder %s4137_s16, %s4132_s13 }
  0xc5   : > { %p4135_p4 = pnand %p4133_p13, %p4566_p1  ;;  %p4140_p5 = por %p4139_p2, %p4138_p0 }
  0xc7   : > { %p4136_p7 = pneg %p4135_p4 }
  0xc9   : > { %p4141_p8 = pnand %p4140_p5, %p4136_p7 }
  0xcb   : > { %4144 = shalt.err (!%p4141_p8)
}
  0xcc   : > { %s4145_s5 = scalar_lea.vmem %s749_s3, 16  ;;  %s4310_s8 = smov [#allocation4]  }
  0xcd   : > { %p4146_p9 = scmp.ne.s32.totalorder %s749_s3, %s4145_s5  ;;  %s4150_s7 = sshll.u32 %s4310_s8, 4  ;;  %s4151_s7 = int_to_ptr.vmem [resolvable:$false] %s4150_s7 }
  0xce   : > { %s4152_s20 = scalar_lea.vmem %s4151_s7, 32  ;;  %p4153_p3 = scmp.lt.s32.totalorder %s749_s3, %s4151_s7 }
  0xcf   : > { %p4148_p10 = pnand %p4146_p9, %p4566_p1  ;;  %p4154_p6 = scmp.lt.s32.totalorder %s4152_s20, %s4145_s5 }
  0xd1   : > { %p4149_p12 = pneg %p4148_p10  ;;  %p4155_p11 = por %p4154_p6, %p4153_p3 }
  0xd3   : > { %p4156_p13 = pnand %p4155_p11, %p4149_p12 }
  0xd5   : > { %4159 = shalt.err (!%p4156_p13)
}
  0xd6   : > { %p5247_p4 = scmp.ne.s32.totalorder %s5232_s1, 0  ;;  %s3341_s11 = sshll.u32 %s4298_s28, 5 }
  0xd7   : > { %s776_s16 = scalar_lea.vmem [#allocation9], %s3188_s6  ;;  %s5248_s4 = sld [smem:[#allocation41_spill]] }
  0xd8   : > { %3734 = dma.hbm_to_vmem [thread:$0]  (!%p5247_p4), %s4662_s27, 16, %s749_s3, %s739_s18  }
  0xd9   : > { %s784_s13 = sshll.u32 %s776_s16, 4  ;;  %s785_s13 = int_to_ptr.vmem [resolvable:$true] %s784_s13 }
  0xdd   : > { %s782_s8 = scalar_lea.hbm %s5248_s4, %s3341_s11  ;;  %s4165_s7 = scalar_lea.hbm %s5248_s4, 64 }
  0xde   : > { %s4160_s14 = scalar_lea.hbm %s782_s8, 32  ;;  %p4166_p5 = scmp.lt.s32.totalorder %s782_s8, %s5248_s4 }
  0xdf   : > { %p4161_p7 = scmp.ne.s32.totalorder %s782_s8, %s4160_s14  ;;  %p4167_p8 = scmp.lt.s32.totalorder %s4165_s7, %s4160_s14 }
  0xe1   : > { %p4163_p0 = pnand %p4161_p7, %p4566_p1  ;;  %p4168_p9 = por %p4167_p8, %p4166_p5 }
  0xe3   : > { %p4164_p2 = pneg %p4163_p0 }
  0xe5   : > { %p4169_p10 = pnand %p4168_p9, %p4164_p2 }
  0xe7   : > { %4172 = shalt.err (!%p4169_p10)
}
  0xe8   : > { %s4173_s28 = scalar_lea.vmem %s785_s13, 32  ;;  %s4311_s27 = smov [#allocation9]  }
  0xe9   : > { %p4174_p12 = scmp.ne.s32.totalorder %s785_s13, %s4173_s28  ;;  %s4178_s3 = sshll.u32 %s4311_s27, 4  ;;  %s4179_s3 = int_to_ptr.vmem [resolvable:$false] %s4178_s3 }
  0xea   : > { %s4180_s6 = scalar_lea.vmem %s4179_s3, 64  ;;  %p4181_p11 = scmp.lt.s32.totalorder %s785_s13, %s4179_s3 }
  0xeb   : > { %p4176_p3 = pnand %p4174_p12, %p4566_p1  ;;  %p4182_p13 = scmp.lt.s32.totalorder %s4180_s6, %s4173_s28 }
  0xed   : > { %p4177_p6 = pneg %p4176_p3  ;;  %p4183_p7 = por %p4182_p13, %p4181_p11 }
  0xef   : > { %p4184_p0 = pnand %p4183_p7, %p4177_p6 }
  0xf1   : > { %4187 = shalt.err (!%p4184_p0)
}
  0xf2   : > { %3740 = dma.hbm_to_vmem [thread:$0]  (!%p5247_p4), %s782_s8, 32, %s785_s13, %s4560_s2  }
  0xf3   : > { %s4188_s9 = scalar_lea.hbm %s4599_s17, 1024  ;;  %s4193_s18 = scalar_lea.hbm %s5151_s12, 2048 }
  0xf4   : > { %p4189_p2 = scmp.ne.s32.totalorder %s4599_s17, %s4188_s9  ;;  %p4194_p9 = scmp.lt.s32.totalorder %s4599_s17, %s5151_s12 }
  0xf5   : > { %p4195_p10 = scmp.lt.s32.totalorder %s4193_s18, %s4188_s9 }
  0xf6   : > { %p4191_p5 = pnand %p4189_p2, %p4566_p1 }
  0xf7   : > { %p4196_p12 = por %p4195_p10, %p4194_p9 }
  0xf8   : > { %p4192_p8 = pneg %p4191_p5 }
  0xfa   : > { %p4197_p3 = pnand %p4196_p12, %p4192_p8 }
  0xfc   : > { %4200 = shalt.err (!%p4197_p3)
}
  0xfd   : > { %s4201_s2 = scalar_lea.vmem %s4631_s30, 1024  ;;  %s4312_s13 = smov [#allocation12]  }
  0xfe   : > { %p4202_p6 = scmp.ne.s32.totalorder %s4631_s30, %s4201_s2  ;;  %s4206_s19 = sshll.u32 %s4312_s13, 4  ;;  %s4207_s19 = int_to_ptr.vmem [resolvable:$false] %s4206_s19 }
  0xff   : > { %s4208_s21 = scalar_lea.vmem %s4207_s19, 2048  ;;  %p4209_p7 = scmp.lt.s32.totalorder %s4631_s30, %s4207_s19 }
 0x100   : > { %p4204_p11 = pnand %p4202_p6, %p4566_p1  ;;  %p4210_p0 = scmp.lt.s32.totalorder %s4208_s21, %s4201_s2 }
 0x102   : > { %p4205_p13 = pneg %p4204_p11  ;;  %p4211_p2 = por %p4210_p0, %p4209_p7 }
 0x104   : > { %p4212_p5 = pnand %p4211_p2, %p4205_p13 }
 0x106   : > { %4215 = shalt.err (!%p4212_p5)
}
 0x107   : > { %3746 = dma.hbm_to_vmem [thread:$0]  (!%p5247_p4), %s4599_s17, 1024, %s4631_s30, %s4603_s24, %s5238_s23, %s5238_s23, %s5237_s10  }
 0x108   : > { %p5249_p1 = scmp.ne.s32.totalorder %s5222_s0, 0 }
 0x109   : > { %s4727_s25 = sand.u32 (!%p5249_p1), 1, %s4290_s26   ;;  %p5250_p8 = scmp.ne.s32.totalorder (!%p5249_p1), %s5231_s15, 0 }
 0x10a   : > { %859 = sbr.rel (%p5249_p1) target bundleno = 2566 (0xa06), region = 112  ;;  %s862_s8 = scalar_lea.sflag (!%p5249_p1), [#allocation5], %s4727_s25 }
 0x10b   : > { %s864_s20 = scalar_lea.vmem (!%p5249_p1), [#allocation4], %s4727_s25 }
 0x10f   : > { %4257 = dma.done.wait (%p5250_p8), %s862_s8, 16  }
 0x110   : > { %4259 = vsyncadd (%p5250_p8), %s862_s8, 4294967280  ;;  %s869_s1 = sand.u32 1, %s4465_s29   ;;  %s872_s0 = scalar_lea.vmem [#allocation7], %s4727_s25 }
 0x111   : > { %s870_s17 = scalar_lea.sflag [#allocation8], %s869_s1 }
 0x112   : > { %4261 = dma.done.wait (%p5250_p8), %s870_s17, 48  }
 0x113   : > { %4263 = vsyncadd (%p5250_p8), %s870_s17, 4294967248  ;;  %s3198_s24 = sshll.u32 %s4727_s25, 1  ;;  %s3199_s10 = sshll.u32 %s4727_s25, 6 }
 0x114   : > { %s4743_s23 = scalar_lea.vmem [#allocation9], %s3198_s24  ;;  %s887_s30 = scalar_lea.sflag [#allocation11], %s869_s1 }
 0x115   : > { %s4745_s5 = scalar_lea.vmem [#allocation10], %s3199_s10 }
 0x116   : > { %4265 = dma.done.wait (%p5250_p8), %s887_s30, 2048  }
 0x117   : > { %4267 = vsyncadd (%p5250_p8), %s887_s30, 4294965248  ;;  %s4751_s7 = scalar_lea.vmem [#allocation12], %s3199_s10  ;;  %p5251_p4 = scmp.eq.s32.totalorder %s4465_s29, 0 }
 0x119   : > { %4269 = dma.done.wait (%p5251_p4), [#allocation14], 272   ;;  %p5252_p9 = pmov %p5251_p4 }
 0x11a   : > { %p5253_p10 = pmov %p5251_p4 }
 0x11b   : > { %4271 = vsyncadd (%p5252_p9), [#allocation14], 4294967024 }
 0x11c   : > { %4273 = dma.done.wait (%p5253_p10), [#allocation17], 32   ;;  %p5254_p12 = pmov %p5251_p4 }
 0x11d   : > { %p5255_p3 = pmov %p5251_p4 }
 0x11e   : > { %4275 = vsyncadd (%p5254_p12), [#allocation17], 4294967264 }
 0x11f   : > { %4277 = dma.done.wait (%p5255_p3), [#allocation20], 272   ;;  %p5256_p6 = pmov %p5255_p3 }
 0x120   : > { %p1021_p11 = scmp.lt.s32.totalorder %s4465_s29, 1  ;;  %s5257_s9 = sld [smem:[#allocation38_spill]] }
 0x121   : > { %4279 = vsyncadd (%p5256_p6), [#allocation20], 4294967024  ;;  %s5258_s11 = sld [smem:[#allocation42_spill]]  ;;  %p5261_p13 = scmp.ne.s32.totalorder %s4465_s29, 0 }
 0x122   : > { %s1022_s15 = scalar_select %p1021_p11, %s4465_s29, 1 }
 0x123   : > { %s5259_s19 = sld [smem:[#allocation43_spill]] }
 0x124   : > { %s3344_s28 = sshll.u32 %s1022_s15, 7  ;;  %s3345_s27 = sshll.u32 %s1022_s15, 6 }
 0x125   : > { %s5260_s17 = sld [smem:[#allocation45_spill]] }
 0x126   : > { %s4770_s22 = scalar_lea.vmem %s5257_s9, %s3344_s28 }
 0x127   : > { %s4775_s16 = scalar_lea.vmem %s5258_s11, %s3345_s27  ;;  %1045 = sbr.rel (%p5261_p13) target bundleno = 304 (0x130), region = 160 }
 0x129   : > { %s4780_s21 = scalar_lea.vmem %s5259_s19, %s3344_s28 }
 0x12b   : > { %s4785_s24 = scalar_lea.vmem %s5260_s17, %s3344_s28 }
 0x12c   : > { %v4313_v0 = vmov 0.0  }
 0x12d   : > { %1046 = vst [vmem:[#allocation2] sm:$0xff] %v4313_v0  ;;  %1047 = vst [vmem:[#allocation2 + $0x8] sm:$0xff] %v4313_v0 }
 0x12e   : > { %1048 = vst [vmem:[#allocation3 + $0x8] sm:$0xff] %v4313_v0  ;;  %1049 = vst [vmem:[#allocation3 + $0x10] sm:$0xff] %v4313_v0 }
 0x12f   : > { %1050 = vst [vmem:[#allocation3] sm:$0xff] %v4313_v0  ;;  %1051 = vst [vmem:[#allocation3 + $0x18] sm:$0xff] %v4313_v0 }
 0x130 PF: > { %v3808_v1 = vld [vmem:[%s4770_s22 + $0x78] sm:$0xff]   ;;  %v3810_v3 = vld [vmem:[%s4770_s22 + $0x70] sm:$0xff]   ;;  %v3812_v5 = vld [vmem:[%s4770_s22 + $0x68] sm:$0xff]   ;;  %s5262_s15 = sld [smem:[#allocation33_spill]]  ;;  %vm1373_vm0 = vcmask 130048   ;;  %v1535_v31 = vlaneseq  ;;  %vm1844_vm3 = vcmask 130112  }
 0x131   : > { %v3809_v2 = vld [vmem:[%s4770_s22 + $0x38] sm:$0xff]   ;;  %3348 = vmatprep.subr.bf16.mxu0 %v3808_v1  ;;  %v3811_v4 = vld [vmem:[%s4770_s22 + $0x30] sm:$0xff]   ;;  %v3813_v6 = vld [vmem:[%s4770_s22 + $0x28] sm:$0xff]   ;;  %s5263_s2 = sld [smem:[#allocation35_spill]]  ;;  %vm1851_vm6 = vcmask 195712   ;;  %vm1858_vm7 = vcmask 261312  }
 0x132   : > { %3349 = vmatpush3.bf16.msra.mxu0 %v3809_v2  ;;  %v3814_v7 = vld [vmem:[%s4770_s22 + $0x60] sm:$0xff]   ;;  %v3816_v9 = vld [vmem:[%s4770_s22 + $0x58] sm:$0xff]   ;;  %v3818_v11 = vld [vmem:[%s4770_s22 + $0x50] sm:$0xff]   ;;  %s5264_s19 = sld [smem:[#allocation36_spill]]  ;;  %v4848_v32 = vshrl.u32 %v1535_v31, 7  ;;  %vm1875_vm10 = vcmask 261120  }
 0x133   : > { %3350 = vmatprep.subr.bf16.mxu0 %v3810_v3  ;;  %v3815_v8 = vld [vmem:[%s4770_s22 + $0x20] sm:$0xff]   ;;  %v3817_v10 = vld [vmem:[%s4770_s22 + $0x18] sm:$0xff]   ;;  %v3819_v14 = vld [vmem:[%s4770_s22 + $0x10] sm:$0xff]   ;;  %s5265_s17 = sld [smem:[#allocation34_spill]]  ;;  %vm4315_vm11 = vmmov 0   ;;  %p3303_p7 = scmp.ne.s32.totalorder %s4465_s29, 1 }
 0x134   : > { %v3820_v16 = vld [vmem:[%s4770_s22 + $0x48] sm:$0xff]   ;;  %v3822_v18 = vld [vmem:[%s4770_s22 + $0x40] sm:$0xff]   ;;  %v1110_v33 = vld [vmem:[%s4743_s23] sm:$0x3]  ;;  %v1537_v34 = vsub.s32 0, %v4848_v32  ;;  %v1541_v35 = vsub.s32 1, %v4848_v32 }
 0x135   : > { %v3821_v17 = vld [vmem:[%s4770_s22 + $0x8] sm:$0xff]   ;;  %v3823_v19 = vld [vmem:[%s4770_s22] sm:$0xff]   ;;  %v3828_v51 = vld [vmem:[%s4780_s21 + $0x78] sm:$0xff]   ;;  %s5269_s10 = sld [smem:[#allocation50_spill]] (!%p3303_p7) }
 0x136   : > { %3351 = vmatpush3.bf16.msra.mxu0 %v3811_v4  ;;  %v1057_v12 = vld [vmem:[%s5262_s15 + $0x8] sm:$0xff]  ;;  %v1059_v13 = vld [vmem:[%s5262_s15 + $0x18] sm:$0xff]  ;;  %v1056_v20 = vld [vmem:[%s5262_s15] sm:$0xff]  ;;  %v4855_v36 = vrot.slane %v1110_v33, %v1537_v34  ;;  %v4857_v37 = vrot.slane %v1110_v33, %v1541_v35  ;;  %s5270_s13 = sld [smem:[#allocation56_spill]] (!%p3303_p7) }
 0x137   : > { %3352 = vmatprep.subr.bf16.mxu0 %v3812_v5  ;;  %v1224_v15 = vpack.c.bf16 %v1059_v13, %v1057_v12  ;;  %v1058_v21 = vld [vmem:[%s5262_s15 + $0x10] sm:$0xff]  ;;  %v4820_v23 = vld [vmem:[%s5263_s2] sm:$0xff]   ;;  %v3835_v52 = vld [vmem:[%s4775_s16 + $0x38] sm:$0xff]  }
 0x138   : > { %v1223_v22 = vpack.c.bf16 %v1058_v21, %v1056_v20  ;;  %v4825_v24 = vld [vmem:[%s5264_s19] sm:$0xff]   ;;  %v4868_v53 = vld [vmem:[%s5263_s2 + $0x8] sm:$0xff]   ;;  %v3829_v55 = vld [vmem:[%s4780_s21 + $0x38] sm:$0xff]  }
 0x139   : > { %1353 = vmatprep.mubr.bf16.mxu0 %v1224_v15  ;;  %3514 = vmatprep.mubr.msk.bf16.mxu1 %vm1373_vm0, %v4825_v24  ;;  %v1061_v25 = vld [vmem:[%s5265_s17 + $0x8] sm:$0xff]  ;;  %v1063_v26 = vld [vmem:[%s5265_s17 + $0x18] sm:$0xff]  ;;  %v1060_v27 = vld [vmem:[%s5265_s17] sm:$0xff] }
 0x13a   : > { %3353 = vmatpush3.bf16.msra.mxu0 %v3813_v6  ;;  %v4840_v28 = vpack.c.bf16 %v1063_v26, %v1061_v25  ;;  %v1062_v29 = vld [vmem:[%s5265_s17 + $0x10] sm:$0xff]  ;;  %v1548_v39 = vmul.f32 %v4857_v37, %v1063_v26  ;;  %v1545_v40 = vmul.f32 %v4855_v36, %v1060_v27  ;;  %v1546_v41 = vmul.f32 %v4857_v37, %v1061_v25  ;;  %v4873_v54 = vld [vmem:[%s5264_s19 + $0x8] sm:$0xff]   ;;  %v3834_v62 = vld [vmem:[%s4780_s21 + $0x60] sm:$0xff]  }
 0x13b   : > { %3354 = vmatprep.subr.bf16.mxu0 %v3814_v7  ;;  %v4845_v30 = vpack.c.bf16 %v1062_v29, %v1060_v27  ;;  %v1547_v38 = vmul.f32 %v4855_v36, %v1062_v29  ;;  %v3830_v56 = vld [vmem:[%s4780_s21 + $0x70] sm:$0xff]   ;;  %v3832_v59 = vld [vmem:[%s4780_s21 + $0x68] sm:$0xff]   ;;  %v3844_v63 = vld [vmem:[%s4775_s16 + $0x20] sm:$0xff]  }
 0x13c   : > { %v1553_v43 = vadd.f32 %v1546_v41, %v1545_v40  ;;  %v3838_v57 = vld [vmem:[%s4775_s16 + $0x30] sm:$0xff]   ;;  %v3841_v60 = vld [vmem:[%s4775_s16 + $0x28] sm:$0xff]   ;;  %v3836_v0 = vld [vmem:[%s4780_s21 + $0x20] sm:$0xff]  }
 0x13d   : > { %v1556_v42 = vadd.f32 %v1548_v39, %v1547_v38  ;;  %v3831_v58 = vld [vmem:[%s4780_s21 + $0x30] sm:$0xff]   ;;  %v3833_v61 = vld [vmem:[%s4780_s21 + $0x28] sm:$0xff]   ;;  %v3837_v1 = vld [vmem:[%s4780_s21 + $0x58] sm:$0xff]  }
 0x13e   : > { %3355 = vmatpush3.bf16.msra.mxu0 %v3815_v8  ;;  %1554 = vadd.xlane.f32.xlu0 %v1553_v43  ;;  %v3847_v2 = vld [vmem:[%s4775_s16 + $0x18] sm:$0xff]   ;;  %v3840_v4 = vld [vmem:[%s4780_s21 + $0x50] sm:$0xff]   ;;  %v3843_v7 = vld [vmem:[%s4780_s21 + $0x48] sm:$0xff]  }
 0x13f   : > { %3356 = vmatprep.subr.bf16.mxu0 %v3816_v9  ;;  %1557 = vadd.xlane.f32.xlu1 %v1556_v42  ;;  %v3839_v3 = vld [vmem:[%s4780_s21 + $0x18] sm:$0xff]   ;;  %v3849_v5 = vld [vmem:[%s4775_s16 + $0x10] sm:$0xff]   ;;  %v3845_v8 = vld [vmem:[%s4780_s21 + $0x8] sm:$0xff]  }
 0x140   : > { %v3842_v6 = vld [vmem:[%s4780_s21 + $0x10] sm:$0xff]   ;;  %v3846_v9 = vld [vmem:[%s4780_s21 + $0x40] sm:$0xff]   ;;  %v1065_v12 = vld [vmem:[%s5265_s17 + $0x28] sm:$0xff] }
 0x141   : > { %v1067_v13 = vld [vmem:[%s5265_s17 + $0x38] sm:$0xff]  ;;  %v1064_v15 = vld [vmem:[%s5265_s17 + $0x20] sm:$0xff] }
 0x142   : > { %3357 = vmatpush3.bf16.msra.mxu0 %v3817_v10  ;;  %v3848_v10 = vld [vmem:[%s4780_s21] sm:$0xff]   ;;  %v1552_v20 = vmul.f32 %v4857_v37, %v1067_v13  ;;  %v1549_v21 = vmul.f32 %v4855_v36, %v1064_v15 }
 0x143   : > { %3358 = vmatprep.subr.bf16.mxu0 %v3818_v11  ;;  %v3850_v11 = vld [vmem:[%s4775_s16 + $0x8] sm:$0xff]   ;;  %v3241_v27 = vld [vmem:[%s872_s0] ss:$0 sm:$0xff]  ;;  %s5266_s0 = sld [smem:[#allocation37_spill]] }
 0x144   : > { %v3240_v29 = vld [vmem:[%s864_s20] ss:$0 sm:$0xff]  ;;  %s5268_s20 = sld [smem:[#allocation51_spill]] (!%p3303_p7) }
 0x146   : > { %3359 = vmatpush3.bf16.msra.mxu0 %v3819_v14  ;;  %v4908_v14 = vpack.c.bf16 %v1067_v13, %v1065_v12 }
 0x147   : > { %3360 = vmatprep.subr.bf16.mxu0 %v3820_v16  ;;  %v1066_v16 = vld [vmem:[%s5265_s17 + $0x30] sm:$0xff] }
 0x14a   : > { %3361 = vmatpush3.bf16.msra.mxu0 %v3821_v17  ;;  %v4916_v17 = vpack.c.bf16 %v1066_v16, %v1064_v15 }
 0x14b   : > { %3362 = vmatprep.subr.bf16.mxu0 %v3822_v18  ;;  %v3851_v18 = vld [vmem:[%s4775_s16] sm:$0xff]  }
 0x14e   : > { %3363 = vmatpush3.bf16.msra.mxu0 %v3823_v19  ;;  %v1551_v19 = vmul.f32 %v4855_v36, %v1066_v16 }
 0x150   : > { %v1562_v25 = vadd.f32 %v1552_v20, %v1551_v19 }
 0x151   : > { %1354 = vmatmul.mubr.bf16.vlgmr.msra.gmra.mxu0 %v1223_v22  ;;  %v1550_v22 = vmul.f32 %v4857_v37, %v1065_v12 }
 0x152   : > { %3508 = vmatprep.mubr.msk.bf16.mxu0 %vm1373_vm0, %v4820_v23 }
 0x153   : > { %v1559_v26 = vadd.f32 %v1550_v22, %v1549_v21 }
 0x211   : > { %v3364_v44 = vpop.f32.mrf.mxu0 }
 0x213   : > { %v3365_v45 = vpop.f32.mrf.mxu0 }
 0x214   : > { %v3366_v48 = vadd.f32 %v3365_v45, %v3364_v44 }
 0x215   : > { %v3367_v46 = vpop.f32.mrf.mxu0 }
 0x217   : > { %v3368_v47 = vpop.f32.mrf.mxu0 }
 0x218   : > { %v3369_v49 = vadd.f32 %v3368_v47, %v3367_v46 }
 0x21a   : > { %v1362_v50 = vpack.c.bf16 %v3369_v49, %v3366_v48 }
 0x21c   : > { %3506 = vmatprep.subr.bf16.mxu0 %v1362_v50  ;;  %3512 = vmatprep.subr.bf16.mxu1 %v1362_v50 }
 0x21d   : > { %3507 = vmatpush3.bf16.msra.mxu0 %v1362_v50  ;;  %3513 = vmatpush3.bf16.msra.mxu1 %v1362_v50 }
 0x21e   : > { %3376 = vmatprep.subr.bf16.mxu1 %v3828_v51  ;;  %3518 = vmatprep.subr.bf16.mxu0 %v3835_v52  ;;  %v4314_v51 = vmov 0.0  }
 0x220   : > { %3509 = vmatmul.mubr.msk.bf16.vlgmr.msra.gmra.mxu0 %vm1373_vm0, %v4868_v53  ;;  %3515 = vmatmul.mubr.msk.bf16.vlgmr.msra.gmra.mxu1 %vm1373_vm0, %v4873_v54 }
 0x221   : > { %3377 = vmatpush3.bf16.msra.mxu1 %v3829_v55  ;;  %3519 = vmatpush3.bf16.msra.mxu0 %v3835_v52  ;;  %v1558_v52 = vpop.xlane.xlu1 %1557  ;;  %v1555_v55 = vpop.xlane.xlu0 %1554 }
 0x222   : > { %3378 = vmatprep.subr.bf16.mxu1 %v3830_v56  ;;  %3520 = vmatprep.subr.bf16.mxu0 %v3838_v57 }
 0x223   : > { %1715 = vmatprep.mubr.bf16.mxu1 %v4840_v28 }
 0x225   : > { %3379 = vmatpush3.bf16.msra.mxu1 %v3831_v58  ;;  %3521 = vmatpush3.bf16.msra.mxu0 %v3838_v57 }
 0x226   : > { %3380 = vmatprep.subr.bf16.mxu1 %v3832_v59  ;;  %3522 = vmatprep.subr.bf16.mxu0 %v3841_v60 }
 0x229   : > { %3381 = vmatpush3.bf16.msra.mxu1 %v3833_v61  ;;  %3523 = vmatpush3.bf16.msra.mxu0 %v3841_v60 }
 0x22a   : > { %3382 = vmatprep.subr.bf16.mxu1 %v3834_v62  ;;  %3524 = vmatprep.subr.bf16.mxu0 %v3844_v63 }
 0x22d   : > { %3383 = vmatpush3.bf16.msra.mxu1 %v3836_v0  ;;  %3525 = vmatpush3.bf16.msra.mxu0 %v3844_v63  ;;  %v1834_v0 = vand.u32 127, %v1535_v31 }
 0x22e   : > { %3384 = vmatprep.subr.bf16.mxu1 %v3837_v1  ;;  %3526 = vmatprep.subr.bf16.mxu0 %v3847_v2 }
 0x231   : > { %3385 = vmatpush3.bf16.msra.mxu1 %v3839_v3  ;;  %3527 = vmatpush3.bf16.msra.mxu0 %v3847_v2  ;;  %v1839_v3 = vadd.s32 4294967288, %v1834_v0 }
 0x232   : > { %3386 = vmatprep.subr.bf16.mxu1 %v3840_v4  ;;  %3528 = vmatprep.subr.bf16.mxu0 %v3849_v5 }
 0x233   : > { %v1842_v13 = vsub.s32 %v1839_v3, %v4848_v32 }
 0x235   : > { %3387 = vmatpush3.bf16.msra.mxu1 %v3842_v6  ;;  %3529 = vmatpush3.bf16.msra.mxu0 %v3849_v5  ;;  %v1853_v6 = vadd.s32 4294967272, %v1834_v0 }
 0x236   : > { %3388 = vmatprep.subr.bf16.mxu1 %v3843_v7  ;;  %3530 = vmatprep.subr.bf16.mxu0 %v3850_v11  ;;  %v1846_v7 = vadd.s32 4294967280, %v1834_v0 }
 0x237   : > { %v1856_v20 = vsub.s32 %v1853_v6, %v4848_v32 }
 0x238   : > { %v1849_v21 = vsub.s32 %v1846_v7, %v4848_v32 }
 0x239   : > { %3389 = vmatpush3.bf16.msra.mxu1 %v3845_v8  ;;  %3531 = vmatpush3.bf16.msra.mxu0 %v3850_v11  ;;  %v1837_v11 = vsub.s32 %v1834_v0, %v4848_v32 }
 0x23a   : > { %3390 = vmatprep.subr.bf16.mxu1 %v3846_v9  ;;  %3532 = vmatprep.subr.bf16.mxu0 %v3851_v18 }
 0x23d   : > { %3391 = vmatpush3.bf16.msra.mxu1 %v3848_v10  ;;  %3533 = vmatpush3.bf16.msra.mxu0 %v3851_v18 }
 0x23e   : > { %3538 = vmatprep.subr.bf16.mxu0 %v4314_v51 }
 0x240   : > { %1716 = vmatmul.mubr.bf16.vlgmr.msra.gmra.mxu1 %v4845_v30 }
 0x241   : > { %1723 = vmatprep.mubr.bf16.mxu1 %v4908_v14 }
 0x248   : > { %1724 = vmatmul.mubr.bf16.gmra.mxu1 %v4916_v17 }
 0x249   : > { %3548 = vmatprep.mubr.msk.bf16.mxu1 %vm1373_vm0, %v4820_v23 }
 0x2e0   : > { %v3510_v33 = vpop.f32.mrf.mxu0  ;;  %v3516_v35 = vpop.f32.mrf.mxu1 }
 0x2e1   : > { %v1520_v38 = vmul.f32 %v3516_v35, %v3241_v27  ;;  %v1502_v39 = vmul.f32 %v3510_v33, %v3240_v29  ;;  %v1053_v35 = vld [vmem:[%s5266_s0 + $0x8] sm:$0xff] }
 0x2e2   : > { %v1414_v40 = vpop.f32.mrf.mxu0  ;;  %v1479_v23 = vpop.f32.mrf.mxu1  ;;  %vm1055_vm8 = vcmp.gt.f32.partialorder %v1053_v35, 0.5 }
 0x2e3   : > { %1526 = vadd.xlane.f32.xlu1 %v1520_v38  ;;  %1508 = vadd.xlane.f32.xlu0 %v1502_v39  ;;  %v1518_v42 = vmul.f32 %v3241_v27, %v1479_v23  ;;  %v1500_v43 = vmul.f32 %v3240_v29, %v1414_v40  ;;  %v1052_v38 = vld [vmem:[%s5266_s0] sm:$0xff] }
 0x2e4   : > { %v3511_v41 = vpop.f32.mrf.mxu0  ;;  %v3517_v36 = vpop.f32.mrf.mxu1  ;;  %vm1054_vm9 = vcmp.gt.f32.partialorder %v1052_v38, 0.5 }
 0x2e5   : > { %v1582_v45 = vpack.c.bf16 %v3511_v41, %v3510_v33  ;;  %v1521_v46 = vmul.f32 %v3517_v36, %v3241_v27  ;;  %v1503_v47 = vmul.f32 %v3511_v41, %v3240_v29 }
 0x2e6   : > { %v1417_v44 = vpop.f32.mrf.mxu0  ;;  %v1482_v48 = vpop.f32.mrf.mxu1 }
 0x2e7   : > { %v1581_v37 = vpack.c.bf16 %v1417_v44, %v1414_v40  ;;  %1522 = vadd.xlane.f32.xlu1 %v1518_v42  ;;  %1504 = vadd.xlane.f32.xlu0 %v1500_v43  ;;  %v1519_v49 = vmul.f32 %v3241_v27, %v1482_v48  ;;  %v1501_v50 = vmul.f32 %v3240_v29, %v1417_v44 }
 0x2e9   : > { %3534 = vmatprep.mubr.bf16.mxu0 %v1581_v37 }
 0x2ea   : > { %3535 = vmatmul.mubr.bf16.vlgmr.msra.gmra.mxu0 %v1582_v45 }
 0x2eb   : > { %1528 = vadd.xlane.f32.xlu1 %v1521_v46  ;;  %1510 = vadd.xlane.f32.xlu0 %v1503_v47 }
 0x2ec   : > { %3542 = vmatprep.mubr.msk.bf16.mxu0 %vm4315_vm11, %v4314_v51 }
 0x2ef   : > { %1524 = vadd.xlane.f32.xlu1 %v1519_v49  ;;  %1506 = vadd.xlane.f32.xlu0 %v1501_v50 }
 0x2f3   : > { %1563 = vadd.xlane.f32.xlu1 %v1562_v25  ;;  %1560 = vadd.xlane.f32.xlu0 %v1559_v26 }
 0x300   : > { %v3392_v46 = vpop.f32.mrf.mxu1 }
 0x302   : > { %v3393_v47 = vpop.f32.mrf.mxu1 }
 0x304   : > { %v3395_v48 = vpop.f32.mrf.mxu1 }
 0x306   : > { %v3396_v49 = vpop.f32.mrf.mxu1 }
 0x308   : > { %v3398_v50 = vpop.f32.mrf.mxu1 }
 0x36c   : > { %v1527_v56 = vpop.xlane.xlu1 %1526  ;;  %v1509_v57 = vpop.xlane.xlu0 %1508 }
 0x36d   : > { %v1532_v8 = vadd.f32 %v1527_v56, %v1509_v57 }
 0x370   : > { %v1523_v58 = vpop.xlane.xlu1 %1522  ;;  %v1505_v59 = vpop.xlane.xlu0 %1504 }
 0x371   : > { %v1530_v60 = vadd.f32 %v1523_v58, %v1505_v59 }
 0x373   : > { %v1565_v61 = vadd.f32 %v1555_v55, %v1530_v60 }
 0x374   : > { %v1529_v62 = vpop.xlane.xlu1 %1528  ;;  %v1511_v63 = vpop.xlane.xlu0 %1510 }
 0x375   : > { %v1573_v1 = vmul.f32 0.1, %v1565_v61  ;;  %vm1569_vm1 = vcmp.ge.f32.partialorder %v1565_v61, 0.0  ;;  %v1533_v9 = vadd.f32 %v1529_v62, %v1511_v63  ;;  %v3394_v63 = vadd.f32 %v3393_v47, %v3392_v46  ;;  %v3855_v47 = vld [vmem:[%s4745_s5 + $0x30] sm:$0xff]  }
 0x377   : > { %v1577_v12 = vsel %vm1569_vm1, %v1565_v61, %v1573_v1  ;;  %v3397_v61 = vadd.f32 %v3396_v49, %v3395_v48  ;;  %v3856_v48 = vld [vmem:[%s4751_s7 + $0x28] sm:$0xff]  }
 0x378   : > { %v1525_v2 = vpop.xlane.xlu1 %1524  ;;  %v1507_v4 = vpop.xlane.xlu0 %1506  ;;  %v1838_v26 = vrot.slane %v1577_v12, %v1837_v11  ;;  %v3857_v49 = vld [vmem:[%s4745_s5 + $0x28] sm:$0xff]  }
 0x379   : > { %v1531_v5 = vadd.f32 %v1525_v2, %v1507_v4 }
 0x37b   : > { %v1566_v10 = vadd.f32 %v1558_v52, %v1531_v5  ;;  %v3399_v52 = vpop.f32.mrf.mxu1 }
 0x37c   : > { %v1564_v15 = vpop.xlane.xlu1 %1563  ;;  %v1561_v16 = vpop.xlane.xlu0 %1560  ;;  %v3400_v58 = vadd.f32 %v3399_v52, %v3398_v50  ;;  %v3858_v50 = vld [vmem:[%s4751_s7 + $0x20] sm:$0xff]  }
 0x37d   : > { %vm1570_vm2 = vcmp.ge.f32.partialorder %v1566_v10, 0.0  ;;  %v1574_v31 = vmul.f32 0.1, %v1566_v10  ;;  %v1568_v18 = vadd.f32 %v1564_v15, %v1533_v9  ;;  %v1567_v19 = vadd.f32 %v1561_v16, %v1532_v8  ;;  %v3401_v55 = vpop.f32.mrf.mxu1  ;;  %v3859_v52 = vld [vmem:[%s4745_s5 + $0x20] sm:$0xff]  }
 0x37f   : > { %v1578_v22 = vsel %vm1570_vm2, %v1566_v10, %v1574_v31  ;;  %vm1572_vm4 = vcmp.ge.f32.partialorder %v1568_v18, 0.0  ;;  %v1576_v25 = vmul.f32 0.1, %v1568_v18  ;;  %vm1571_vm5 = vcmp.ge.f32.partialorder %v1567_v19, 0.0  ;;  %v3402_v56 = vpop.f32.mrf.mxu1 }
 0x380   : > { %v1843_v27 = vrot.slane %v1578_v22, %v1842_v13  ;;  %v1575_v29 = vmul.f32 0.1, %v1567_v19  ;;  %v3403_v59 = vadd.f32 %v3402_v56, %v3401_v55  ;;  %v3862_v55 = vld [vmem:[%s4751_s7 + $0x10] sm:$0xff]  }
 0x381   : > { %v1580_v33 = vsel %vm1572_vm4, %v1568_v18, %v1576_v25  ;;  %v3863_v56 = vld [vmem:[%s4745_s5 + $0x10] sm:$0xff]  }
 0x382   : > { %v1857_v39 = vrot.slane %v1580_v33, %v1856_v20  ;;  %v1579_v40 = vsel %vm1571_vm5, %v1567_v19, %v1575_v29  ;;  %v1845_v23 = vsel %vm1844_vm3, %v1843_v27, %v1838_v26 }
 0x383   : > { %v1850_v41 = vrot.slane %v1579_v40, %v1849_v21 }
 0x385   : > { %v1852_v42 = vsel %vm1851_vm6, %v1850_v41, %v1845_v23 }
 0x386   : > { %v1859_v43 = vsel %vm1858_vm7, %v1857_v39, %v1852_v42  ;;  %v2396_v42 = vld [vmem:[#allocation2 + $0x8] sm:$0xff] }
 0x387   : > { %v1874_v36 = vsel %vm1055_vm8, %v1859_v43, -1e+30  ;;  %v1873_v44 = vsel %vm1054_vm9, %v1859_v43, -1e+30 }
 0x388   : > { %v1879_v37 = vsel %vm1875_vm10, %v1874_v36, -inf  ;;  %v1876_v45 = vsel %vm1875_vm10, %v1873_v44, -inf }
 0x389   : > { %1880 = vmax.xlane.f32.xlu1 %v1879_v37  ;;  %1877 = vmax.xlane.f32.xlu0 %v1876_v45  ;;  %v3853_v37 = vld [vmem:[%s4745_s5 + $0x38] sm:$0xff]  }
 0x3aa   : > { %v3536_v57 = vpop.f32.mrf.mxu0 }
 0x3ab   : > { %v1823_v0 = vadd.f32 %v3536_v57, %v3400_v58  ;;  %v3864_v57 = vld [vmem:[%s4751_s7 + $0x8] sm:$0xff]  }
 0x3ac   : > { %v1814_v60 = vpop.f32.mrf.mxu0  ;;  %v3865_v58 = vld [vmem:[%s4745_s5 + $0x8] sm:$0xff]  }
 0x3ad   : > { %v1815_v5 = vadd.f32 %v3394_v63, %v1814_v60  ;;  %v3867_v60 = vld [vmem:[%s4745_s5] sm:$0xff]  }
 0x3ae   : > { %v3537_v62 = vpop.f32.mrf.mxu0 }
 0x3af   : > { %v1826_v1 = vadd.f32 %v3537_v62, %v3403_v59  ;;  %v3866_v59 = vld [vmem:[%s4751_s7] sm:$0xff]  }
 0x3b0   : > { %v1817_v2 = vpop.f32.mrf.mxu0 }
 0x3b1   : > { %v1904_v3 = vpack.c.bf16 %v1826_v1, %v1823_v0  ;;  %v1818_v4 = vadd.f32 %v3397_v61, %v1817_v2  ;;  %v3868_v61 = vld [vmem:[%s4785_s24 + $0x78] sm:$0xff]  }
 0x3b3   : > { %3539 = vmatpush3.bf16.msra.mxu0 %v1904_v3  ;;  %v1903_v6 = vpack.c.bf16 %v1818_v4, %v1815_v5 }
 0x3b4   : > { %3540 = vmatprep.subr.bf16.mxu0 %v4314_v51  ;;  %v2395_v51 = vld [vmem:[#allocation2] sm:$0xff] }
 0x3b7   : > { %3541 = vmatpush3.bf16.msra.mxu0 %v1903_v6 }
 0x412   : > { %v1881_v7 = vpop.xlane.xlu1 %1880  ;;  %v1878_v8 = vpop.xlane.xlu0 %1877 }
 0x413   : > { %v1883_v9 = vsub.f32 %v1874_v36, %v1881_v7  ;;  %v1882_v10 = vsub.f32 %v1873_v44, %v1878_v8  ;;  %v3852_v44 = vld [vmem:[%s4751_s7 + $0x38] sm:$0xff]  }
 0x415   : > { %v1886_v11 = vmul.f32 1.442695, %v1883_v9  ;;  %v1884_v12 = vmul.f32 1.442695, %v1882_v10  ;;  %v3869_v9 = vld [vmem:[%s4785_s24 + $0x38] sm:$0xff]  }
 0x417   : > { %3884 = vpow2.f32 %v1886_v11  ;;  %v3870_v11 = vld [vmem:[%s4785_s24 + $0x70] sm:$0xff]  }
 0x418   : > { %3886 = vpow2.f32 %v1884_v12  ;;  %v3871_v12 = vld [vmem:[%s4785_s24 + $0x30] sm:$0xff]  }
 0x424   : > { %v3885_v13 = vpop.eup %3884 }
 0x425   : > { %v3887_v15 = vpop.eup %3886  ;;  %v1889_v16 = vsel %vm1055_vm8, %v3885_v13, 0.0  ;;  %v3872_v13 = vld [vmem:[%s4785_s24 + $0x68] sm:$0xff]  }
 0x426   : > { %v1893_v31 = vsel %vm1875_vm10, %v1889_v16, 0.0  ;;  %v1888_v18 = vsel %vm1054_vm9, %v3887_v15, 0.0  ;;  %v3873_v15 = vld [vmem:[%s4785_s24 + $0x28] sm:$0xff]  }
 0x427   : > { %1894 = vadd.xlane.f32.xlu1 %v1893_v31  ;;  %v1890_v19 = vsel %vm1875_vm10, %v1888_v18, 0.0  ;;  %v3875_v31 = vld [vmem:[%s4785_s24 + $0x20] sm:$0xff]  }
 0x428   : > { %1891 = vadd.xlane.f32.xlu0 %v1890_v19  ;;  %v3877_v19 = vld [vmem:[%s4785_s24 + $0x18] sm:$0xff]  }
 0x4b0   : > { %v1895_v20 = vpop.xlane.xlu1 %1894 }
 0x4b1   : > { %v1897_v21 = vmax.f32 %v1895_v20, 1e-20  ;;  %v1892_v22 = vpop.xlane.xlu0 %1891  ;;  %v3878_v20 = vld [vmem:[%s4785_s24 + $0x50] sm:$0xff]  }
 0x4b2   : > { %v1896_v25 = vmax.f32 %v1892_v22, 1e-20  ;;  %v3881_v22 = vld [vmem:[%s4785_s24 + $0x8] sm:$0xff]  }
 0x4b3   : > { %3888 = vrcp.f32 %v1897_v21  ;;  %v3880_v21 = vld [vmem:[%s4785_s24 + $0x48] sm:$0xff]  }
 0x4b4   : > { %3890 = vrcp.f32 %v1896_v25  ;;  %v3882_v25 = vld [vmem:[%s4785_s24 + $0x40] sm:$0xff]  }
 0x4c0   : > { %v3889_v26 = vpop.eup %3888 }
 0x4c1   : > { %v3891_v27 = vpop.eup %3890  ;;  %v1901_v29 = vmul.f32 %v3889_v26, %v1889_v16  ;;  %v3874_v16 = vld [vmem:[%s4785_s24 + $0x60] sm:$0xff]  }
 0x4c2   : > { %v1900_v33 = vmul.f32 %v3891_v27, %v1888_v18  ;;  %v3876_v18 = vld [vmem:[%s4785_s24 + $0x58] sm:$0xff]   ;;  %v3883_v26 = vld [vmem:[%s4785_s24] sm:$0xff]  }
 0x4c4   : > { %v1902_v35 = vpack.c.bf16 %v1901_v29, %v1900_v33 }
 0x4c6   : > { %3543 = vmatmul.mubr.msk.bf16.vlgmr.msra.gmra.mxu0 %vm1875_vm10, %v1902_v35 }
 0x4c7   : > { %3554 = vmatprep.mubr.msk.bf16.mxu0 %vm1373_vm0, %v4825_v24  ;;  %v3854_v24 = vld [vmem:[%s4751_s7 + $0x30] sm:$0xff]  }
 0x586   : > { %v1942_v38 = vpop.f32.mrf.mxu0 }
 0x587   : > { %v2397_v39 = vmul.f32 0.5, %v1942_v38 }
 0x588   : > { %v3544_v40 = vpop.f32.mrf.mxu0 }
 0x589   : > { %v2399_v23 = vadd.f32 %v2397_v39, %v2395_v51 }
 0x58a   : > { %v1945_v41 = vpop.f32.mrf.mxu0 }
 0x58b   : > { %2401 = vst [vmem:[#allocation2] sm:$0xff] %v2399_v23  ;;  %v1949_v43 = vpack.c.bf16 %v1945_v41, %v1942_v38  ;;  %v2398_v36 = vmul.f32 0.5, %v1945_v41 }
 0x58c   : > { %v3545_v45 = vpop.f32.mrf.mxu0 }
 0x58d   : > { %v2400_v46 = vadd.f32 %v2398_v36, %v2396_v42  ;;  %3546 = vmatprep.subr.bf16.mxu1 %v1949_v43  ;;  %3552 = vmatprep.subr.bf16.mxu0 %v1949_v43 }
 0x58e   : > { %3547 = vmatpush3.bf16.msra.mxu1 %v1949_v43  ;;  %3553 = vmatpush3.bf16.msra.mxu0 %v1949_v43 }
 0x58f   : > { %2402 = vst [vmem:[#allocation2 + $0x8] sm:$0xff] %v2400_v46  ;;  %3558 = vmatprep.subr.bf16.mxu1 %v3852_v44  ;;  %3578 = vmatprep.subr.bf16.mxu0 %v3853_v37 }
 0x591   : > { %3549 = vmatmul.mubr.msk.bf16.vlgmr.msra.gmra.mxu1 %vm1373_vm0, %v4868_v53  ;;  %3555 = vmatmul.mubr.msk.bf16.vlgmr.msra.gmra.mxu0 %vm1373_vm0, %v4873_v54  ;;  %v3860_v53 = vld [vmem:[%s4751_s7 + $0x18] sm:$0xff]  }
 0x592   : > { %3559 = vmatpush3.bf16.msra.mxu1 %v3852_v44  ;;  %3579 = vmatpush3.bf16.msra.mxu0 %v3853_v37  ;;  %v3861_v54 = vld [vmem:[%s4745_s5 + $0x18] sm:$0xff]   ;;  %v2403_v37 = vld [vmem:[#allocation3 + $0x8] sm:$0xff] }
 0x593   : > { %3560 = vmatprep.subr.bf16.mxu1 %v3854_v24  ;;  %3580 = vmatprep.subr.bf16.mxu0 %v3855_v47 }
 0x596   : > { %3561 = vmatpush3.bf16.msra.mxu1 %v3854_v24  ;;  %3581 = vmatpush3.bf16.msra.mxu0 %v3855_v47 }
 0x597   : > { %3562 = vmatprep.subr.bf16.mxu1 %v3856_v48  ;;  %3582 = vmatprep.subr.bf16.mxu0 %v3857_v49 }
 0x59a   : > { %3563 = vmatpush3.bf16.msra.mxu1 %v3856_v48  ;;  %3583 = vmatpush3.bf16.msra.mxu0 %v3857_v49  ;;  %v2404_v48 = vld [vmem:[#allocation3 + $0x10] sm:$0xff] }
 0x59b   : > { %3564 = vmatprep.subr.bf16.mxu1 %v3858_v50  ;;  %3584 = vmatprep.subr.bf16.mxu0 %v3859_v52 }
 0x59e   : > { %3565 = vmatpush3.bf16.msra.mxu1 %v3858_v50  ;;  %3585 = vmatpush3.bf16.msra.mxu0 %v3859_v52 }
 0x59f   : > { %3566 = vmatprep.subr.bf16.mxu1 %v3860_v53  ;;  %3586 = vmatprep.subr.bf16.mxu0 %v3861_v54 }
 0x5a2   : > { %3567 = vmatpush3.bf16.msra.mxu1 %v3860_v53  ;;  %3587 = vmatpush3.bf16.msra.mxu0 %v3861_v54 }
 0x5a3   : > { %3568 = vmatprep.subr.bf16.mxu1 %v3862_v55  ;;  %3588 = vmatprep.subr.bf16.mxu0 %v3863_v56 }
 0x5a6   : > { %3569 = vmatpush3.bf16.msra.mxu1 %v3862_v55  ;;  %3589 = vmatpush3.bf16.msra.mxu0 %v3863_v56 }
 0x5a7   : > { %3570 = vmatprep.subr.bf16.mxu1 %v3864_v57  ;;  %3590 = vmatprep.subr.bf16.mxu0 %v3865_v58 }
 0x5aa   : > { %3571 = vmatpush3.bf16.msra.mxu1 %v3864_v57  ;;  %3591 = vmatpush3.bf16.msra.mxu0 %v3865_v58  ;;  %v2405_v57 = vld [vmem:[#allocation3] sm:$0xff] }
 0x5ab   : > { %3572 = vmatprep.subr.bf16.mxu1 %v3866_v59  ;;  %3592 = vmatprep.subr.bf16.mxu0 %v3867_v60 }
 0x5ae   : > { %3573 = vmatpush3.bf16.msra.mxu1 %v3866_v59  ;;  %3593 = vmatpush3.bf16.msra.mxu0 %v3867_v60 }
 0x5af   : > { %3443 = vmatprep.subr.bf16.mxu1 %v3868_v61 }
 0x651   : > { %v3550_v62 = vpop.f32.mrf.mxu1  ;;  %v3556_v63 = vpop.f32.mrf.mxu0 }
 0x653   : > { %v1984_v0 = vpop.f32.mrf.mxu1  ;;  %v2033_v1 = vpop.f32.mrf.mxu0 }
 0x655   : > { %v3551_v2 = vpop.f32.mrf.mxu1  ;;  %v3557_v3 = vpop.f32.mrf.mxu0 }
 0x656   : > { %v2049_v4 = vpack.c.bf16 %v3551_v2, %v3550_v62  ;;  %v2051_v10 = vpack.c.bf16 %v3557_v3, %v3556_v63 }
 0x657   : > { %v1987_v5 = vpop.f32.mrf.mxu1  ;;  %v2036_v6 = vpop.f32.mrf.mxu0 }
 0x658   : > { %v2048_v7 = vpack.c.bf16 %v1987_v5, %v1984_v0  ;;  %v2050_v8 = vpack.c.bf16 %v2036_v6, %v2033_v1  ;;  %v2406_v0 = vld [vmem:[#allocation3 + $0x18] sm:$0xff] }
 0x65a   : > { %3574 = vmatprep.mubr.bf16.mxu1 %v2050_v8  ;;  %3594 = vmatprep.mubr.bf16.mxu0 %v2048_v7 }
 0x65b   : > { %3575 = vmatmul.mubr.bf16.vlgmr.msra.gmra.mxu1 %v2051_v10  ;;  %3595 = vmatmul.mubr.bf16.vlgmr.msra.gmra.mxu0 %v2049_v4 }
 0x65c   : > { %3444 = vmatpush3.bf16.msra.mxu1 %v3869_v9  ;;  %2374 = vmatprep.mubr.bf16.mxu1 %v4840_v28  ;;  %v3879_v28 = vld [vmem:[%s4785_s24 + $0x10] sm:$0xff]   ;;  %s5267_s24 = sld [smem:[#allocation46_spill]] (!%p3303_p7) }
 0x65d   : > { %3445 = vmatprep.subr.bf16.mxu1 %v3870_v11 }
 0x660   : > { %3446 = vmatpush3.bf16.msra.mxu1 %v3871_v12 }
 0x661   : > { %3447 = vmatprep.subr.bf16.mxu1 %v3872_v13 }
 0x664   : > { %3448 = vmatpush3.bf16.msra.mxu1 %v3873_v15 }
 0x665   : > { %3449 = vmatprep.subr.bf16.mxu1 %v3874_v16 }
 0x668   : > { %3450 = vmatpush3.bf16.msra.mxu1 %v3875_v31 }
 0x669   : > { %3451 = vmatprep.subr.bf16.mxu1 %v3876_v18 }
 0x66c   : > { %3452 = vmatpush3.bf16.msra.mxu1 %v3877_v19 }
 0x66d   : > { %3453 = vmatprep.subr.bf16.mxu1 %v3878_v20 }
 0x670   : > { %3454 = vmatpush3.bf16.msra.mxu1 %v3879_v28 }
 0x671   : > { %3455 = vmatprep.subr.bf16.mxu1 %v3880_v21 }
 0x674   : > { %3456 = vmatpush3.bf16.msra.mxu1 %v3881_v22 }
 0x675   : > { %3457 = vmatprep.subr.bf16.mxu1 %v3882_v25 }
 0x678   : > { %3458 = vmatpush3.bf16.msra.mxu1 %v3883_v26 }
 0x67b   : > { %2375 = vmatmul.mubr.bf16.vlgmr.msra.gmra.mxu1 %v4845_v30 }
 0x67c   : > { %2382 = vmatprep.mubr.bf16.mxu1 %v4908_v14 }
 0x683   : > { %2383 = vmatmul.mubr.bf16.gmra.mxu1 %v4916_v17 }
 0x71b   : > { %v3576_v27 = vpop.f32.mrf.mxu1  ;;  %v3596_v33 = vpop.f32.mrf.mxu0 }
 0x71c   : > { %v2240_v50 = vadd.f32 %v3596_v33, %v3576_v27 }
 0x71d   : > { %v2134_v29 = vpop.f32.mrf.mxu1  ;;  %v2231_v38 = vpop.f32.mrf.mxu0 }
 0x71e   : > { %v2232_v41 = vadd.f32 %v2231_v38, %v2134_v29 }
 0x71f   : > { %v3577_v35 = vpop.f32.mrf.mxu1  ;;  %v3597_v39 = vpop.f32.mrf.mxu0 }
 0x720   : > { %v2243_v59 = vadd.f32 %v3597_v39, %v3577_v35 }
 0x721   : > { %v2137_v51 = vpop.f32.mrf.mxu1  ;;  %v2234_v43 = vpop.f32.mrf.mxu0 }
 0x722   : > { %v2235_v45 = vadd.f32 %v2234_v43, %v2137_v51 }
 0x73b   : > { %v3459_v40 = vpop.f32.mrf.mxu1 }
 0x73d   : > { %v3460_v23 = vpop.f32.mrf.mxu1 }
 0x73e   : > { %v3461_v42 = vadd.f32 %v3460_v23, %v3459_v40 }
 0x73f   : > { %v3462_v36 = vpop.f32.mrf.mxu1 }
 0x740   : > { %v2391_v44 = vadd.f32 %v3461_v42, %v2232_v41 }
 0x741   : > { %v3463_v30 = vpop.f32.mrf.mxu1 }
 0x742   : > { %v2407_v14 = vmul.f32 0.5, %v2391_v44  ;;  %v3464_v46 = vadd.f32 %v3463_v30, %v3462_v36 }
 0x743   : > { %v3465_v17 = vpop.f32.mrf.mxu1 }
 0x744   : > { %v2411_v24 = vadd.f32 %v2407_v14, %v2403_v37  ;;  %v2392_v47 = vadd.f32 %v3464_v46, %v2235_v45 }
 0x745   : > { %v3466_v49 = vpop.f32.mrf.mxu1 }
 0x746   : > { %2415 = vst [vmem:[#allocation3 + $0x8] sm:$0xff] %v2411_v24  ;;  %v2408_v52 = vmul.f32 0.5, %v2392_v47  ;;  %v3467_v53 = vadd.f32 %v3466_v49, %v3465_v17 }
 0x747   : > { %v3468_v54 = vpop.f32.mrf.mxu1 }
 0x748   : > { %v2412_v55 = vadd.f32 %v2408_v52, %v2404_v48  ;;  %v2393_v56 = vadd.f32 %v3467_v53, %v2240_v50 }
 0x749   : > { %v3469_v58 = vpop.f32.mrf.mxu1 }
 0x74a   : > { %2416 = vst [vmem:[#allocation3 + $0x10] sm:$0xff] %v2412_v55  ;;  %v2409_v60 = vmul.f32 0.5, %v2393_v56  ;;  %v3470_v61 = vadd.f32 %v3469_v58, %v3468_v54 }
 0x74c   : > { %v2413_v62 = vadd.f32 %v2409_v60, %v2405_v57  ;;  %v2394_v63 = vadd.f32 %v3470_v61, %v2243_v59 }
 0x74e   : > { %2417 = vst [vmem:[#allocation3] sm:$0xff] %v2413_v62  ;;  %v2410_v1 = vmul.f32 0.5, %v2394_v63  ;;  %2422 = sbr.rel (%p3303_p7) target bundleno = 2545 (0x9f1), region = 164 }
 0x750   : > { %v2414_v2 = vadd.f32 %v2410_v1, %v2406_v0 }
 0x752   : > { %2418 = vst [vmem:[#allocation3 + $0x18] sm:$0xff] %v2414_v2 }
 0x753   : > { %v3892_v3 = vld [vmem:[%s5267_s24 + $0x38] sm:$0xff]   ;;  %v4316_v4 = vmov 0.0   ;;  %v3893_v5 = vld [vmem:[%s5267_s24 + $0x30] sm:$0xff]   ;;  %vm4317_vm12 = vmmov 0   ;;  %v3894_v6 = vld [vmem:[%s5267_s24 + $0x28] sm:$0xff]  }
 0x754   : > { %3598 = vmatprep.subr.bf16.mxu0 %v4316_v4  ;;  %3618 = vmatprep.subr.bf16.mxu1 %v4316_v4  ;;  %v2423_v7 = vld [vmem:[#allocation2] sm:$0xff]  ;;  %v2424_v8 = vld [vmem:[#allocation2 + $0x8] sm:$0xff]  ;;  %v3896_v13 = vld [vmem:[%s5267_s24 + $0x18] sm:$0xff]  }
 0x755   : > { %3599 = vmatpush3.bf16.msra.mxu0 %v3892_v3  ;;  %3614 = vmatprep.mubr.msk.bf16.mxu0 %vm4317_vm12, %v4316_v4  ;;  %v2429_v9 = vadd.f32 %v2424_v8, %v2423_v7  ;;  %v3895_v10 = vld [vmem:[%s5267_s24 + $0x20] sm:$0xff]   ;;  %v3897_v31 = vld [vmem:[%s5267_s24 + $0x10] sm:$0xff]   ;;  %v3898_v20 = vld [vmem:[%s5267_s24 + $0x8] sm:$0xff]  }
 0x756   : > { %3600 = vmatprep.subr.bf16.mxu0 %v4316_v4  ;;  %3622 = vmatprep.mubr.msk.bf16.mxu1 %vm4317_vm12, %v4316_v4  ;;  %v3901_v11 = vld [vmem:[#allocation15 + $0x8] sm:$0xff]   ;;  %v3900_v25 = vld [vmem:[%s5268_s20 + $0x38] sm:$0xff]   ;;  %v3902_v27 = vld [vmem:[%s5268_s20 + $0x30] sm:$0xff]  }
 0x757   : > { %v2430_v12 = vrot.slane %v2429_v9, 4  ;;  %3619 = vmatpush3.bf16.msra.mxu1 %v3901_v11  ;;  %v3899_v22 = vld [vmem:[%s5267_s24] sm:$0xff]   ;;  %v3904_v33 = vld [vmem:[%s5268_s20 + $0x28] sm:$0xff]   ;;  %v3908_v38 = vld [vmem:[%s5268_s20 + $0x18] sm:$0xff]  }
 0x758   : > { %3620 = vmatprep.subr.bf16.mxu1 %v4316_v4  ;;  %v3903_v29 = vld [vmem:[#allocation15] sm:$0xff]   ;;  %v3910_v51 = vld [vmem:[%s5268_s20 + $0x10] sm:$0xff]   ;;  %v3912_v39 = vld [vmem:[%s5268_s20 + $0x8] sm:$0xff]  }
 0x759   : > { %3601 = vmatpush3.bf16.msra.mxu0 %v3893_v5  ;;  %v2431_v15 = vadd.f32 %v2430_v12, %v2429_v9  ;;  %v3906_v35 = vld [vmem:[%s5268_s20 + $0x20] sm:$0xff]   ;;  %v2425_v23 = vld [vmem:[#allocation3 + $0x8] sm:$0xff]  ;;  %v2427_v43 = vld [vmem:[#allocation3] sm:$0xff] }
 0x75a   : > { %3602 = vmatprep.subr.bf16.mxu0 %v4316_v4  ;;  %v3914_v40 = vld [vmem:[%s5268_s20] sm:$0xff]   ;;  %v2428_v36 = vld [vmem:[#allocation3 + $0x18] sm:$0xff]  ;;  %v2455_v37 = vld [vmem:[#allocation13] sm:$0x1] }
 0x75b   : > { %v2432_v16 = vrot.slane %v2431_v15, 2  ;;  %3621 = vmatpush3.bf16.msra.mxu1 %v3903_v29  ;;  %v2426_v41 = vld [vmem:[#allocation3 + $0x10] sm:$0xff]  ;;  %v2728_v44 = vpack.c.bf16 %v2428_v36, %v2427_v43  ;;  %v3905_v24 = vld [vmem:[%s5269_s10 + $0x38] sm:$0xff]   ;;  %v3907_v49 = vld [vmem:[%s5269_s10 + $0x30] sm:$0xff]  }
 0x75c   : > { %3626 = vmatprep.subr.bf16.mxu1 %v4316_v4  ;;  %v2727_v42 = vpack.c.bf16 %v2426_v41, %v2425_v23  ;;  %v3909_v50 = vld [vmem:[%s5269_s10 + $0x28] sm:$0xff]   ;;  %v3911_v52 = vld [vmem:[%s5269_s10 + $0x20] sm:$0xff]   ;;  %v3913_v53 = vld [vmem:[%s5269_s10 + $0x18] sm:$0xff]  }
 0x75d   : > { %3603 = vmatpush3.bf16.msra.mxu0 %v3894_v6  ;;  %v2433_v18 = vadd.f32 %v2432_v16, %v2431_v15  ;;  %v3915_v54 = vld [vmem:[%s5269_s10 + $0x10] sm:$0xff]   ;;  %v3916_v55 = vld [vmem:[%s5269_s10 + $0x8] sm:$0xff]   ;;  %v3917_v56 = vld [vmem:[%s5269_s10] sm:$0xff]  }
 0x75e   : > { %3604 = vmatprep.subr.bf16.mxu0 %v4316_v4  ;;  %v3918_v57 = vld [vmem:[#allocation19 + $0x8] sm:$0xff]   ;;  %v3919_v58 = vld [vmem:[#allocation19] sm:$0xff]   ;;  %v2550_v59 = vld [vmem:[#allocation16] sm:$0x1] }
 0x75f   : > { %v2434_v19 = vrot.slane %v2433_v18, 1  ;;  %v3331_v8 = vld [vmem:[#allocation18] ss:$0 sm:$0xff] }
 0x761   : > { %3605 = vmatpush3.bf16.msra.mxu0 %v3895_v10  ;;  %v2435_v28 = vadd.f32 %v2434_v19, %v2433_v18 }
 0x762   : > { %3606 = vmatprep.subr.bf16.mxu0 %v4316_v4 }
 0x763   : > { %v2437_v21 = vmul.f32 0.0625, %v2435_v28 }
 0x765   : > { %3607 = vmatpush3.bf16.msra.mxu0 %v3896_v13  ;;  %v5038_v26 = vpack.c.bf16 %v2437_v21, %v2437_v21 }
 0x766   : > { %3608 = vmatprep.subr.bf16.mxu0 %v4316_v4 }
 0x769   : > { %3609 = vmatpush3.bf16.msra.mxu0 %v3897_v31 }
 0x76a   : > { %3610 = vmatprep.subr.bf16.mxu0 %v4316_v4 }
 0x76d   : > { %3611 = vmatpush3.bf16.msra.mxu0 %v3898_v20 }
 0x76e   : > { %3612 = vmatprep.subr.bf16.mxu0 %v4316_v4 }
 0x771   : > { %3613 = vmatpush3.bf16.msra.mxu0 %v3899_v22 }
 0x772   : > { %3646 = vmatprep.subr.bf16.mxu0 %v3900_v25 }
 0x774   : > { %3615 = vmatmul.mubr.bf16.vlgmr.msra.gmra.mxu0 %v5038_v26 }
 0x775   : > { %3647 = vmatpush3.bf16.msra.mxu0 %v3900_v25  ;;  %3662 = vmatprep.mubr.bf16.mxu0 %v2727_v42 }
 0x776   : > { %3648 = vmatprep.subr.bf16.mxu0 %v3902_v27 }
 0x779   : > { %3649 = vmatpush3.bf16.msra.mxu0 %v3902_v27 }
 0x77a   : > { %3650 = vmatprep.subr.bf16.mxu0 %v3904_v33 }
 0x77d   : > { %3651 = vmatpush3.bf16.msra.mxu0 %v3904_v33 }
 0x77e   : > { %3652 = vmatprep.subr.bf16.mxu0 %v3906_v35 }
 0x781   : > { %3653 = vmatpush3.bf16.msra.mxu0 %v3906_v35 }
 0x782   : > { %3654 = vmatprep.subr.bf16.mxu0 %v3908_v38 }
 0x785   : > { %3655 = vmatpush3.bf16.msra.mxu0 %v3908_v38 }
 0x786   : > { %3656 = vmatprep.subr.bf16.mxu0 %v3910_v51 }
 0x789   : > { %3657 = vmatpush3.bf16.msra.mxu0 %v3910_v51 }
 0x78a   : > { %3658 = vmatprep.subr.bf16.mxu0 %v3912_v39 }
 0x78d   : > { %3659 = vmatpush3.bf16.msra.mxu0 %v3912_v39 }
 0x78e   : > { %3660 = vmatprep.subr.bf16.mxu0 %v3914_v40 }
 0x791   : > { %3661 = vmatpush3.bf16.msra.mxu0 %v3914_v40 }
 0x794   : > { %3663 = vmatmul.mubr.bf16.vlgmr.msra.gmra.mxu0 %v2728_v44 }
 0x834   : > { %v2538_v30 = vpop.f32.mrf.mxu0 }
 0x835   : > { %v2539_v45 = vadd.f32 %v2538_v30, %v2455_v37 }
 0x836   : > { %v3616_v14 = vpop.f32.mrf.mxu0 }
 0x837   : > { %v2544_v46 = vmax.f32 %v2539_v45, 0.0 }
 0x838   : > { %v2541_v17 = vpop.f32.mrf.mxu0 }
 0x839   : > { %v2549_v47 = vpack.c.bf16 %v2544_v46, %v2544_v46 }
 0x83a   : > { %v3617_v48 = vpop.f32.mrf.mxu0 }
 0x83b   : > { %3623 = vmatmul.mubr.msk.bf16.vlgmr.msra.gmra.mxu1 %vm1875_vm10, %v2549_v47 }
 0x83c   : > { %3627 = vmatpush3.bf16.msra.mxu1 %v3905_v24  ;;  %3642 = vmatprep.mubr.msk.bf16.mxu1 %vm4317_vm12, %v4316_v4 }
 0x83d   : > { %3628 = vmatprep.subr.bf16.mxu1 %v4316_v4 }
 0x840   : > { %3629 = vmatpush3.bf16.msra.mxu1 %v3907_v49 }
 0x841   : > { %3630 = vmatprep.subr.bf16.mxu1 %v4316_v4 }
 0x844   : > { %3631 = vmatpush3.bf16.msra.mxu1 %v3909_v50 }
 0x845   : > { %3632 = vmatprep.subr.bf16.mxu1 %v4316_v4 }
 0x848   : > { %3633 = vmatpush3.bf16.msra.mxu1 %v3911_v52 }
 0x849   : > { %3634 = vmatprep.subr.bf16.mxu1 %v4316_v4 }
 0x84c   : > { %3635 = vmatpush3.bf16.msra.mxu1 %v3913_v53 }
 0x84d   : > { %3636 = vmatprep.subr.bf16.mxu1 %v4316_v4 }
 0x850   : > { %3637 = vmatpush3.bf16.msra.mxu1 %v3915_v54 }
 0x851   : > { %3638 = vmatprep.subr.bf16.mxu1 %v4316_v4 }
 0x854   : > { %3639 = vmatpush3.bf16.msra.mxu1 %v3916_v55  ;;  %v3664_v1 = vpop.f32.mrf.mxu0 }
 0x855   : > { %3640 = vmatprep.subr.bf16.mxu1 %v4316_v4 }
 0x856   : > { %v2815_v2 = vpop.f32.mrf.mxu0 }
 0x858   : > { %3641 = vmatpush3.bf16.msra.mxu1 %v3917_v56  ;;  %v3665_v3 = vpop.f32.mrf.mxu0 }
 0x859   : > { %3666 = vmatprep.subr.bf16.mxu1 %v3918_v57 }
 0x85a   : > { %v2818_v6 = vpop.f32.mrf.mxu0 }
 0x85b   : > { %3643 = vmatmul.mubr.bf16.vlgmr.msra.gmra.mxu1 %v5038_v26 }
 0x85c   : > { %3667 = vmatpush3.bf16.msra.mxu1 %v3918_v57 }
 0x85d   : > { %3668 = vmatprep.subr.bf16.mxu1 %v3919_v58 }
 0x860   : > { %3669 = vmatpush3.bf16.msra.mxu1 %v3919_v58 }
 0x8fb   : > { %v2600_v60 = vpop.f32.mrf.mxu1 }
 0x8fc   : > { %v2601_v61 = vadd.f32 %v2600_v60, %v2550_v59 }
 0x8fd   : > { %v3624_v62 = vpop.f32.mrf.mxu1 }
 0x8fe   : > { %2606 = vst [vmem:[#allocation22] sm:$0x1] %v2601_v61 }
 0x8ff   : > { %v2603_v63 = vpop.f32.mrf.mxu1 }
 0x901   : > { %v3625_v0 = vpop.f32.mrf.mxu1 }
 0x91b   : > { %v2705_v4 = vpop.f32.mrf.mxu1 }
 0x91c   : > { %v2732_v5 = vrot.slane %v2705_v4, %v1537_v34  ;;  %v3332_v34 = vld [vmem:[#allocation21] ss:$0 sm:$0xff] }
 0x91d   : > { %v3644_v7 = vpop.f32.mrf.mxu1 }
 0x91e   : > { %v2824_v9 = vadd.f32 %v3664_v1, %v2732_v5  ;;  %v2827_v10 = vadd.f32 %v3665_v3, %v2732_v5  ;;  %v2816_v11 = vadd.f32 %v2815_v2, %v2732_v5  ;;  %v2819_v12 = vadd.f32 %v2818_v6, %v2732_v5 }
 0x91f   : > { %v2708_v13 = vpop.f32.mrf.mxu1 }
 0x920   : > { %v2837_v15 = vadd.f32 %v3331_v8, %v2816_v11  ;;  %v2838_v16 = vadd.f32 %v3331_v8, %v2819_v12  ;;  %v2839_v31 = vadd.f32 %v3331_v8, %v2824_v9  ;;  %v2840_v18 = vadd.f32 %v3331_v8, %v2827_v10 }
 0x921   : > { %v3645_v19 = vpop.f32.mrf.mxu1 }
 0x922   : > { %v2841_v20 = vmax.f32 %v2837_v15, 0.0  ;;  %v2842_v28 = vmax.f32 %v2838_v16, 0.0  ;;  %v2843_v21 = vmax.f32 %v2839_v31, 0.0  ;;  %v2844_v22 = vmax.f32 %v2840_v18, 0.0 }
 0x924   : > { %v2849_v25 = vpack.c.bf16 %v2842_v28, %v2841_v20  ;;  %v2850_v32 = vpack.c.bf16 %v2844_v22, %v2843_v21 }
 0x926   : > { %3670 = vmatprep.mubr.msk.bf16.mxu1 %vm1875_vm10, %v2849_v25 }
 0x927   : > { %3671 = vmatmul.mubr.msk.bf16.vlgmr.msra.gmra.mxu1 %vm1875_vm10, %v2850_v32 }
 0x9e7   : > { %v3672_v26 = vpop.f32.mrf.mxu1 }
 0x9e8   : > { %v2919_v27 = vadd.f32 %v3672_v26, %v3332_v34 }
 0x9e9   : > { %v2910_v29 = vpop.f32.mrf.mxu1 }
 0x9ea   : > { %2927 = vst [vmem:[%s5270_s13 + $0x10] sm:$0xff] %v2919_v27  ;;  %v2911_v33 = vadd.f32 %v3332_v34, %v2910_v29 }
 0x9eb   : > { %v3673_v35 = vpop.f32.mrf.mxu1 }
 0x9ec   : > { %2925 = vst [vmem:[%s5270_s13] sm:$0xff] %v2911_v33  ;;  %v2922_v38 = vadd.f32 %v3673_v35, %v3332_v34 }
 0x9ed   : > { %v2913_v51 = vpop.f32.mrf.mxu1 }
 0x9ee   : > { %2928 = vst [vmem:[%s5270_s13 + $0x18] sm:$0xff] %v2922_v38  ;;  %v2914_v39 = vadd.f32 %v3332_v34, %v2913_v51 }
 0x9f0   : > { %2926 = vst [vmem:[%s5270_s13 + $0x8] sm:$0xff] %v2914_v39 }
 0x9f1 PF: > { %p3760_p0 = scmp.eq.s32.totalorder %s4465_s29, 1  ;;  %s4318_s28 = smov [#allocation22]  }
 0x9f2   : > { %s2936_s5 = sshll.u32 %s4318_s28, 4  ;;  %s2937_s5 = int_to_ptr.vmem [resolvable:$true] %s2936_s5 }
 0x9f3   : > { %s4216_s7 = scalar_lea.vmem %s2937_s5, 16  ;;  %s4222_s27 = scalar_lea.vmem %s2937_s5, 32 }
 0x9f4   : > { %p4217_p2 = scmp.ne.s32.totalorder %s2937_s5, %s4216_s7  ;;  %p4223_p8 = scmp.lt.s32.totalorder %s2937_s5, %s2937_s5 }
 0x9f5   : > { %p4224_p4 = scmp.lt.s32.totalorder %s4222_s27, %s4216_s7 }
 0x9f6   : > { %p4218_p5 = pnand %p4217_p2, %p3760_p0 }
 0x9f7   : > { %p4225_p9 = por %p4224_p4, %p4223_p8 }
 0x9f8   : > { %p4219_p1 = pneg %p4218_p5 }
 0x9fa   : > { %p4226_p10 = pnand %p4225_p9, %p4219_p1 }
 0x9fc   : > { %4229 = shalt.err (!%p4226_p10)
}
 0x9fd   : > { %s5271_s23 = sld [smem:[#allocation55_spill]] }
 0xa03   : > { %3709 = dma.vmem_to_hbm [thread:$0]  (%p3760_p0), %s2937_s5, 16, %s5271_s23, [#allocation6]  }
 0xa04   : > { %4281 = dma.done.wait (%p3760_p0), [#allocation6], 16  }
 0xa05   : > { %4283 = vsyncadd (%p3760_p0), [#allocation6], 4294967280 }
 0xa06 PF: > { %s5272_s28 = sld [smem:[#allocation31_spill]]  ;;  %s5275_s5 = smov %s4290_s26 }
 0xa07   : > { %s5273_s9 = sld [smem:[#allocation30_spill]] }
 0xa08   : > { %s5274_s27 = sld [smem:[#allocation32_spill]] }
 0xa0c   : > { %p45_p12 = scmp.ge.s32.totalorder %s5272_s28, 4  }
 0xa0d   : > { %s5276_s26 = smov %s5273_s9 }
 0xa0e   :  { %47 = sbr.rel (!%p45_p12) target bundleno = 36 (0x24), region = 249 }
 0xa13   :  { %2955 = vsyncpa [#allocation5], 1 }
 0xa14   :  { %2957 = vsyncpa [#allocation5 + $0x1], 1 }
 0xa15   :  { %2958 = vsyncpa [#allocation8], 1 }
 0xa16   :  { %2960 = vsyncpa [#allocation8 + $0x1], 1 }
 0xa17   :  { %2961 = vsyncpa [#allocation11], 1 }
 0xa18   :  { %2963 = vsyncpa [#allocation11 + $0x1], 1 }
 0xa19   :  { %2964 = vsyncpa [#allocation14], 1 }
 0xa1a   :  { %2965 = vsyncpa [#allocation17], 1 }
 0xa1b   :  { %2966 = vsyncpa [#allocation20], 1 }
 0xa1c   :  { %2967 = vsyncpa [#allocation6], 1 }
 0xa1d   :  { %2969 = vsyncpa [#allocation6 + $0x1], 1 }

</bundles_post_ra>
